<compile_context>
chip_gen: v5e
topology: v5e:2x2
jax: 0.10.0
libtpu: 0.0.40
codegen_flags: <defaults>
</compile_context>

<pallas_src>
from functools import partial

import jax
import jax.numpy as jnp
from jax import lax
from jax.experimental import pallas as pl
from jax.experimental.pallas import tpu as pltpu

LANE = 128  # pad all output-channel dims to this many lanes (v5e MXU width)


# ----------------------------------------------------------------------------
# small helpers
# ----------------------------------------------------------------------------
def _round_up(n, m):
    return ((n + m - 1) // m) * m


def _pad2(a, rows, cols):
    r, c = a.shape
    return jnp.pad(a, ((0, rows - r), (0, cols - c)))


def _prep_conv(w_oihw, b, c_in_pad, c_out_pad, dtype):
    """PyTorch (C_out, C_in, 3, 3) weight -> per-vertical-tap (3, 3*C_in_pad, C_out_pad)."""
    co, ci, _, _ = w_oihw.shape
    w = jnp.pad(w_oihw, ((0, c_out_pad - co), (0, c_in_pad - ci), (0, 0), (0, 0)))
    # (kh, kw, c_in, c_out) -> flatten (kw, c_in), matching the in-kernel W-tap concat.
    wk = jnp.transpose(w, (2, 3, 1, 0)).reshape(3, 3 * c_in_pad, c_out_pad).astype(dtype)
    bp = jnp.pad(b, (0, c_out_pad - co)).reshape(1, c_out_pad).astype(jnp.float32)
    return wk, bp


# ----------------------------------------------------------------------------
# in-kernel conv building blocks (everything stays in VMEM / vregs)
# ----------------------------------------------------------------------------
def _pad_hw1(x):
    """(H, W, C) -> (H+2, W+2, C) with a zero border (conv pad=1), built in VMEM."""
    h, w, c = x.shape
    zr = jnp.zeros((1, w, c), x.dtype)
    x = jnp.concatenate([zr, x, zr], axis=0)
    zc = jnp.zeros((h + 2, 1, c), x.dtype)
    return jnp.concatenate([zc, x, zc], axis=1)


def _conv3x3_plane(xpad, w_ref, H, W):
    """3x3 conv (stride 1) over a padded plane.

    xpad: (H+2, W+2, C) bf16; w_ref: (3, 3*C, Co) bf16 ref.
    Vertical taps are a static unrolled loop; horizontal taps are concatenated
    on the lane axis so each MXU op is (H*W, 3C) @ (3C, Co) with f32 accumulation.
    Returns (H*W, Co) f32.
    """
    c = xpad.shape[-1]
    acc = None
    for kh in range(3):                       # static unroll -> no extra grid axis
        rows = xpad[kh:kh + H]                # (H, W+2, C)
        xk = jnp.concatenate([rows[:, kw:kw + W, :] for kw in range(3)], axis=-1)
        xk = xk.reshape(H * W, 3 * c)         # row-major (y, x) matches weight layout
        part = jnp.dot(xk, w_ref[kh], preferred_element_type=jnp.float32)
        acc = part if acc is None else acc + part
    return acc


# ----------------------------------------------------------------------------
# Kernel A: conv1 3x3 + bias + ReLU, whole plane per image
# ----------------------------------------------------------------------------
def _conv1_kernel(x_ref, w_ref, b_ref, o_ref, *, H, W):
    xpad = _pad_hw1(x_ref[0])                                  # halo built in VMEM
    acc = _conv3x3_plane(xpad, w_ref, H, W)                    # (H*W, C1p) f32
    y = jnp.maximum(acc + b_ref[...], 0.0)                     # bias + ReLU (f32)
    o_ref[0] = y.reshape(H, W, -1).astype(o_ref.dtype)


def conv1_layer(x_nhwc, wk, bias, *, compute_dtype=jnp.bfloat16):
    N, H, W, C = x_nhwc.shape
    Co = wk.shape[-1]
    return pl.pallas_call(
        partial(_conv1_kernel, H=H, W=W),
        out_shape=jax.ShapeDtypeStruct((N, H, W, Co), compute_dtype),
        grid=(N,),
        in_specs=[
            pl.BlockSpec((1, H, W, C), lambda n: (n, 0, 0, 0)),
            pl.BlockSpec(wk.shape, lambda n: (0, 0, 0)),       # constant -> loaded once
            pl.BlockSpec(bias.shape, lambda n: (0, 0)),
        ],
        out_specs=pl.BlockSpec((1, H, W, Co), lambda n: (n, 0, 0, 0)),
        compiler_params=pltpu.CompilerParams(
            dimension_semantics=("parallel",),
            vmem_limit_bytes=32 * 1024 * 1024),
    )(x_nhwc.astype(compute_dtype), wk, bias)


# ----------------------------------------------------------------------------
# Kernel B: conv2 + bias + ReLU + lwhiten + GeM + L2N + whiten + L2N, fused
# ----------------------------------------------------------------------------
def _conv2_gem_head_kernel(x_ref, w_ref, b_ref, wl_ref, bl_ref, ww_ref, bw_ref,
                           o_ref, *, H, W, c_valid, p, gem_eps, l2n_eps,
                           compute_dtype):
    xpad = _pad_hw1(x_ref[0])
    acc = _conv3x3_plane(xpad, w_ref, H, W)                    # (H*W, C2p) f32
    h = jnp.maximum(acc + b_ref[...], 0.0)                     # bias + ReLU

    # per-location local whitening (1x1 linear), bf16 operands / f32 accumulate
    lw = jnp.dot(h.astype(compute_dtype), wl_ref[...],
                 preferred_element_type=jnp.float32) + bl_ref[...]   # (H*W, Clwp)

    # GeM pooling over the whole plane (feature map never leaves VMEM)
    xc = jnp.maximum(lw, gem_eps)                              # clamp(min=eps)
    xpw = xc * xc * xc if p == 3.0 else jnp.power(xc, p)       # VPU cubes, no pow
    pooled = jnp.sum(xpw, axis=0, keepdims=True) * (1.0 / float(H * W))  # (1, Clwp)
    pooled = jnp.power(pooled, 1.0 / p)

    # zero the lane-padding channels so they don't perturb the L2 norm
    lane = lax.broadcasted_iota(jnp.int32, pooled.shape, 1)
    pooled = jnp.where(lane < c_valid, pooled, 0.0)
    nrm = jnp.sqrt(jnp.sum(pooled * pooled, axis=-1, keepdims=True))
    pooled = pooled / (nrm + l2n_eps)                          # L2N

    # whitening linear + final L2N
    v = jnp.dot(pooled.astype(compute_dtype), ww_ref[...],
                preferred_element_type=jnp.float32) + bw_ref[...]
    nrm2 = jnp.sqrt(jnp.sum(v * v, axis=-1, keepdims=True))
    o_ref[0] = (v / (nrm2 + l2n_eps)).astype(o_ref.dtype)      # (1, ODp)


def conv2_gem_whiten_head(x_nhwc, wk, bias, wl, bl, ww, bw, *, c_valid, p,
                          gem_eps, l2n_eps, compute_dtype=jnp.bfloat16):
    N, H, W, C = x_nhwc.shape
    OD = ww.shape[-1]
    kernel = partial(_conv2_gem_head_kernel, H=H, W=W, c_valid=c_valid, p=p,
                     gem_eps=gem_eps, l2n_eps=l2n_eps, compute_dtype=compute_dtype)
    return pl.pallas_call(
        kernel,
        out_shape=jax.ShapeDtypeStruct((N, 1, OD), jnp.float32),
        grid=(N,),
        in_specs=[
            pl.BlockSpec((1, H, W, C), lambda n: (n, 0, 0, 0)),
            pl.BlockSpec(wk.shape, lambda n: (0, 0, 0)),       # constant -> loaded once
            pl.BlockSpec(bias.shape, lambda n: (0, 0)),
            pl.BlockSpec(wl.shape, lambda n: (0, 0)),
            pl.BlockSpec(bl.shape, lambda n: (0, 0)),
            pl.BlockSpec(ww.shape, lambda n: (0, 0)),
            pl.BlockSpec(bw.shape, lambda n: (0, 0)),
        ],
        out_specs=pl.BlockSpec((1, 1, OD), lambda n: (n, 0, 0)),
        compiler_params=pltpu.CompilerParams(
            dimension_semantics=("parallel",),
            vmem_limit_bytes=32 * 1024 * 1024),
    )(x_nhwc, wk, bias, wl, bl, ww, bw)


# ----------------------------------------------------------------------------
# ImageRetrievalNet forward
# ----------------------------------------------------------------------------
def image_retrieval_net_forward(x_nchw, params, *, p=3.0, gem_eps=1e-6,
                                l2n_eps=1e-6, compute_dtype=jnp.bfloat16):
    """Mirrors ImageRetrievalNet.forward (features -> lwhiten -> GeM -> L2N ->
    whiten -> L2N -> permute(1, 0)).  Returns (outputdim, batch) in f32."""
    N, C_in, H, W = x_nchw.shape
    x = jnp.transpose(x_nchw, (0, 2, 3, 1))                    # NCHW -> NHWC (layout glue)

    (w1, b1), (w2, b2) = params["features"]
    wl, bl = params["lwhiten"]        # (C_lw, C2), (C_lw,)
    ww, bw = params["whiten"]         # (outdim, C_lw), (outdim,)

    C1, C2 = w1.shape[0], w2.shape[0]
    C_lw, outdim = wl.shape[0], ww.shape[0]
    C1p, C2p = _round_up(C1, LANE), _round_up(C2, LANE)
    Clwp, ODp = _round_up(C_lw, LANE), _round_up(outdim, LANE)

    # self.features[0]: conv3x3 + ReLU
    wk1, bp1 = _prep_conv(w1, b1, C_in, C1p, compute_dtype)
    h1 = conv1_layer(x, wk1, bp1, compute_dtype=compute_dtype)             # (N,H,W,C1p) bf16

    # self.features[1] + lwhiten + pool + norm + whiten + norm, all fused
    wk2, bp2 = _prep_conv(w2, b2, C1p, C2p, compute_dtype)
    wl_p = _pad2(wl.T, C2p, Clwp).astype(compute_dtype)                    # (C2p, Clwp)
    bl_p = jnp.pad(bl, (0, Clwp - C_lw)).reshape(1, Clwp).astype(jnp.float32)
    ww_p = _pad2(ww.T, Clwp, ODp).astype(compute_dtype)                    # bf16 MXU path
    bw_p = jnp.pad(bw, (0, ODp - outdim)).reshape(1, ODp).astype(jnp.float32)

    v = conv2_gem_whiten_head(h1, wk2, bp2, wl_p, bl_p, ww_p, bw_p,
                              c_valid=C_lw, p=p, gem_eps=gem_eps,
                              l2n_eps=l2n_eps, compute_dtype=compute_dtype)  # (N,1,ODp)

    # o.permute(1, 0): tiny (N, outdim) slice + transpose done in XLA.
    return v[:, 0, :outdim].T                                              # (outdim, N)


# ----------------------------------------------------------------------------
# Deterministic synthetic parameters
# ----------------------------------------------------------------------------
def init_params(key):
    c_in, c1, c2 = 4, 8, 16          # backbone channels
    lw_out = 16                      # local whitening out_features
    out_dim = 32                     # whitening out_features (meta['outputdim'])
    keys = jax.random.split(key, 8)

    def nrm(k, shape, scale=0.1):
        return (scale * jax.random.normal(k, shape)).astype(jnp.float32)

    return {
        "features": [
            (nrm(keys[0], (c1, c_in, 3, 3)), nrm(keys[1], (c1,))),
            (nrm(keys[2], (c2, c1, 3, 3)), nrm(keys[3], (c2,))),
        ],
        "lwhiten": (nrm(keys[4], (lw_out, c2)), nrm(keys[5], (lw_out,))),
        "whiten": (nrm(keys[6], (out_dim, lw_out)), nrm(keys[7], (out_dim,))),
    }


if __name__ == "__main__":
    key = jax.random.PRNGKey(0)
    kx, kp = jax.random.split(key)

    x = jax.random.normal(kx, (2, 4, 16, 16), dtype=jnp.float32)   # NCHW, like PyTorch
    params = init_params(kp)

    fwd = jax.jit(image_retrieval_net_forward)
    out = jax.block_until_ready(fwd(x, params))

    assert out.shape == (32, 2), out.shape                          # (outputdim, batch)
    assert bool(jnp.all(jnp.isfinite(out)))
    # columns of `out` are L2-normalized per image
    col_norms = jnp.sqrt(jnp.sum(out * out, axis=0))
    assert bool(jnp.all(jnp.abs(col_norms - 1.0) < 1e-3))
    print("KERNEL_OK")
</pallas_src>

<mosaic_0001>
module attributes {stable_mosaic.version = 11 : i64} {
  func.func @_conv1_kernel(%arg0: i32, %arg1: memref<1x16x16x4xbf16, #tpu.memory_space<vmem>>, %arg2: memref<3x12x128xbf16, #tpu.memory_space<vmem>>, %arg3: memref<1x128xf32, #tpu.memory_space<vmem>>, %arg4: memref<1x16x16x128xbf16, #tpu.memory_space<vmem>>) attributes {dimension_semantics = [#tpu.dimension_semantics<parallel>], iteration_bounds = array<i64: 2>, scalar_prefetch = 0 : i64, scratch_operands = 0 : i64, tpu.core_type = #tpu.core_type<tc>, window_params = [{transform_indices = @transform_0, window_bounds = array<i64: 1, 16, 16, 4>}, {pipeline_mode = #tpu.pipeline_mode<synchronous>, transform_indices = @transform_1, window_bounds = array<i64: 3, 12, 128>}, {pipeline_mode = #tpu.pipeline_mode<synchronous>, transform_indices = @transform_2, window_bounds = array<i64: 1, 128>}, {transform_indices = @transform_3, window_bounds = array<i64: 1, 16, 16, 128>}]} {
    %c0 = arith.constant 0 : index
    %c0_0 = arith.constant 0 : index
    %c0_1 = arith.constant 0 : index
    %c0_2 = arith.constant 0 : index
    %0 = vector.load %arg1[%c0, %c0_0, %c0_1, %c0_2] : memref<1x16x16x4xbf16, #tpu.memory_space<vmem>>, vector<1x16x16x4xbf16>
    %1 = vector.shape_cast %0 : vector<1x16x16x4xbf16> to vector<16x16x4xbf16>
    %cst = arith.constant 0.000000e+00 : bf16
    %2 = vector.broadcast %cst : bf16 to vector<1x16x4xbf16>
    %3 = tpu.concatenate %2, %1, %2 in 0 : vector<1x16x4xbf16>, vector<16x16x4xbf16>, vector<1x16x4xbf16> -> vector<18x16x4xbf16>
    %cst_3 = arith.constant 0.000000e+00 : bf16
    %4 = vector.broadcast %cst_3 : bf16 to vector<18x1x4xbf16>
    %5 = tpu.concatenate %4, %3, %4 in 1 : vector<18x1x4xbf16>, vector<18x16x4xbf16>, vector<18x1x4xbf16> -> vector<18x18x4xbf16>
    %6 = vector.extract_strided_slice %5 {offsets = [0, 0, 0], sizes = [16, 18, 4], strides = [1, 1, 1]} : vector<18x18x4xbf16> to vector<16x18x4xbf16>
    %7 = vector.extract_strided_slice %6 {offsets = [0, 0, 0], sizes = [16, 16, 4], strides = [1, 1, 1]} : vector<16x18x4xbf16> to vector<16x16x4xbf16>
    %8 = vector.extract_strided_slice %6 {offsets = [0, 1, 0], sizes = [16, 16, 4], strides = [1, 1, 1]} : vector<16x18x4xbf16> to vector<16x16x4xbf16>
    %9 = vector.extract_strided_slice %6 {offsets = [0, 2, 0], sizes = [16, 16, 4], strides = [1, 1, 1]} : vector<16x18x4xbf16> to vector<16x16x4xbf16>
    %10 = tpu.concatenate %7, %8, %9 in 2 : vector<16x16x4xbf16>, vector<16x16x4xbf16>, vector<16x16x4xbf16> -> vector<16x16x12xbf16>
    %11 = vector.shape_cast %10 : vector<16x16x12xbf16> to vector<256x12xbf16>
    %c0_4 = arith.constant 0 : index
    %c0_5 = arith.constant 0 : index
    %c0_6 = arith.constant 0 : index
    %12 = vector.load %arg2[%c0_4, %c0_5, %c0_6] : memref<3x12x128xbf16, #tpu.memory_space<vmem>>, vector<1x12x128xbf16>
    %13 = vector.shape_cast %12 : vector<1x12x128xbf16> to vector<12x128xbf16>
    %cst_7 = arith.constant dense<0.000000e+00> : vector<256x128xf32>
    %14 = tpu.matmul %11, %13, %cst_7 {dimension_numbers = #tpu.dot_dimension_numbers<[1], [0], [0], [1], [0, 0, 1, 1], [], []>} : vector<256x12xbf16>, vector<12x128xbf16>, vector<256x128xf32> -> vector<256x128xf32>
    %15 = vector.extract_strided_slice %5 {offsets = [1, 0, 0], sizes = [16, 18, 4], strides = [1, 1, 1]} : vector<18x18x4xbf16> to vector<16x18x4xbf16>
    %16 = vector.extract_strided_slice %15 {offsets = [0, 0, 0], sizes = [16, 16, 4], strides = [1, 1, 1]} : vector<16x18x4xbf16> to vector<16x16x4xbf16>
    %17 = vector.extract_strided_slice %15 {offsets = [0, 1, 0], sizes = [16, 16, 4], strides = [1, 1, 1]} : vector<16x18x4xbf16> to vector<16x16x4xbf16>
    %18 = vector.extract_strided_slice %15 {offsets = [0, 2, 0], sizes = [16, 16, 4], strides = [1, 1, 1]} : vector<16x18x4xbf16> to vector<16x16x4xbf16>
    %19 = tpu.concatenate %16, %17, %18 in 2 : vector<16x16x4xbf16>, vector<16x16x4xbf16>, vector<16x16x4xbf16> -> vector<16x16x12xbf16>
    %20 = vector.shape_cast %19 : vector<16x16x12xbf16> to vector<256x12xbf16>
    %c1 = arith.constant 1 : index
    %c0_8 = arith.constant 0 : index
    %c0_9 = arith.constant 0 : index
    %21 = vector.load %arg2[%c1, %c0_8, %c0_9] : memref<3x12x128xbf16, #tpu.memory_space<vmem>>, vector<1x12x128xbf16>
    %22 = vector.shape_cast %21 : vector<1x12x128xbf16> to vector<12x128xbf16>
    %cst_10 = arith.constant dense<0.000000e+00> : vector<256x128xf32>
    %23 = tpu.matmul %20, %22, %cst_10 {dimension_numbers = #tpu.dot_dimension_numbers<[1], [0], [0], [1], [0, 0, 1, 1], [], []>} : vector<256x12xbf16>, vector<12x128xbf16>, vector<256x128xf32> -> vector<256x128xf32>
    %24 = arith.addf %14, %23 : vector<256x128xf32>
    %25 = vector.extract_strided_slice %5 {offsets = [2, 0, 0], sizes = [16, 18, 4], strides = [1, 1, 1]} : vector<18x18x4xbf16> to vector<16x18x4xbf16>
    %26 = vector.extract_strided_slice %25 {offsets = [0, 0, 0], sizes = [16, 16, 4], strides = [1, 1, 1]} : vector<16x18x4xbf16> to vector<16x16x4xbf16>
    %27 = vector.extract_strided_slice %25 {offsets = [0, 1, 0], sizes = [16, 16, 4], strides = [1, 1, 1]} : vector<16x18x4xbf16> to vector<16x16x4xbf16>
    %28 = vector.extract_strided_slice %25 {offsets = [0, 2, 0], sizes = [16, 16, 4], strides = [1, 1, 1]} : vector<16x18x4xbf16> to vector<16x16x4xbf16>
    %29 = tpu.concatenate %26, %27, %28 in 2 : vector<16x16x4xbf16>, vector<16x16x4xbf16>, vector<16x16x4xbf16> -> vector<16x16x12xbf16>
    %30 = vector.shape_cast %29 : vector<16x16x12xbf16> to vector<256x12xbf16>
    %c2 = arith.constant 2 : index
    %c0_11 = arith.constant 0 : index
    %c0_12 = arith.constant 0 : index
    %31 = vector.load %arg2[%c2, %c0_11, %c0_12] : memref<3x12x128xbf16, #tpu.memory_space<vmem>>, vector<1x12x128xbf16>
    %32 = vector.shape_cast %31 : vector<1x12x128xbf16> to vector<12x128xbf16>
    %cst_13 = arith.constant dense<0.000000e+00> : vector<256x128xf32>
    %33 = tpu.matmul %30, %32, %cst_13 {dimension_numbers = #tpu.dot_dimension_numbers<[1], [0], [0], [1], [0, 0, 1, 1], [], []>} : vector<256x12xbf16>, vector<12x128xbf16>, vector<256x128xf32> -> vector<256x128xf32>
    %34 = arith.addf %24, %33 : vector<256x128xf32>
    %c0_14 = arith.constant 0 : index
    %c0_15 = arith.constant 0 : index
    %35 = vector.load %arg3[%c0_14, %c0_15] : memref<1x128xf32, #tpu.memory_space<vmem>>, vector<1x128xf32>
    %36 = vector.broadcast %35 : vector<1x128xf32> to vector<256x128xf32>
    %37 = arith.addf %34, %36 : vector<256x128xf32>
    %cst_16 = arith.constant 0.000000e+00 : f32
    %38 = vector.broadcast %cst_16 : f32 to vector<256x128xf32>
    %39 = arith.maximumf %37, %38 : vector<256x128xf32>
    %40 = vector.shape_cast %39 : vector<256x128xf32> to vector<16x16x128xf32>
    %41 = arith.truncf %40 : vector<16x16x128xf32> to vector<16x16x128xbf16>
    %c0_17 = arith.constant 0 : index
    %c0_18 = arith.constant 0 : index
    %c0_19 = arith.constant 0 : index
    %c0_20 = arith.constant 0 : index
    %42 = vector.load %arg4[%c0_17, %c0_18, %c0_19, %c0_20] : memref<1x16x16x128xbf16, #tpu.memory_space<vmem>>, vector<1x16x16x128xbf16>
    %43 = vector.shape_cast %42 : vector<1x16x16x128xbf16> to vector<16x16x128xbf16>
    %44 = vector.shape_cast %41 : vector<16x16x128xbf16> to vector<1x16x16x128xbf16>
    tpu.vector_store %arg4[%c0_17, %c0_18, %c0_19, %c0_20], %44 {strides = array<i32>} : memref<1x16x16x128xbf16, #tpu.memory_space<vmem>>, vector<1x16x16x128xbf16>,
    return
  }
  func.func @transform_0(%arg0: i32) -> (i32, i32, i32, i32) {
    %c0_i32 = arith.constant 0 : i32
    %c0_i32_0 = arith.constant 0 : i32
    %c0_i32_1 = arith.constant 0 : i32
    %c0_i32_2 = arith.constant 0 : i32
    return %arg0, %c0_i32, %c0_i32_0, %c0_i32_1 : i32, i32, i32, i32
  }
  func.func @transform_1(%arg0: i32) -> (i32, i32, i32) {
    %c0_i32 = arith.constant 0 : i32
    %c0_i32_0 = arith.constant 0 : i32
    %c0_i32_1 = arith.constant 0 : i32
    %c0_i32_2 = arith.constant 0 : i32
    return %c0_i32, %c0_i32_0, %c0_i32_1 : i32, i32, i32
  }
  func.func @transform_2(%arg0: i32) -> (i32, i32) {
    %c0_i32 = arith.constant 0 : i32
    %c0_i32_0 = arith.constant 0 : i32
    %c0_i32_1 = arith.constant 0 : i32
    return %c0_i32, %c0_i32_0 : i32, i32
  }
  func.func @transform_3(%arg0: i32) -> (i32, i32, i32, i32) {
    %c0_i32 = arith.constant 0 : i32
    %c0_i32_0 = arith.constant 0 : i32
    %c0_i32_1 = arith.constant 0 : i32
    %c0_i32_2 = arith.constant 0 : i32
    return %arg0, %c0_i32, %c0_i32_0, %c0_i32_1 : i32, i32, i32, i32
  }
}

module attributes {stable_mosaic.version = 11 : i64} {
  func.func @_conv2_gem_head_kernel(%arg0: i32, %arg1: memref<1x16x16x128xbf16, #tpu.memory_space<vmem>>, %arg2: memref<3x384x128xbf16, #tpu.memory_space<vmem>>, %arg3: memref<1x128xf32, #tpu.memory_space<vmem>>, %arg4: memref<128x128xbf16, #tpu.memory_space<vmem>>, %arg5: memref<1x128xf32, #tpu.memory_space<vmem>>, %arg6: memref<128x128xbf16, #tpu.memory_space<vmem>>, %arg7: memref<1x128xf32, #tpu.memory_space<vmem>>, %arg8: memref<1x1x128xf32, #tpu.memory_space<vmem>>) attributes {dimension_semantics = [#tpu.dimension_semantics<parallel>], iteration_bounds = array<i64: 2>, scalar_prefetch = 0 : i64, scratch_operands = 0 : i64, tpu.core_type = #tpu.core_type<tc>, window_params = [{transform_indices = @transform_0, window_bounds = array<i64: 1, 16, 16, 128>}, {pipeline_mode = #tpu.pipeline_mode<synchronous>, transform_indices = @transform_1, window_bounds = array<i64: 3, 384, 128>}, {pipeline_mode = #tpu.pipeline_mode<synchronous>, transform_indices = @transform_2, window_bounds = array<i64: 1, 128>}, {pipeline_mode = #tpu.pipeline_mode<synchronous>, transform_indices = @transform_3, window_bounds = array<i64: 128, 128>}, {pipeline_mode = #tpu.pipeline_mode<synchronous>, transform_indices = @transform_4, window_bounds = array<i64: 1, 128>}, {pipeline_mode = #tpu.pipeline_mode<synchronous>, transform_indices = @transform_5, window_bounds = array<i64: 128, 128>}, {pipeline_mode = #tpu.pipeline_mode<synchronous>, transform_indices = @transform_6, window_bounds = array<i64: 1, 128>}, {transform_indices = @transform_7, window_bounds = array<i64: 1, 1, 128>}]} {
    %c0 = arith.constant 0 : index
    %c0_0 = arith.constant 0 : index
    %c0_1 = arith.constant 0 : index
    %c0_2 = arith.constant 0 : index
    %0 = vector.load %arg1[%c0, %c0_0, %c0_1, %c0_2] : memref<1x16x16x128xbf16, #tpu.memory_space<vmem>>, vector<1x16x16x128xbf16>
    %1 = vector.shape_cast %0 : vector<1x16x16x128xbf16> to vector<16x16x128xbf16>
    %cst = arith.constant 0.000000e+00 : bf16
    %2 = vector.broadcast %cst : bf16 to vector<1x16x128xbf16>
    %3 = tpu.concatenate %2, %1, %2 in 0 : vector<1x16x128xbf16>, vector<16x16x128xbf16>, vector<1x16x128xbf16> -> vector<18x16x128xbf16>
    %cst_3 = arith.constant 0.000000e+00 : bf16
    %4 = vector.broadcast %cst_3 : bf16 to vector<18x1x128xbf16>
    %5 = tpu.concatenate %4, %3, %4 in 1 : vector<18x1x128xbf16>, vector<18x16x128xbf16>, vector<18x1x128xbf16> -> vector<18x18x128xbf16>
    %6 = vector.extract_strided_slice %5 {offsets = [0, 0, 0], sizes = [16, 18, 128], strides = [1, 1, 1]} : vector<18x18x128xbf16> to vector<16x18x128xbf16>
    %7 = vector.extract_strided_slice %6 {offsets = [0, 0, 0], sizes = [16, 16, 128], strides = [1, 1, 1]} : vector<16x18x128xbf16> to vector<16x16x128xbf16>
    %8 = vector.extract_strided_slice %6 {offsets = [0, 1, 0], sizes = [16, 16, 128], strides = [1, 1, 1]} : vector<16x18x128xbf16> to vector<16x16x128xbf16>
    %9 = vector.extract_strided_slice %6 {offsets = [0, 2, 0], sizes = [16, 16, 128], strides = [1, 1, 1]} : vector<16x18x128xbf16> to vector<16x16x128xbf16>
    %10 = tpu.concatenate %7, %8, %9 in 2 : vector<16x16x128xbf16>, vector<16x16x128xbf16>, vector<16x16x128xbf16> -> vector<16x16x384xbf16>
    %11 = vector.shape_cast %10 : vector<16x16x384xbf16> to vector<256x384xbf16>
    %c0_4 = arith.constant 0 : index
    %c0_5 = arith.constant 0 : index
    %c0_6 = arith.constant 0 : index
    %12 = vector.load %arg2[%c0_4, %c0_5, %c0_6] : memref<3x384x128xbf16, #tpu.memory_space<vmem>>, vector<1x384x128xbf16>
    %13 = vector.shape_cast %12 : vector<1x384x128xbf16> to vector<384x128xbf16>
    %cst_7 = arith.constant dense<0.000000e+00> : vector<256x128xf32>
    %14 = tpu.matmul %11, %13, %cst_7 {dimension_numbers = #tpu.dot_dimension_numbers<[1], [0], [0], [1], [0, 0, 1, 1], [], []>} : vector<256x384xbf16>, vector<384x128xbf16>, vector<256x128xf32> -> vector<256x128xf32>
    %15 = vector.extract_strided_slice %5 {offsets = [1, 0, 0], sizes = [16, 18, 128], strides = [1, 1, 1]} : vector<18x18x128xbf16> to vector<16x18x128xbf16>
    %16 = vector.extract_strided_slice %15 {offsets = [0, 0, 0], sizes = [16, 16, 128], strides = [1, 1, 1]} : vector<16x18x128xbf16> to vector<16x16x128xbf16>
    %17 = vector.extract_strided_slice %15 {offsets = [0, 1, 0], sizes = [16, 16, 128], strides = [1, 1, 1]} : vector<16x18x128xbf16> to vector<16x16x128xbf16>
    %18 = vector.extract_strided_slice %15 {offsets = [0, 2, 0], sizes = [16, 16, 128], strides = [1, 1, 1]} : vector<16x18x128xbf16> to vector<16x16x128xbf16>
    %19 = tpu.concatenate %16, %17, %18 in 2 : vector<16x16x128xbf16>, vector<16x16x128xbf16>, vector<16x16x128xbf16> -> vector<16x16x384xbf16>
    %20 = vector.shape_cast %19 : vector<16x16x384xbf16> to vector<256x384xbf16>
    %c1 = arith.constant 1 : index
    %c0_8 = arith.constant 0 : index
    %c0_9 = arith.constant 0 : index
    %21 = vector.load %arg2[%c1, %c0_8, %c0_9] : memref<3x384x128xbf16, #tpu.memory_space<vmem>>, vector<1x384x128xbf16>
    %22 = vector.shape_cast %21 : vector<1x384x128xbf16> to vector<384x128xbf16>
    %cst_10 = arith.constant dense<0.000000e+00> : vector<256x128xf32>
    %23 = tpu.matmul %20, %22, %cst_10 {dimension_numbers = #tpu.dot_dimension_numbers<[1], [0], [0], [1], [0, 0, 1, 1], [], []>} : vector<256x384xbf16>, vector<384x128xbf16>, vector<256x128xf32> -> vector<256x128xf32>
    %24 = arith.addf %14, %23 : vector<256x128xf32>
    %25 = vector.extract_strided_slice %5 {offsets = [2, 0, 0], sizes = [16, 18, 128], strides = [1, 1, 1]} : vector<18x18x128xbf16> to vector<16x18x128xbf16>
    %26 = vector.extract_strided_slice %25 {offsets = [0, 0, 0], sizes = [16, 16, 128], strides = [1, 1, 1]} : vector<16x18x128xbf16> to vector<16x16x128xbf16>
    %27 = vector.extract_strided_slice %25 {offsets = [0, 1, 0], sizes = [16, 16, 128], strides = [1, 1, 1]} : vector<16x18x128xbf16> to vector<16x16x128xbf16>
    %28 = vector.extract_strided_slice %25 {offsets = [0, 2, 0], sizes = [16, 16, 128], strides = [1, 1, 1]} : vector<16x18x128xbf16> to vector<16x16x128xbf16>
    %29 = tpu.concatenate %26, %27, %28 in 2 : vector<16x16x128xbf16>, vector<16x16x128xbf16>, vector<16x16x128xbf16> -> vector<16x16x384xbf16>
    %30 = vector.shape_cast %29 : vector<16x16x384xbf16> to vector<256x384xbf16>
    %c2 = arith.constant 2 : index
    %c0_11 = arith.constant 0 : index
    %c0_12 = arith.constant 0 : index
    %31 = vector.load %arg2[%c2, %c0_11, %c0_12] : memref<3x384x128xbf16, #tpu.memory_space<vmem>>, vector<1x384x128xbf16>
    %32 = vector.shape_cast %31 : vector<1x384x128xbf16> to vector<384x128xbf16>
    %cst_13 = arith.constant dense<0.000000e+00> : vector<256x128xf32>
    %33 = tpu.matmul %30, %32, %cst_13 {dimension_numbers = #tpu.dot_dimension_numbers<[1], [0], [0], [1], [0, 0, 1, 1], [], []>} : vector<256x384xbf16>, vector<384x128xbf16>, vector<256x128xf32> -> vector<256x128xf32>
    %34 = arith.addf %24, %33 : vector<256x128xf32>
    %c0_14 = arith.constant 0 : index
    %c0_15 = arith.constant 0 : index
    %35 = vector.load %arg3[%c0_14, %c0_15] : memref<1x128xf32, #tpu.memory_space<vmem>>, vector<1x128xf32>
    %36 = vector.broadcast %35 : vector<1x128xf32> to vector<256x128xf32>
    %37 = arith.addf %34, %36 : vector<256x128xf32>
    %cst_16 = arith.constant 0.000000e+00 : f32
    %38 = vector.broadcast %cst_16 : f32 to vector<256x128xf32>
    %39 = arith.maximumf %37, %38 : vector<256x128xf32>
    %40 = arith.truncf %39 : vector<256x128xf32> to vector<256x128xbf16>
    %c0_17 = arith.constant 0 : index
    %c0_18 = arith.constant 0 : index
    %41 = vector.load %arg4[%c0_17, %c0_18] : memref<128x128xbf16, #tpu.memory_space<vmem>>, vector<128x128xbf16>
    %cst_19 = arith.constant dense<0.000000e+00> : vector<256x128xf32>
    %42 = tpu.matmul %40, %41, %cst_19 {dimension_numbers = #tpu.dot_dimension_numbers<[1], [0], [0], [1], [0, 0, 1, 1], [], []>} : vector<256x128xbf16>, vector<128x128xbf16>, vector<256x128xf32> -> vector<256x128xf32>
    %c0_20 = arith.constant 0 : index
    %c0_21 = arith.constant 0 : index
    %43 = vector.load %arg5[%c0_20, %c0_21] : memref<1x128xf32, #tpu.memory_space<vmem>>, vector<1x128xf32>
    %44 = vector.broadcast %43 : vector<1x128xf32> to vector<256x128xf32>
    %45 = arith.addf %42, %44 : vector<256x128xf32>
    %cst_22 = arith.constant 9.99999997E-7 : f32
    %46 = vector.broadcast %cst_22 : f32 to vector<256x128xf32>
    %47 = arith.maximumf %45, %46 : vector<256x128xf32>
    %48 = arith.mulf %47, %47 : vector<256x128xf32>
    %49 = arith.mulf %48, %47 : vector<256x128xf32>
    %cst_23 = arith.constant dense<0.000000e+00> : vector<128xf32>
    %50 = vector.multi_reduction <add>, %49, %cst_23 [0] : vector<256x128xf32> to vector<128xf32>
    %51 = vector.shape_cast %50 : vector<128xf32> to vector<1x128xf32>
    %cst_24 = arith.constant 3.906250e-03 : f32
    %52 = vector.broadcast %cst_24 : f32 to vector<1x128xf32>
    %53 = arith.mulf %51, %52 : vector<1x128xf32>
    %cst_25 = arith.constant 0.333333343 : f32
    %54 = vector.broadcast %cst_25 : f32 to vector<1x128xf32>
    %55 = math.powf %53, %54 : vector<1x128xf32>
    %56 = tpu.iota {dimensions = array<i32: 1>} : vector<1x128xi32>
    %c16_i32 = arith.constant 16 : i32
    %57 = vector.broadcast %c16_i32 : i32 to vector<1x128xi32>
    %58 = arith.cmpi slt, %56, %57 : vector<1x128xi32>
    %cst_26 = arith.constant 0.000000e+00 : f32
    %59 = vector.broadcast %cst_26 : f32 to vector<1x128xf32>
    %60 = arith.select %58, %55, %59 : vector<1x128xi1>, vector<1x128xf32>
    %61 = arith.mulf %60, %60 : vector<1x128xf32>
    %cst_27 = arith.constant dense<0.000000e+00> : vector<1xf32>
    %62 = vector.multi_reduction <add>, %61, %cst_27 [1] : vector<1x128xf32> to vector<1xf32>
    %63 = vector.shape_cast %62 : vector<1xf32> to vector<1x1xf32>
    %64 = math.sqrt %63 : vector<1x1xf32>
    %cst_28 = arith.constant 9.99999997E-7 : f32
    %65 = vector.broadcast %cst_28 : f32 to vector<1x1xf32>
    %66 = arith.addf %64, %65 : vector<1x1xf32>
    %67 = vector.broadcast %66 : vector<1x1xf32> to vector<1x128xf32>
    %68 = arith.divf %60, %67 : vector<1x128xf32>
    %69 = arith.truncf %68 : vector<1x128xf32> to vector<1x128xbf16>
    %c0_29 = arith.constant 0 : index
    %c0_30 = arith.constant 0 : index
    %70 = vector.load %arg6[%c0_29, %c0_30] : memref<128x128xbf16, #tpu.memory_space<vmem>>, vector<128x128xbf16>
    %cst_31 = arith.constant dense<0.000000e+00> : vector<1x128xf32>
    %71 = tpu.matmul %69, %70, %cst_31 {dimension_numbers = #tpu.dot_dimension_numbers<[1], [0], [0], [1], [0, 0, 1, 1], [], []>} : vector<1x128xbf16>, vector<128x128xbf16>, vector<1x128xf32> -> vector<1x128xf32>
    %c0_32 = arith.constant 0 : index
    %c0_33 = arith.constant 0 : index
    %72 = vector.load %arg7[%c0_32, %c0_33] : memref<1x128xf32, #tpu.memory_space<vmem>>, vector<1x128xf32>
    %73 = arith.addf %71, %72 : vector<1x128xf32>
    %74 = arith.mulf %73, %73 : vector<1x128xf32>
    %cst_34 = arith.constant dense<0.000000e+00> : vector<1xf32>
    %75 = vector.multi_reduction <add>, %74, %cst_34 [1] : vector<1x128xf32> to vector<1xf32>
    %76 = vector.shape_cast %75 : vector<1xf32> to vector<1x1xf32>
    %77 = math.sqrt %76 : vector<1x1xf32>
    %cst_35 = arith.constant 9.99999997E-7 : f32
    %78 = vector.broadcast %cst_35 : f32 to vector<1x1xf32>
    %79 = arith.addf %77, %78 : vector<1x1xf32>
    %80 = vector.broadcast %79 : vector<1x1xf32> to vector<1x128xf32>
    %81 = arith.divf %73, %80 : vector<1x128xf32>
    %c0_36 = arith.constant 0 : index
    %c0_37 = arith.constant 0 : index
    %c0_38 = arith.constant 0 : index
    %82 = vector.load %arg8[%c0_36, %c0_37, %c0_38] : memref<1x1x128xf32, #tpu.memory_space<vmem>>, vector<1x1x128xf32>
    %83 = vector.shape_cast %82 : vector<1x1x128xf32> to vector<1x128xf32>
    %84 = vector.shape_cast %81 : vector<1x128xf32> to vector<1x1x128xf32>
    tpu.vector_store %arg8[%c0_36, %c0_37, %c0_38], %84 {strides = array<i32>} : memref<1x1x128xf32, #tpu.memory_space<vmem>>, vector<1x1x128xf32>,
    return
  }
  func.func @transform_0(%arg0: i32) -> (i32, i32, i32, i32) {
    %c0_i32 = arith.constant 0 : i32
    %c0_i32_0 = arith.constant 0 : i32
    %c0_i32_1 = arith.constant 0 : i32
    %c0_i32_2 = arith.constant 0 : i32
    return %arg0, %c0_i32, %c0_i32_0, %c0_i32_1 : i32, i32, i32, i32
  }
  func.func @transform_1(%arg0: i32) -> (i32, i32, i32) {
    %c0_i32 = arith.constant 0 : i32
    %c0_i32_0 = arith.constant 0 : i32
    %c0_i32_1 = arith.constant 0 : i32
    %c0_i32_2 = arith.constant 0 : i32
    return %c0_i32, %c0_i32_0, %c0_i32_1 : i32, i32, i32
  }
  func.func @transform_2(%arg0: i32) -> (i32, i32) {
    %c0_i32 = arith.constant 0 : i32
    %c0_i32_0 = arith.constant 0 : i32
    %c0_i32_1 = arith.constant 0 : i32
    return %c0_i32, %c0_i32_0 : i32, i32
  }
  func.func @transform_3(%arg0: i32) -> (i32, i32) {
    %c0_i32 = arith.constant 0 : i32
    %c0_i32_0 = arith.constant 0 : i32
    %c0_i32_1 = arith.constant 0 : i32
    return %c0_i32, %c0_i32_0 : i32, i32
  }
  func.func @transform_4(%arg0: i32) -> (i32, i32) {
    %c0_i32 = arith.constant 0 : i32
    %c0_i32_0 = arith.constant 0 : i32
    %c0_i32_1 = arith.constant 0 : i32
    return %c0_i32, %c0_i32_0 : i32, i32
  }
  func.func @transform_5(%arg0: i32) -> (i32, i32) {
    %c0_i32 = arith.constant 0 : i32
    %c0_i32_0 = arith.constant 0 : i32
    %c0_i32_1 = arith.constant 0 : i32
    return %c0_i32, %c0_i32_0 : i32, i32
  }
  func.func @transform_6(%arg0: i32) -> (i32, i32) {
    %c0_i32 = arith.constant 0 : i32
    %c0_i32_0 = arith.constant 0 : i32
    %c0_i32_1 = arith.constant 0 : i32
    return %c0_i32, %c0_i32_0 : i32, i32
  }
  func.func @transform_7(%arg0: i32) -> (i32, i32, i32) {
    %c0_i32 = arith.constant 0 : i32
    %c0_i32_0 = arith.constant 0 : i32
    %c0_i32_1 = arith.constant 0 : i32
    return %arg0, %c0_i32, %c0_i32_0 : i32, i32, i32
  }
}

</mosaic_0001>

<bundles_post_ra>
// kernel: image_retrieval_net_forward.2
= control target key start
LH: loop header
LB: loop body
LE: loop exit
PB: predicated region body
PF: predicated region fallthrough
CT: control target
= control target key end

     0   :  { %s1758_s12 = smov 0   ;;  %s2297_s0 = inlined_call_operand.vmem [shape: bf16[2,16,16,4], index: 0, kind: input, shape index: {}]   ;;  %s2298_s1 = inlined_call_operand.vmem [shape: bf16[3,12,128], index: 1, kind: input, shape index: {}]   ;;  %s2299_s2 = inlined_call_operand.vmem [shape: f32[1,128], index: 2, kind: input, shape index: {}]   ;;  %s2300_s3 = inlined_call_operand.vmem [shape: bf16[2,16,16,128], index: 3, kind: output, shape index: {}]  }
   0x1 LB: > { %s1457_s13 = sadd.s32 4294967295, %s1733_s12   ;;  %p1461_p0 = scmp.ge.s32.totalorder %s1733_s12, 1  ;;  %s1733_s12 = sphi %s1758_s12, %s13_s12  }
   0x2   : > { %p137_p1 = scmp.lt.s32.totalorder %s1733_s12, 3 }
   0x4   : > { %p138_p2 = pnand %p1461_p0, %p137_p1 }
   0x5   : > { %p161_p3 = scmp.lt.s32.totalorder (!%p138_p2), %s1457_s13, 1  ;;  %s1736_s18 = smov (!%p138_p2), 8  }
   0x6   : > { %141 = sbr.rel (%p138_p2) target bundleno = 482 (0x1e2), region = 32  ;;  %s1737_s19 = smov (!%p138_p2), 4  }
   0xb   : > { %s2304_s13 = smov (!%p161_p3, %s1457_s13), 1  ;;  %vm437_vm0 = vcmask 1040384   ;;  %vm438_vm1 = vsmask.f32 256  ;;  %v1735_v3 = vmov 0   ;;  %vm731_vm3 = vcmask 1046528  }
   0xc   : > { %s1596_s14 = sshll.u32 %s2304_s13, 7  ;;  %v287_v4 = vrot.slane %v1735_v3, 7  ;;  %vm1779_vm2 = vmand %vm437_vm0, %vm438_vm1  ;;  %vm474_vm4 = vsmask.f32 7424  ;;  %vm946_vm5 = vcmask 1045504   ;;  %vm812_vm6 = vcmask 31744  }
   0xd   : > { %s1774_s17 = scalar_lea.vmem %s2297_s0, %s1596_s14  ;;  %vm845_vm7 = vcmask 64512   ;;  %vm913_vm8 = vcmask 97280   ;;  %s2188_s9 = scalar_lea.vmem %s2300_s3, %s1596_s14 }
   0xe   : > { %v1599_v0 = vld [vmem:[%s1774_s17 + $0x8] sm:$0xff]  ;;  %v1610_v1 = vld [vmem:[%s1774_s17 + $0x60] sm:$0xff]  ;;  %v1788_v17 = vsel %vm1779_vm2, 0, %v287_v4  ;;  %v1600_v18 = vld [vmem:[%s1774_s17 + $0x10] sm:$0xff]  ;;  %v457_v48 = vsel %vm1779_vm2, %v287_v4, 0 }
   0xf   : > { %v1598_v2 = vld [vmem:[%s1774_s17] sm:$0xff]  ;;  %v299_v5 = vshrl.u32 %v1599_v0, 16  ;;  %v302_v6 = vshll.u32 %v1599_v0, 16  ;;  %v376_v7 = vshrl.u32 %v1610_v1, 16  ;;  %v379_v8 = vshll.u32 %v1610_v1, 16  ;;  %v1611_v13 = vld [vmem:[%s1774_s17 + $0x68] sm:$0xff] }
  0x10   : > { %v292_v10 = vshrl.u32 %v1598_v2, 16  ;;  %v295_v22 = vshll.u32 %v1598_v2, 16  ;;  %v383_v25 = vshrl.u32 %v1611_v13, 16  ;;  %v478_v26 = vshll.u32 %v1788_v17, 16  ;;  %v1601_v47 = vld [vmem:[%s1774_s17 + $0x18] sm:$0xff]  ;;  %v1612_v59 = vld [vmem:[%s1774_s17 + $0x70] sm:$0xff] }
  0x11   : > { %v301_v11 = vrot.slane %v299_v5, 7  ;;  %v378_v12 = vrot.slane %v376_v7, 7  ;;  %v306_v33 = vshrl.u32 %v1600_v18, 16  ;;  %v386_v34 = vshll.u32 %v1611_v13, 16 }
  0x12   : > { %v294_v21 = vrot.slane %v292_v10, 7  ;;  %v476_v42 = vshrl.u32 %v1788_v17, 16  ;;  %v385_v45 = vrot.slane %v383_v25, 7  ;;  %v480_v46 = vrot.slane %v478_v26, 1 }
  0x13   : > { %v304_v14 = vor.u32 %v302_v6, %v301_v11  ;;  %v459_v15 = vsel %vm1779_vm2, %v301_v11, 0  ;;  %v381_v16 = vor.u32 %v379_v8, %v378_v12  ;;  %v470_v30 = vsel %vm1779_vm2, %v378_v12, 0 }
  0x14   : > { %v739_v19 = vrot.slane %v459_v15, 1  ;;  %v507_v20 = vshll.u32 %v459_v15, 16  ;;  %v639_v32 = vshll.u32 %v470_v30, 16  ;;  %v297_v38 = vor.u32 %v295_v22, %v294_v21  ;;  %v1602_v22 = vld [vmem:[%s1774_s17 + $0x20] sm:$0xff] }
  0x15   : > { %v1793_v23 = vsel %vm1779_vm2, 0, %v304_v14  ;;  %v1797_v24 = vsel %vm1779_vm2, 0, %v381_v16  ;;  %v772_v39 = vrot.slane %v470_v30, 1  ;;  %v308_v49 = vrot.slane %v306_v33, 7 }
  0x16   : > { %v738_v27 = vrot.slane %v1793_v23, 1  ;;  %v500_v28 = vshrl.u32 %v1793_v23, 16  ;;  %v502_v29 = vshll.u32 %v1793_v23, 16  ;;  %v634_v31 = vshll.u32 %v1797_v24, 16 }
  0x17   : > { %v509_v37 = vrot.slane %v507_v20, 1  ;;  %v632_v40 = vshrl.u32 %v1797_v24, 16  ;;  %v771_v44 = vrot.slane %v1797_v24, 1  ;;  %v309_v50 = vshll.u32 %v1600_v18, 16 }
  0x18   : > { %v740_v35 = vsel %vm731_vm3, %v738_v27, %v739_v19  ;;  %v504_v36 = vrot.slane %v502_v29, 1  ;;  %v636_v41 = vrot.slane %v634_v31, 1  ;;  %v641_v52 = vrot.slane %v639_v32, 1 }
  0x19   : > { %784 = vrot.lane.b32.xlu1 %v740_v35, %s1736_s18  ;;  %v1817_v53 = vsel %vm1779_vm2, 0, %v297_v38  ;;  %v458_v54 = vsel %vm1779_vm2, %v294_v21, 0  ;;  %v388_v56 = vor.u32 %v386_v34, %v385_v45  ;;  %v481_v57 = vor.u32 %v480_v46, %v476_v42 }
  0x1a   : > { %v505_v43 = vor.u32 %v504_v36, %v500_v28  ;;  %v637_v55 = vor.u32 %v636_v41, %v632_v40  ;;  %v483_v58 = vshll.u32 %v457_v48, 16  ;;  %v773_v60 = vsel %vm731_vm3, %v771_v44, %v772_v39 }
  0x1b   : > { %v313_v61 = vshrl.u32 %v1601_v47, 16  ;;  %v736_v62 = vrot.slane %v458_v54, 1  ;;  %v311_v63 = vor.u32 %v309_v50, %v308_v49  ;;  %v735_v1 = vrot.slane %v1817_v53, 1 }
  0x1c   : > { %v510_v51 = vsel %vm474_vm4, %v505_v43, %v509_v37  ;;  %v485_v0 = vrot.slane %v483_v58, 1  ;;  %v488_v2 = vshrl.u32 %v1817_v53, 16  ;;  %v490_v3 = vshll.u32 %v1817_v53, 16 }
  0x1d   : > { %671 = vrot.lane.b32.xlu0 %v510_v51, %s1737_s19  ;;  %v495_v4 = vshll.u32 %v458_v54, 16  ;;  %v642_v5 = vsel %vm474_vm4, %v637_v55, %v641_v52  ;;  %v1831_v6 = vsel %vm1779_vm2, 0, %v388_v56  ;;  %v390_v8 = vshrl.u32 %v1612_v59, 16 }
  0x1e   : > { %v486_v7 = vsel %vm474_vm4, %v481_v57, %v485_v0  ;;  %v315_v10 = vrot.slane %v313_v61, 7  ;;  %v316_v11 = vshll.u32 %v1601_v47, 16  ;;  %v492_v12 = vrot.slane %v490_v3, 1 }
  0x1f   : > { %667 = vrot.lane.b32.xlu2 %v486_v7, %s1737_s19  ;;  %v393_v13 = vshll.u32 %v1612_v59, 16  ;;  %v1837_v14 = vsel %vm1779_vm2, 0, %v311_v63  ;;  %v1841_v15 = vsel %vm1779_vm2, %v385_v45, 0  ;;  %v497_v16 = vrot.slane %v495_v4, 1 }
  0x20   : > { %v392_v18 = vrot.slane %v390_v8, 7  ;;  %v646_v19 = vshll.u32 %v1831_v6, 16  ;;  %v493_v20 = vor.u32 %v492_v12, %v488_v2  ;;  %v514_v21 = vshll.u32 %v1837_v14, 16  ;;  %v1603_v12 = vld [vmem:[%s1774_s17 + $0x28] sm:$0xff] }
  0x21   : > { %806 = vrot.lane.b32.xlu1 %v773_v60, %s1736_s18  ;;  %v737_v25 = vsel %vm731_vm3, %v735_v1, %v736_v62  ;;  %v732_v26 = vrot.slane %v1788_v17, 1  ;;  %v733_v27 = vrot.slane %v457_v48, 1  ;;  %v460_v28 = vsel %vm1779_vm2, %v308_v49, 0  ;;  %v1613_v48 = vld [vmem:[%s1774_s17 + $0x78] sm:$0xff] }
  0x22   : > { %v644_v29 = vshrl.u32 %v1831_v6, 16  ;;  %v651_v30 = vshll.u32 %v1841_v15, 16  ;;  %v318_v31 = vor.u32 %v316_v11, %v315_v10  ;;  %v395_v32 = vor.u32 %v393_v13, %v392_v18 }
  0x23   : > { %v498_v33 = vsel %vm474_vm4, %v493_v20, %v497_v16  ;;  %v512_v34 = vshrl.u32 %v1837_v14, 16  ;;  %v516_v35 = vrot.slane %v514_v21, 1  ;;  %v519_v36 = vshll.u32 %v460_v28, 16 }
  0x24   : > { %v648_v37 = vrot.slane %v646_v19, 1  ;;  %v1857_v38 = vsel %vm1779_vm2, 0, %v395_v32  ;;  %v320_v39 = vshrl.u32 %v1602_v22, 16  ;;  %v323_v40 = vshll.u32 %v1602_v22, 16 }
  0x25   : > { %693 = vrot.lane.b32.xlu0 %v642_v5, %s1737_s19  ;;  %v734_v41 = vsel %vm731_vm3, %v732_v26, %v733_v27  ;;  %v742_v42 = vrot.slane %v460_v28, 1  ;;  %v658_v43 = vshll.u32 %v1857_v38, 16  ;;  %v741_v44 = vrot.slane %v1837_v14, 1 }
  0x26   : > { %v1865_v45 = vsel %vm1779_vm2, 0, %v318_v31  ;;  %v1870_v46 = vsel %vm1779_vm2, %v392_v18, 0  ;;  %v322_v47 = vrot.slane %v320_v39, 7  ;;  %v517_v49 = vor.u32 %v516_v35, %v512_v34  ;;  %v1609_v18 = vld [vmem:[%s1774_s17 + $0x58] sm:$0xff]  ;;  %v1604_v39 = vld [vmem:[%s1774_s17 + $0x30] sm:$0xff] }
  0x27   : > { %669 = vrot.lane.b32.xlu2 %v498_v33, %s1737_s19  ;;  %v521_v50 = vrot.slane %v519_v36, 1  ;;  %v649_v51 = vor.u32 %v648_v37, %v644_v29  ;;  %v653_v52 = vrot.slane %v651_v30, 1  ;;  %v461_v54 = vsel %vm1779_vm2, %v315_v10, 0 }
  0x28   : > { %v325_v55 = vor.u32 %v323_v40, %v322_v47  ;;  %v526_v56 = vshll.u32 %v1865_v45, 16  ;;  %v656_v57 = vshrl.u32 %v1857_v38, 16  ;;  %v660_v58 = vrot.slane %v658_v43, 1 }
  0x29   : > { %782 = vrot.lane.b32.xlu1 %v737_v25, %s1736_s18  ;;  %v663_v59 = vshll.u32 %v1870_v46, 16  ;;  %v743_v60 = vsel %vm731_vm3, %v741_v44, %v742_v42  ;;  %v397_v61 = vshrl.u32 %v1613_v48, 16  ;;  %v522_v62 = vsel %vm474_vm4, %v517_v49, %v521_v50 }
  0x2a   : > { %v1883_v63 = vsel %vm1779_vm2, 0, %v325_v55  ;;  %v654_v0 = vsel %vm474_vm4, %v649_v51, %v653_v52  ;;  %v531_v1 = vshll.u32 %v461_v54, 16  ;;  %v524_v2 = vshrl.u32 %v1865_v45, 16 }
  0x2b   : > { %v528_v3 = vrot.slane %v526_v56, 1  ;;  %v661_v4 = vor.u32 %v660_v58, %v656_v57  ;;  %v665_v5 = vrot.slane %v663_v59, 1  ;;  %v1891_v7 = vsel %vm1779_vm2, %v322_v47, 0 }
  0x2c   : > { %v538_v8 = vshll.u32 %v1883_v63, 16  ;;  %v399_v10 = vrot.slane %v397_v61, 7  ;;  %v400_v11 = vshll.u32 %v1613_v48, 16  ;;  %v774_v13 = vrot.slane %v1831_v6, 1 }
  0x2d   : > { %780 = vrot.lane.b32.xlu0 %v734_v41, %s1736_s18  ;;  %v775_v16 = vrot.slane %v1841_v15, 1  ;;  %v529_v19 = vor.u32 %v528_v3, %v524_v2  ;;  %v533_v20 = vrot.slane %v531_v1, 1  ;;  %v666_v21 = vsel %vm474_vm4, %v661_v4, %v665_v5 }
  0x2e   : > { %v543_v22 = vshll.u32 %v1891_v7, 16  ;;  %v536_v25 = vshrl.u32 %v1883_v63, 16  ;;  %v540_v26 = vrot.slane %v538_v8, 1  ;;  %v402_v27 = vor.u32 %v400_v11, %v399_v10 }
  0x2f   : > { %673 = vrot.lane.b32.xlu2 %v522_v62, %s1737_s19  ;;  %v327_v28 = vshrl.u32 %v1603_v12, 16  ;;  %v776_v29 = vsel %vm731_vm3, %v774_v13, %v775_v16  ;;  %v369_v30 = vshrl.u32 %v1609_v18, 16  ;;  %v534_v15 = vsel %vm474_vm4, %v529_v19, %v533_v20 }
  0x30   : > { %v545_v31 = vrot.slane %v543_v22, 1  ;;  %v744_v32 = vrot.slane %v1865_v45, 1  ;;  %v745_v33 = vrot.slane %v461_v54, 1  ;;  %v541_v34 = vor.u32 %v540_v26, %v536_v25 }
  0x31   : > { %786 = vrot.lane.b32.xlu1 %v743_v60, %s1736_s18  ;;  %v1909_v35 = vsel %vm1779_vm2, 0, %v402_v27  ;;  %v329_v36 = vrot.slane %v327_v28, 7  ;;  %v330_v37 = vshll.u32 %v1603_v12, 16  ;;  %v371_v40 = vrot.slane %v369_v30, 7  ;;  %v1605_v30 = vld [vmem:[%s1774_s17 + $0x38] sm:$0xff] }
  0x32   : > { %v372_v41 = vshll.u32 %v1609_v18, 16  ;;  %v883_v42 = vshll.u32 %v1909_v35, 16  ;;  %v777_v43 = vrot.slane %v1857_v38, 1  ;;  %v778_v44 = vrot.slane %v1870_v46, 1 }
  0x33   : > { %v473_v47 = vsel %vm1779_vm2, %v399_v10, 0  ;;  %v546_v48 = vsel %vm474_vm4, %v541_v34, %v545_v31  ;;  %v746_v49 = vsel %vm731_vm3, %v744_v32, %v745_v33  ;;  %v332_v50 = vor.u32 %v330_v37, %v329_v36 }
  0x34   : > { %v334_v51 = vshrl.u32 %v1604_v39, 16  ;;  %v374_v52 = vor.u32 %v372_v41, %v371_v40  ;;  %v881_v54 = vshrl.u32 %v1909_v35, 16  ;;  %v885_v55 = vrot.slane %v883_v42, 1 }
  0x35   : > { %695 = vrot.lane.b32.xlu0 %v654_v0, %s1737_s19  ;;  %v888_v56 = vshll.u32 %v473_v47, 16  ;;  %v896_v57 = vrot.slane %v1909_v35, 1  ;;  %v897_v58 = vrot.slane %v473_v47, 1  ;;  %v779_v46 = vsel %vm731_vm3, %v777_v43, %v778_v44 }
  0x36   : > { %v1927_v59 = vsel %vm1779_vm2, 0, %v332_v50  ;;  %v336_v60 = vrot.slane %v334_v51, 7  ;;  %v337_v61 = vshll.u32 %v1604_v39, 16  ;;  %v1931_v62 = vsel %vm1779_vm2, 0, %v374_v52 }
  0x37   : > { %808 = vrot.lane.b32.xlu2 %v776_v29, %s1736_s18  ;;  %v886_v0 = vor.u32 %v885_v55, %v881_v54  ;;  %v890_v1 = vrot.slane %v888_v56, 1  ;;  %v550_v2 = vshll.u32 %v1927_v59, 16  ;;  %v747_v3 = vrot.slane %v1883_v63, 1 }
  0x38   : > { %v748_v4 = vrot.slane %v1891_v7, 1  ;;  %v898_v5 = vsel %vm731_vm3, %v896_v57, %v897_v58  ;;  %v463_v8 = vsel %vm1779_vm2, %v329_v36, 0  ;;  %v469_v10 = vsel %vm1779_vm2, %v371_v40, 0 }
  0x39   : > { %697 = vrot.lane.b32.xlu1 %v666_v21, %s1737_s19  ;;  %v622_v11 = vshll.u32 %v1931_v62, 16  ;;  %v339_v12 = vor.u32 %v337_v61, %v336_v60  ;;  %v891_v13 = vsel %vm474_vm4, %v886_v0, %v890_v1  ;;  %v548_v16 = vshrl.u32 %v1927_v59, 16  ;;  %v1606_v0 = vld [vmem:[%s1774_s17 + $0x40] sm:$0xff] }
  0x3a   : > { %v552_v18 = vrot.slane %v550_v2, 1  ;;  %v555_v19 = vshll.u32 %v463_v8, 16  ;;  %v750_v7 = vrot.slane %v1927_v59, 1  ;;  %v751_v20 = vrot.slane %v463_v8, 1 }
  0x3b   : > { %v749_v21 = vsel %vm731_vm3, %v747_v3, %v748_v4  ;;  %v620_v22 = vshrl.u32 %v1931_v62, 16  ;;  %v624_v25 = vrot.slane %v622_v11, 1  ;;  %v627_v26 = vshll.u32 %v469_v10, 16 }
  0x3c   : > { %v1952_v27 = vsel %vm1779_vm2, 0, %v339_v12  ;;  %v553_v28 = vor.u32 %v552_v18, %v548_v16  ;;  %v557_v29 = vrot.slane %v555_v19, 1  ;;  %v464_v33 = vsel %vm1779_vm2, %v336_v60, 0  ;;  %v1576_v12 = vld [vmem:[%s2298_s1 + $0x10] sm:$0xf] }
  0x3d   : > { %675 = vrot.lane.b32.xlu0 %v534_v15, %s1737_s19  ;;  %v752_v15 = vsel %vm731_vm3, %v750_v7, %v751_v20  ;;  %v625_v31 = vor.u32 %v624_v25, %v620_v22  ;;  %v629_v32 = vrot.slane %v627_v26, 1  ;;  %v562_v34 = vshll.u32 %v1952_v27, 16  ;;  %v1607_v26 = vld [vmem:[%s1774_s17 + $0x48] sm:$0xff] }
  0x3e   : > { %v558_v36 = vsel %vm474_vm4, %v553_v28, %v557_v29  ;;  %v341_v37 = vshrl.u32 %v1605_v30, 16  ;;  %v567_v39 = vshll.u32 %v464_v33, 16  ;;  %v754_v40 = vrot.slane %v464_v33, 1 }
  0x3f   : > { %788 = vrot.lane.b32.xlu2 %v746_v49, %s1736_s18  ;;  %v630_v41 = vsel %vm474_vm4, %v625_v31, %v629_v32  ;;  %v560_v42 = vshrl.u32 %v1952_v27, 16  ;;  %v564_v43 = vrot.slane %v562_v34, 1  ;;  %v753_v44 = vrot.slane %v1952_v27, 1 }
  0x40   : > { %v768_v47 = vrot.slane %v1931_v62, 1  ;;  %v343_v49 = vrot.slane %v341_v37, 7  ;;  %v344_v50 = vshll.u32 %v1605_v30, 16  ;;  %v569_v52 = vrot.slane %v567_v39, 1  ;;  %v1534_v30 = vld [vmem:[%s2298_s1 + $0x8] sm:$0xf] }
  0x41   : > { %677 = vrot.lane.b32.xlu1 %v546_v48, %s1737_s19  ;;  %v769_v48 = vrot.slane %v469_v10, 1  ;;  %v565_v51 = vor.u32 %v564_v43, %v560_v42  ;;  %v755_v54 = vsel %vm731_vm3, %v753_v44, %v754_v40  ;;  %v348_v2 = vshrl.u32 %v1606_v0, 16 }
  0x42   : > { %v346_v56 = vor.u32 %v344_v50, %v343_v49  ;;  %v351_v4 = vshll.u32 %v1606_v0, 16  ;;  %v355_v29 = vshrl.u32 %v1607_v26, 16  ;;  %v358_v37 = vshll.u32 %v1607_v26, 16 }
  0x43   : > { %v770_v55 = vsel %vm731_vm3, %v768_v47, %v769_v48  ;;  %v570_v57 = vsel %vm474_vm4, %v565_v51, %v569_v52  ;;  %v350_v3 = vrot.slane %v348_v2, 7  ;;  %v1554_v48 = vld [vmem:[%s2298_s1] sm:$0xf]  ;;  %v1608_v2 = vld [vmem:[%s1774_s17 + $0x50] sm:$0xff] }
  0x44   : > { %v1975_v58 = vsel %vm1779_vm2, 0, %v346_v56 }
  0x45   : > { %810 = vrot.lane.b32.xlu0 %v779_v46, %s1736_s18  ;;  %v465_v46 = vsel %vm1779_vm2, %v343_v49, 0  ;;  %v756_v60 = vrot.slane %v1975_v58, 1  ;;  %v466_v11 = vsel %vm1779_vm2, %v350_v3, 0  ;;  %v574_v28 = vshll.u32 %v1975_v58, 16  ;;  %v1614_v49 = vld [vmem:[%s2298_s1] sm:$0x30] }
  0x46   : > { %v757_v61 = vrot.slane %v465_v46, 1  ;;  %v591_v7 = vshll.u32 %v466_v11, 16  ;;  %v572_v31 = vshrl.u32 %v1975_v58, 16  ;;  %v579_v34 = vshll.u32 %v465_v46, 16 }
  0x47   : > { %892 = vrot.lane.b32.xlu2 %v891_v13, %s1737_s19  ;;  %v1616_v13 = vld [vmem:[%s2298_s1 + $0x10] sm:$0x30]  ;;  %v576_v32 = vrot.slane %v574_v28, 1  ;;  %v1555_v51 = vor.u32 %v1614_v49, %v1554_v48 }
  0x48   : > { %v758_v1 = vsel %vm731_vm3, %v756_v60, %v757_v61  ;;  %v1577_v16 = vor.u32 %v1616_v13, %v1576_v12  ;;  %v593_v22 = vrot.slane %v591_v7, 1 }
  0x49   : > { %899 = vrot.lane.b32.xlu1 %v898_v5, %s1736_s18  ;;  %v353_v5 = vor.u32 %v351_v4, %v350_v3  ;;  %v577_v39 = vor.u32 %v576_v32, %v572_v31  ;;  %v1047_v56 = vsel %vm946_vm5, %v1555_v51, 0  ;;  %v760_v4 = vrot.slane %v466_v11, 1 }
  0x4a   : > { %v1999_v20 = vsel %vm946_vm5, %v1577_v16, 0  ;;  %1056 = vmatpush.bf16.msra.mxu1 %v1047_v56  ;;  %v365_v16 = vshll.u32 %v1608_v2, 16 }
  0x4b   : > { %v1986_v8 = vsel %vm1779_vm2, 0, %v353_v5  ;;  %1156 = vmatpush.bf16.msra.mxu2 %v1999_v20  ;;  %v362_v5 = vshrl.u32 %v1608_v2, 16 }
  0x4c   : > { %v586_v10 = vshll.u32 %v1986_v8, 16  ;;  %v584_v18 = vshrl.u32 %v1986_v8, 16  ;;  %v759_v3 = vrot.slane %v1986_v8, 1 }
  0x4d   : > { %790 = vrot.lane.b32.xlu0 %v749_v21, %s1736_s18  ;;  %v364_v13 = vrot.slane %v362_v5, 7 }
  0x4e   : > { %v588_v19 = vrot.slane %v586_v10, 1  ;;  %v761_v12 = vsel %vm731_vm3, %v759_v3, %v760_v4 }
  0x4f   : > { %679 = vrot.lane.b32.xlu2 %v558_v36, %s1737_s19  ;;  %v357_v36 = vrot.slane %v355_v29, 7 }
  0x50   : > { %v589_v21 = vor.u32 %v588_v19, %v584_v18  ;;  %v367_v19 = vor.u32 %v365_v16, %v364_v13 }
  0x51   : > { %792 = vrot.lane.b32.xlu1 %v752_v15, %s1736_s18  ;;  %v1615_v15 = vld [vmem:[%s2298_s1 + $0x8] sm:$0x30]  ;;  %v360_v42 = vor.u32 %v358_v37, %v357_v36  ;;  %v467_v50 = vsel %vm1779_vm2, %v357_v36, 0 }
  0x52   : > { %v594_v25 = vsel %vm474_vm4, %v589_v21, %v593_v22  ;;  %v1535_v33 = vor.u32 %v1615_v15, %v1534_v30  ;;  %v763_v61 = vrot.slane %v467_v50, 1  ;;  %v2042_v7 = vsel %vm1779_vm2, 0, %v367_v19 }
  0x53   : > { %v2017_v44 = vsel %vm1779_vm2, 0, %v360_v42  ;;  %v468_v21 = vsel %vm1779_vm2, %v364_v13, 0  ;;  %v765_v11 = vrot.slane %v2042_v7, 1 }
  0x54   : > { %v948_v40 = vsel %vm946_vm5, %v1535_v33, 0  ;;  %v598_v47 = vshll.u32 %v2017_v44, 16  ;;  %v596_v52 = vshrl.u32 %v2017_v44, 16  ;;  %v762_v60 = vrot.slane %v2017_v44, 1 }
  0x55   : > { %691 = vrot.lane.b32.xlu0 %v630_v41, %s1737_s19  ;;  %v581_v41 = vrot.slane %v579_v34, 1  ;;  %1712 = vmatpush.bf16.msra.mxu3 %v948_v40  ;;  %v766_v22 = vrot.slane %v468_v21, 1 }
  0x56   : > { %957 = vmatpush.bf16.msra.mxu0 %v948_v40 }
  0x57   : > { %804 = vrot.lane.b32.xlu2 %v770_v55, %s1736_s18  ;;  %v582_v43 = vsel %vm474_vm4, %v577_v39, %v581_v41  ;;  %v603_v55 = vshll.u32 %v467_v50, 16  ;;  %v767_v28 = vsel %vm731_vm3, %v765_v11, %v766_v22  ;;  %v608_v41 = vshrl.u32 %v2042_v7, 16 }
  0x59   : > { %794 = vrot.lane.b32.xlu1 %v755_v54, %s1736_s18  ;;  %v600_v54 = vrot.slane %v598_v47, 1  ;;  %v605_v46 = vrot.slane %v603_v55, 1  ;;  %1713 = vmatpush.bf16.msrb.mxu3 %v1047_v56 }
  0x5d   : > { %681 = vrot.lane.b32.xlu0 %v570_v57, %s1737_s19  ;;  %v601_v57 = vor.u32 %v600_v54, %v596_v52 }
  0x5f   : > { %683 = vrot.lane.b32.xlu2 %v582_v43, %s1737_s19  ;;  %v606_v0 = vsel %vm474_vm4, %v601_v57, %v605_v46  ;;  %v615_v43 = vshll.u32 %v468_v21, 16 }
  0x61   : > { %685 = vrot.lane.b32.xlu1 %v594_v25, %s1737_s19  ;;  %v617_v48 = vrot.slane %v615_v43, 1  ;;  %v2170_v43 = vld [vmem:[%s2299_s2] ss:$0 sm:$0xff] }
  0x65   : > { %796 = vrot.lane.b32.xlu0 %v758_v1, %s1736_s18  ;;  %v764_v1 = vsel %vm731_vm3, %v762_v60, %v763_v61 }
  0x67   : > { %798 = vrot.lane.b32.xlu2 %v761_v12, %s1736_s18 }
  0x69   : > { %800 = vrot.lane.b32.xlu1 %v764_v1, %s1736_s18 }
  0x6d   : > { %687 = vrot.lane.b32.xlu0 %v606_v0, %s1737_s19 }
  0x75   : > { %802 = vrot.lane.b32.xlu0 %v767_v28, %s1736_s18 }
  0x79   : > { %v668_v10 = vpop.permute.xlu2 %667 }
  0x81   : > { %v670_v30 = vpop.permute.xlu2 %669 }
  0x82   : > { %v816_v32 = vsel %vm812_vm6, %v1817_v53, %v670_v30 }
  0x89   : > { %v674_v36 = vpop.permute.xlu2 %673 }
  0x8a   : > { %v820_v39 = vsel %vm812_vm6, %v1837_v14, %v674_v36 }
  0x8b   : > { %v785_v18 = vpop.permute.xlu1 %784 }
  0x8f   : > { %v672_v25 = vpop.permute.xlu0 %671 }
  0x90   : > { %v818_v26 = vsel %vm812_vm6, %v1793_v23, %v672_v25 }
  0x91   : > { %v851_v29 = vsel %vm845_vm7, %v818_v26, %v785_v18  ;;  %v809_v49 = vpop.permute.xlu2 %808 }
  0x92   : > { %1578 = vmatmul.msk.bf16.vlgmr.msra.gmra.mxu2 %vm913_vm8, %v851_v29 }
  0x93   : > { %v807_v9 = vpop.permute.xlu1 %806 }
  0x97   : > { %v694_v15 = vpop.permute.xlu0 %693 }
  0x98   : > { %v840_v31 = vsel %vm812_vm6, %v1797_v24, %v694_v15  ;;  %v814_v24 = vsel %vm812_vm6, %v1788_v17, %v668_v10 }
  0x99   : > { %v2058_v33 = vsel %vm845_vm7, %v840_v31, %v807_v9  ;;  %v789_v55 = vpop.permute.xlu2 %788 }
  0x9a   : > { %1548 = vmatmul.msk.bf16.vlgmr.msra.gmra.mxu3 %vm913_vm8, %v2058_v33 }
  0x9b   : > { %v783_v23 = vpop.permute.xlu1 %782  ;;  %1714 = vmatpush.bf16.msra.mxu3 %v1999_v20  ;;  %v610_v20 = vshll.u32 %v2042_v7, 16 }
  0x9c   : > { %v849_v34 = vsel %vm845_vm7, %v816_v32, %v783_v23 }
  0x9d   : > { %1536 = vmatmul.msk.bf16.vlgmr.msra.gmra.mxu0 %vm913_vm8, %v849_v34  ;;  %v612_v42 = vrot.slane %v610_v20, 1 }
  0x9f   : > { %v781_v37 = vpop.permute.xlu0 %780  ;;  %v613_v17 = vor.u32 %v612_v42, %v608_v41 }
  0xa0   : > { %v2068_v53 = vsel %vm845_vm7, %v814_v24, %v781_v37 }
  0xa1   : > { %1556 = vmatmul.msk.bf16.vlgmr.msra.gmra.mxu1 %vm913_vm8, %v2068_v53  ;;  %v618_v14 = vsel %vm474_vm4, %v613_v17, %v617_v48  ;;  %v893_v2 = vpop.permute.xlu2 %892 }
  0xa2   : > { %689 = vrot.lane.b32.xlu2 %v618_v14, %s1737_s19 }
  0xa3   : > { %v787_v40 = vpop.permute.xlu1 %786 }
  0xa4   : > { %v853_v47 = vsel %vm845_vm7, %v820_v39, %v787_v40 }
  0xa5   : > { %1579 = vmatmul.msk.bf16.gmra.mxu2 %vm913_vm8, %v853_v47 }
  0xa7   : > { %v696_v50 = vpop.permute.xlu0 %695 }
  0xa8   : > { %v842_v51 = vsel %vm812_vm6, %v1831_v6, %v696_v50 }
  0xa9   : > { %v2083_v52 = vsel %vm845_vm7, %v842_v51, %v809_v49  ;;  %v680_v10 = vpop.permute.xlu2 %679 }
  0xaa   : > { %1549 = vmatmul.msk.bf16.gmra.mxu3 %vm913_vm8, %v2083_v52 }
  0xab   : > { %v698_v57 = vpop.permute.xlu1 %697 }
  0xac   : > { %v844_v46 = vsel %vm812_vm6, %v1857_v38, %v698_v57  ;;  %v902_v38 = vsel %vm812_vm6, %v1909_v35, %v893_v2 }
  0xad   : > { %1537 = vmatmul.msk.bf16.gmra.mxu0 %vm913_vm8, %v851_v29 }
  0xaf   : > { %v676_v54 = vpop.permute.xlu0 %675 }
  0xb0   : > { %v822_v56 = vsel %vm812_vm6, %v1865_v45, %v676_v54 }
  0xb1   : > { %1557 = vmatmul.msk.bf16.gmra.mxu1 %vm913_vm8, %v849_v34  ;;  %v855_v6 = vsel %vm845_vm7, %v822_v56, %v789_v55  ;;  %v805_v18 = vpop.permute.xlu2 %804 }
  0xb3   : > { %v678_v0 = vpop.permute.xlu1 %677 }
  0xb4   : > { %v824_v45 = vsel %vm812_vm6, %v1883_v63, %v678_v0  ;;  %v826_v63 = vsel %vm812_vm6, %v1927_v59, %v680_v10 }
  0xb5   : > { %1580 = vmatmul.msk.bf16.gmra.mxu2 %vm913_vm8, %v855_v6 }
  0xb7   : > { %v811_v60 = vpop.permute.xlu0 %810 }
  0xb8   : > { %v2096_v61 = vsel %vm845_vm7, %v844_v46, %v811_v60 }
  0xb9   : > { %v684_v22 = vpop.permute.xlu2 %683 }
  0xba   : > { %1550 = vmatmul.msk.bf16.gmra.mxu3 %vm913_vm8, %v2096_v61  ;;  %v830_v25 = vsel %vm812_vm6, %v1975_v58, %v684_v22 }
  0xbb   : > { %v900_v4 = vpop.permute.xlu1 %899 }
  0xbc   : > { %v2109_v5 = vsel %vm845_vm7, %v902_v38, %v900_v4 }
  0xbd   : > { %1538 = vmatmul.msk.bf16.gmra.mxu0 %vm913_vm8, %v853_v47 }
  0xbf   : > { %v791_v1 = vpop.permute.xlu0 %790 }
  0xc0   : > { %v857_v3 = vsel %vm845_vm7, %v824_v45, %v791_v1 }
  0xc1   : > { %1558 = vmatmul.msk.bf16.gmra.mxu1 %vm913_vm8, %v851_v29  ;;  %v799_v30 = vpop.permute.xlu2 %798 }
  0xc3   : > { %v793_v12 = vpop.permute.xlu1 %792 }
  0xc4   : > { %v859_v35 = vsel %vm845_vm7, %v826_v63, %v793_v12 }
  0xc5   : > { %1581 = vmatmul.msk.bf16.gmra.mxu2 %vm913_vm8, %v857_v3 }
  0xc7   : > { %v692_v13 = vpop.permute.xlu0 %691 }
  0xc8   : > { %v838_v16 = vsel %vm812_vm6, %v1931_v62, %v692_v13 }
  0xc9   : > { %v2122_v19 = vsel %vm845_vm7, %v838_v16, %v805_v18 }
  0xca   : > { %1551 = vmatmul.msk.bf16.gmra.mxu3 %vm913_vm8, %v2109_v5 }
  0xcb   : > { %v795_v11 = vpop.permute.xlu1 %794 }
  0xcd   : > { %1539 = vmatmul.msk.bf16.gmra.mxu0 %vm913_vm8, %v855_v6 }
  0xcf   : > { %v682_v21 = vpop.permute.xlu0 %681 }
  0xd0   : > { %v828_v59 = vsel %vm812_vm6, %v1952_v27, %v682_v21 }
  0xd1   : > { %1559 = vmatmul.msk.bf16.gmra.mxu1 %vm913_vm8, %v853_v47  ;;  %v861_v62 = vsel %vm845_vm7, %v828_v59, %v795_v11 }
  0xd3   : > { %v686_v28 = vpop.permute.xlu1 %685 }
  0xd4   : > { %v832_v29 = vsel %vm812_vm6, %v1986_v8, %v686_v28 }
  0xd5   : > { %1582 = vmatmul.msk.bf16.gmra.mxu2 %vm913_vm8, %v859_v35  ;;  %v865_v58 = vsel %vm845_vm7, %v832_v29, %v799_v30 }
  0xd7   : > { %v797_v26 = vpop.permute.xlu0 %796 }
  0xd8   : > { %v863_v27 = vsel %vm845_vm7, %v830_v25, %v797_v26 }
  0xda   : > { %1568 = vmatmul.msk.bf16.vlgmr.msrb.gmra.mxu3 %vm913_vm8, %v2122_v19 }
  0xdb   : > { %v801_v31 = vpop.permute.xlu1 %800 }
  0xdd   : > { %1540 = vmatmul.msk.bf16.gmra.mxu0 %vm913_vm8, %v857_v3 }
  0xdf   : > { %v688_v9 = vpop.permute.xlu0 %687 }
  0xe0   : > { %v834_v15 = vsel %vm812_vm6, %v2017_v44, %v688_v9 }
  0xe1   : > { %1560 = vmatmul.msk.bf16.gmra.mxu1 %vm913_vm8, %v855_v6  ;;  %v867_v8 = vsel %vm845_vm7, %v834_v15, %v801_v31 }
  0xe5   : > { %1583 = vmatmul.msk.bf16.gmra.mxu2 %vm913_vm8, %v861_v62 }
  0xe7   : > { %v803_v37 = vpop.permute.xlu0 %802 }
  0xea   : > { %1569 = vmatmul.msk.bf16.gmra.mxu3 %vm913_vm8, %v2058_v33 }
  0xed   : > { %1541 = vmatmul.msk.bf16.gmra.mxu0 %vm913_vm8, %v859_v35 }
  0xf1   : > { %1561 = vmatmul.msk.bf16.gmra.mxu1 %vm913_vm8, %v857_v3 }
  0xf5   : > { %1584 = vmatmul.msk.bf16.gmra.mxu2 %vm913_vm8, %v863_v27 }
  0xfa   : > { %1570 = vmatmul.msk.bf16.gmra.mxu3 %vm913_vm8, %v2083_v52 }
  0xfc   : > { %v690_v34 = vpop.permute.xlu2 %689 }
  0xfd   : > { %1542 = vmatmul.msk.bf16.gmra.mxu0 %vm913_vm8, %v861_v62  ;;  %v836_v44 = vsel %vm812_vm6, %v2042_v7, %v690_v34 }
  0xfe   : > { %v2165_v41 = vsel %vm845_vm7, %v836_v44, %v803_v37 }
 0x101   : > { %1562 = vmatmul.msk.bf16.gmra.mxu1 %vm913_vm8, %v859_v35 }
 0x105   : > { %1585 = vmatmul.msk.bf16.gmra.mxu2 %vm913_vm8, %v865_v58 }
 0x10a   : > { %1571 = vmatmul.msk.bf16.gmra.mxu3 %vm913_vm8, %v2096_v61 }
 0x10d   : > { %1543 = vmatmul.msk.bf16.gmra.mxu0 %vm913_vm8, %v863_v27 }
 0x111   : > { %1563 = vmatmul.msk.bf16.gmra.mxu1 %vm913_vm8, %v861_v62 }
 0x115   : > { %1586 = vmatmul.msk.bf16.gmra.mxu2 %vm913_vm8, %v867_v8  ;;  %v1158_v32 = vpop.f32.mrf.mxu2 }
 0x11a   : > { %v959_v23 = vpop.f32.mrf.mxu0  ;;  %1590 = vmatmul.msk.bf16.vlgmr.msra.gmra.mxu3 %vm913_vm8, %v2083_v52 }
 0x11d   : > { %1544 = vmatmul.msk.bf16.gmra.mxu0 %vm913_vm8, %v865_v58  ;;  %v2159_v36 = vpop.f32.mrf.mxu3  ;;  %v1160_v39 = vpop.f32.mrf.mxu2 }
 0x11e   : > { %v1058_v24 = vpop.f32.mrf.mxu1 }
 0x11f   : > { %v1059_v20 = vadd.f32 %v1058_v24, %v959_v23 }
 0x121   : > { %1564 = vmatmul.msk.bf16.gmra.mxu1 %vm913_vm8, %v863_v27  ;;  %v1238_v42 = vadd.f32 %v1158_v32, %v1059_v20 }
 0x122   : > { %v961_v40 = vpop.f32.mrf.mxu0 }
 0x123   : > { %v1274_v49 = vadd.f32 %v2170_v43, %v1238_v42 }
 0x125   : > { %v2172_v47 = vpop.f32.mrf.mxu3  ;;  %1587 = vmatmul.msk.bf16.gmra.mxu2 %vm913_vm8, %v2165_v41  ;;  %v1306_v52 = vmax.f32 %v1274_v49, 0.0 }
 0x126   : > { %v1060_v7 = vpop.f32.mrf.mxu1 }
 0x127   : > { %v1061_v17 = vadd.f32 %v1060_v7, %v961_v40 }
 0x128   : > { %v1163_v48 = vpop.f32.mrf.mxu2 }
 0x129   : > { %v1239_v50 = vadd.f32 %v1160_v39, %v1061_v17 }
 0x12a   : > { %v964_v14 = vpop.f32.mrf.mxu0  ;;  %1591 = vmatmul.msk.bf16.gmra.mxu3 %vm913_vm8, %v2096_v61 }
 0x12b   : > { %v1275_v51 = vadd.f32 %v2170_v43, %v1239_v50 }
 0x12d   : > { %v1307_v54 = vmax.f32 %v1275_v51, 0.0  ;;  %1545 = vmatmul.msk.bf16.gmra.mxu0 %vm913_vm8, %v867_v8  ;;  %v2181_v55 = vpop.f32.mrf.mxu3 }
 0x12e   : > { %v1063_v56 = vpop.f32.mrf.mxu1 }
 0x12f   : > { %v1620_v57 = vpack.c.bf16 %v1307_v54, %v1306_v52  ;;  %v1064_v46 = vadd.f32 %v1063_v56, %v964_v14 }
 0x130   : > { %v1165_v6 = vpop.f32.mrf.mxu2 }
 0x131   : > { %1621 = vst [vmem:[%s2188_s9] sm:$0xff] %v1620_v57   ;;  %1565 = vmatmul.msk.bf16.gmra.mxu1 %vm913_vm8, %v865_v58  ;;  %v1240_v61 = vadd.f32 %v1163_v48, %v1064_v46 }
 0x132   : > { %v966_v60 = vpop.f32.mrf.mxu0 }
 0x133   : > { %v1276_v3 = vadd.f32 %v2170_v43, %v1240_v61 }
 0x135   : > { %v2192_v0 = vpop.f32.mrf.mxu3  ;;  %1588 = vmatmul.msk.bf16.gmra.mxu2 %vm913_vm8, %v2122_v19  ;;  %v1308_v63 = vmax.f32 %v1276_v3, 0.0 }
 0x136   : > { %v1065_v45 = vpop.f32.mrf.mxu1 }
 0x137   : > { %v1066_v1 = vadd.f32 %v1065_v45, %v966_v60 }
 0x138   : > { %v1168_v2 = vpop.f32.mrf.mxu2 }
 0x139   : > { %v1241_v38 = vadd.f32 %v1165_v6, %v1066_v1 }
 0x13a   : > { %v969_v4 = vpop.f32.mrf.mxu0  ;;  %1592 = vmatmul.msk.bf16.gmra.mxu3 %vm913_vm8, %v2109_v5 }
 0x13b   : > { %v1277_v10 = vadd.f32 %v2170_v43, %v1241_v38 }
 0x13d   : > { %v1309_v12 = vmax.f32 %v1277_v10, 0.0  ;;  %1546 = vmatmul.msk.bf16.gmra.mxu0 %vm913_vm8, %v2165_v41  ;;  %v2202_v13 = vpop.f32.mrf.mxu3 }
 0x13e   : > { %v1068_v35 = vpop.f32.mrf.mxu1 }
 0x13f   : > { %v1625_v16 = vpack.c.bf16 %v1309_v12, %v1308_v63  ;;  %v1069_v21 = vadd.f32 %v1068_v35, %v969_v4 }
 0x140   : > { %v1170_v18 = vpop.f32.mrf.mxu2 }
 0x141   : > { %1697 = vst [vmem:[%s2188_s9 + $0x8] sm:$0xff] %v1625_v16   ;;  %1566 = vmatmul.msk.bf16.gmra.mxu1 %vm913_vm8, %v867_v8  ;;  %v1242_v11 = vadd.f32 %v1168_v2, %v1069_v21 }
 0x142   : > { %v971_v59 = vpop.f32.mrf.mxu0 }
 0x143   : > { %v1278_v26 = vadd.f32 %v2170_v43, %v1242_v11 }
 0x145   : > { %v2206_v62 = vpop.f32.mrf.mxu3  ;;  %1589 = vmatmul.msk.bf16.gmra.mxu2 %vm913_vm8, %v2058_v33  ;;  %v1310_v30 = vmax.f32 %v1278_v26, 0.0 }
 0x146   : > { %v1070_v5 = vpop.f32.mrf.mxu1 }
 0x147   : > { %v1071_v22 = vadd.f32 %v1070_v5, %v971_v59 }
 0x148   : > { %v1173_v25 = vpop.f32.mrf.mxu2 }
 0x149   : > { %v1243_v27 = vadd.f32 %v1170_v18, %v1071_v22 }
 0x14a   : > { %v974_v28 = vpop.f32.mrf.mxu0  ;;  %1593 = vmatmul.msk.bf16.gmra.mxu3 %vm913_vm8, %v2068_v53 }
 0x14b   : > { %v1279_v29 = vadd.f32 %v2170_v43, %v1243_v27 }
 0x14d   : > { %v1311_v58 = vmax.f32 %v1279_v29, 0.0  ;;  %1547 = vmatmul.msk.bf16.gmra.mxu0 %vm913_vm8, %v2122_v19  ;;  %v2216_v9 = vpop.f32.mrf.mxu3 }
 0x14e   : > { %v1073_v33 = vpop.f32.mrf.mxu1 }
 0x14f   : > { %v1630_v15 = vpack.c.bf16 %v1311_v58, %v1310_v30  ;;  %v1074_v8 = vadd.f32 %v1073_v33, %v974_v28 }
 0x150   : > { %v1175_v31 = vpop.f32.mrf.mxu2 }
 0x151   : > { %1698 = vst [vmem:[%s2188_s9 + $0x10] sm:$0xff] %v1630_v15   ;;  %1567 = vmatmul.msk.bf16.gmra.mxu1 %vm913_vm8, %v2165_v41  ;;  %v1244_v23 = vadd.f32 %v1173_v25, %v1074_v8 }
 0x152   : > { %v976_v32 = vpop.f32.mrf.mxu0 }
 0x153   : > { %v1280_v19 = vadd.f32 %v2170_v43, %v1244_v23 }
 0x155   : > { %v2221_v53 = vpop.f32.mrf.mxu3  ;;  %v1312_v40 = vmax.f32 %v1280_v19, 0.0 }
 0x156   : > { %v1075_v34 = vpop.f32.mrf.mxu1 }
 0x157   : > { %v1076_v24 = vadd.f32 %v1075_v34, %v976_v32 }
 0x158   : > { %v1178_v44 = vpop.f32.mrf.mxu2 }
 0x159   : > { %v1245_v37 = vadd.f32 %v1175_v31, %v1076_v24 }
 0x15a   : > { %v979_v39 = vpop.f32.mrf.mxu0 }
 0x15b   : > { %v1281_v20 = vadd.f32 %v2170_v43, %v1245_v37 }
 0x15d   : > { %v1313_v42 = vmax.f32 %v1281_v20, 0.0  ;;  %v1118_v7 = vpop.f32.mrf.mxu3 }
 0x15e   : > { %v2226_v17 = vadd.f32 %v1118_v7, %v2159_v36  ;;  %v1078_v41 = vpop.f32.mrf.mxu1 }
 0x15f   : > { %v1635_v48 = vpack.c.bf16 %v1313_v42, %v1312_v40  ;;  %v1079_v50 = vadd.f32 %v1078_v41, %v979_v39 }
 0x160   : > { %v1180_v49 = vpop.f32.mrf.mxu2 }
 0x161   : > { %1699 = vst [vmem:[%s2188_s9 + $0x18] sm:$0xff] %v1635_v48   ;;  %v1246_v51 = vadd.f32 %v1178_v44, %v1079_v50 }
 0x162   : > { %v981_v14 = vpop.f32.mrf.mxu0 }
 0x163   : > { %v1282_v6 = vadd.f32 %v2170_v43, %v1246_v51 }
 0x165   : > { %v2229_v52 = vpop.f32.mrf.mxu3  ;;  %v1314_v61 = vmax.f32 %v1282_v6, 0.0 }
 0x166   : > { %v1080_v54 = vpop.f32.mrf.mxu1 }
 0x167   : > { %v1081_v56 = vadd.f32 %v1080_v54, %v981_v14 }
 0x168   : > { %v1183_v57 = vpop.f32.mrf.mxu2 }
 0x169   : > { %v1247_v46 = vadd.f32 %v1180_v49, %v1081_v56 }
 0x16a   : > { %v984_v60 = vpop.f32.mrf.mxu0 }
 0x16b   : > { %v1283_v36 = vadd.f32 %v2170_v43, %v1247_v46 }
 0x16d   : > { %v1315_v45 = vmax.f32 %v1283_v36, 0.0  ;;  %v1123_v1 = vpop.f32.mrf.mxu3 }
 0x16e   : > { %v2234_v2 = vadd.f32 %v1123_v1, %v2181_v55  ;;  %v1083_v3 = vpop.f32.mrf.mxu1 }
 0x16f   : > { %v1640_v38 = vpack.c.bf16 %v1315_v45, %v1314_v61  ;;  %v1084_v10 = vadd.f32 %v1083_v3, %v984_v60 }
 0x170   : > { %v1185_v4 = vpop.f32.mrf.mxu2 }
 0x171   : > { %1700 = vst [vmem:[%s2188_s9 + $0x20] sm:$0xff] %v1640_v38   ;;  %v1248_v12 = vadd.f32 %v1183_v57, %v1084_v10  ;;  %v1121_v10 = vadd.f32 %v2229_v52, %v2172_v47 }
 0x172   : > { %v986_v63 = vpop.f32.mrf.mxu0 }
 0x173   : > { %v1284_v59 = vadd.f32 %v2170_v43, %v1248_v12 }
 0x175   : > { %v2237_v35 = vpop.f32.mrf.mxu3  ;;  %v1316_v22 = vmax.f32 %v1284_v59, 0.0 }
 0x176   : > { %v1085_v16 = vpop.f32.mrf.mxu1 }
 0x177   : > { %v1086_v18 = vadd.f32 %v1085_v16, %v986_v63 }
 0x178   : > { %v1188_v21 = vpop.f32.mrf.mxu2 }
 0x179   : > { %v1249_v11 = vadd.f32 %v1185_v4, %v1086_v18 }
 0x17a   : > { %v989_v5 = vpop.f32.mrf.mxu0 }
 0x17b   : > { %v1285_v55 = vadd.f32 %v2170_v43, %v1249_v11 }
 0x17d   : > { %v1317_v25 = vmax.f32 %v1285_v55, 0.0  ;;  %v1128_v26 = vpop.f32.mrf.mxu3 }
 0x17e   : > { %v2242_v27 = vadd.f32 %v1128_v26, %v2202_v13  ;;  %v1088_v28 = vpop.f32.mrf.mxu1 }
 0x17f   : > { %v1645_v29 = vpack.c.bf16 %v1317_v25, %v1316_v22  ;;  %v1089_v58 = vadd.f32 %v1088_v28, %v989_v5 }
 0x180   : > { %v1190_v30 = vpop.f32.mrf.mxu2 }
 0x181   : > { %1701 = vst [vmem:[%s2188_s9 + $0x28] sm:$0xff] %v1645_v29   ;;  %v1250_v15 = vadd.f32 %v1188_v21, %v1089_v58 }
 0x182   : > { %v991_v33 = vpop.f32.mrf.mxu0 }
 0x183   : > { %v1286_v34 = vadd.f32 %v2170_v43, %v1250_v15 }
 0x185   : > { %v2245_v31 = vpop.f32.mrf.mxu3  ;;  %v1318_v19 = vmax.f32 %v1286_v34, 0.0  ;;  %v1126_v34 = vadd.f32 %v2237_v35, %v2192_v0 }
 0x186   : > { %v1090_v8 = vpop.f32.mrf.mxu1 }
 0x187   : > { %v1091_v32 = vadd.f32 %v1090_v8, %v991_v33 }
 0x188   : > { %v1193_v23 = vpop.f32.mrf.mxu2 }
 0x189   : > { %v1251_v24 = vadd.f32 %v1190_v30, %v1091_v32 }
 0x18a   : > { %v994_v44 = vpop.f32.mrf.mxu0 }
 0x18b   : > { %v1287_v13 = vadd.f32 %v2170_v43, %v1251_v24 }
 0x18d   : > { %v1319_v37 = vmax.f32 %v1287_v13, 0.0  ;;  %v1133_v39 = vpop.f32.mrf.mxu3 }
 0x18e   : > { %v2250_v20 = vadd.f32 %v1133_v39, %v2216_v9  ;;  %v1093_v40 = vpop.f32.mrf.mxu1 }
 0x18f   : > { %v1650_v42 = vpack.c.bf16 %v1319_v37, %v1318_v19  ;;  %v1094_v41 = vadd.f32 %v1093_v40, %v994_v44 }
 0x190   : > { %v1195_v7 = vpop.f32.mrf.mxu2 }
 0x191   : > { %1702 = vst [vmem:[%s2188_s9 + $0x30] sm:$0xff] %v1650_v42   ;;  %v1252_v49 = vadd.f32 %v1193_v23, %v1094_v41 }
 0x192   : > { %v996_v48 = vpop.f32.mrf.mxu0 }
 0x193   : > { %v1288_v56 = vadd.f32 %v2170_v43, %v1252_v49 }
 0x195   : > { %v2253_v50 = vpop.f32.mrf.mxu3  ;;  %v1320_v46 = vmax.f32 %v1288_v56, 0.0 }
 0x196   : > { %v1095_v14 = vpop.f32.mrf.mxu1 }
 0x197   : > { %v1096_v51 = vadd.f32 %v1095_v14, %v996_v48 }
 0x198   : > { %v1198_v54 = vpop.f32.mrf.mxu2 }
 0x199   : > { %v1253_v57 = vadd.f32 %v1195_v7, %v1096_v51 }
 0x19a   : > { %v999_v6 = vpop.f32.mrf.mxu0 }
 0x19b   : > { %v1289_v9 = vadd.f32 %v2170_v43, %v1253_v57 }
 0x19d   : > { %v1321_v60 = vmax.f32 %v1289_v9, 0.0  ;;  %v1218_v36 = vpop.f32.mrf.mxu3 }
 0x19e   : > { %v1098_v61 = vpop.f32.mrf.mxu1  ;;  %v1262_v38 = vadd.f32 %v1218_v36, %v2226_v17 }
 0x19f   : > { %v1655_v45 = vpack.c.bf16 %v1321_v60, %v1320_v46  ;;  %v1099_v3 = vadd.f32 %v1098_v61, %v999_v6  ;;  %v1131_v60 = vadd.f32 %v2245_v31, %v2206_v62 }
 0x1a0   : > { %v1200_v1 = vpop.f32.mrf.mxu2  ;;  %v1298_v16 = vadd.f32 %v2170_v43, %v1262_v38 }
 0x1a1   : > { %1703 = vst [vmem:[%s2188_s9 + $0x38] sm:$0xff] %v1655_v45   ;;  %v1254_v63 = vadd.f32 %v1198_v54, %v1099_v3 }
 0x1a2   : > { %v1001_v4 = vpop.f32.mrf.mxu0  ;;  %v1330_v17 = vmax.f32 %v1298_v16, 0.0 }
 0x1a3   : > { %v1290_v55 = vadd.f32 %v2170_v43, %v1254_v63 }
 0x1a5   : > { %v1220_v12 = vpop.f32.mrf.mxu3  ;;  %v1322_v28 = vmax.f32 %v1290_v55, 0.0 }
 0x1a6   : > { %v1263_v18 = vadd.f32 %v1220_v12, %v1121_v10  ;;  %v1100_v21 = vpop.f32.mrf.mxu1 }
 0x1a7   : > { %v1101_v59 = vadd.f32 %v1100_v21, %v1001_v4 }
 0x1a8   : > { %v1299_v11 = vadd.f32 %v2170_v43, %v1263_v18  ;;  %v1203_v5 = vpop.f32.mrf.mxu2 }
 0x1a9   : > { %v1255_v22 = vadd.f32 %v1200_v1, %v1101_v59 }
 0x1aa   : > { %v1331_v25 = vmax.f32 %v1299_v11, 0.0  ;;  %v1004_v26 = vpop.f32.mrf.mxu0 }
 0x1ab   : > { %v1291_v47 = vadd.f32 %v2170_v43, %v1255_v22 }
 0x1ac   : > { %v1680_v52 = vpack.c.bf16 %v1331_v25, %v1330_v17 }
 0x1ad   : > { %v1323_v29 = vmax.f32 %v1291_v47, 0.0  ;;  %v1223_v30 = vpop.f32.mrf.mxu3 }
 0x1ae   : > { %1708 = vst [vmem:[%s2188_s9 + $0x60] sm:$0xff] %v1680_v52   ;;  %v1103_v58 = vpop.f32.mrf.mxu1  ;;  %v1264_v32 = vadd.f32 %v1223_v30, %v2234_v2 }
 0x1af   : > { %v1660_v33 = vpack.c.bf16 %v1323_v29, %v1322_v28  ;;  %v1104_v8 = vadd.f32 %v1103_v58, %v1004_v26  ;;  %v1136_v26 = vadd.f32 %v2253_v50, %v2221_v53 }
 0x1b0   : > { %v1205_v15 = vpop.f32.mrf.mxu2  ;;  %v1300_v13 = vadd.f32 %v2170_v43, %v1264_v32 }
 0x1b1   : > { %1704 = vst [vmem:[%s2188_s9 + $0x40] sm:$0xff] %v1660_v33   ;;  %v1256_v24 = vadd.f32 %v1203_v5, %v1104_v8 }
 0x1b2   : > { %v1006_v23 = vpop.f32.mrf.mxu0  ;;  %v1332_v41 = vmax.f32 %v1300_v13, 0.0 }
 0x1b3   : > { %v1292_v42 = vadd.f32 %v2170_v43, %v1256_v24 }
 0x1b5   : > { %v1225_v44 = vpop.f32.mrf.mxu3  ;;  %v1324_v14 = vmax.f32 %v1292_v42, 0.0 }
 0x1b6   : > { %v1265_v19 = vadd.f32 %v1225_v44, %v1126_v34  ;;  %v1105_v37 = vpop.f32.mrf.mxu1 }
 0x1b7   : > { %v1106_v39 = vadd.f32 %v1105_v37, %v1006_v23 }
 0x1b8   : > { %v1301_v40 = vadd.f32 %v2170_v43, %v1265_v19  ;;  %v1208_v48 = vpop.f32.mrf.mxu2 }
 0x1b9   : > { %v1257_v7 = vadd.f32 %v1205_v15, %v1106_v39 }
 0x1ba   : > { %v1333_v2 = vmax.f32 %v1301_v40, 0.0  ;;  %v1009_v49 = vpop.f32.mrf.mxu0 }
 0x1bb   : > { %v1293_v0 = vadd.f32 %v2170_v43, %v1257_v7 }
 0x1bc   : > { %v1685_v35 = vpack.c.bf16 %v1333_v2, %v1332_v41 }
 0x1bd   : > { %v1325_v51 = vmax.f32 %v1293_v0, 0.0  ;;  %v1228_v54 = vpop.f32.mrf.mxu3 }
 0x1be   : > { %1709 = vst [vmem:[%s2188_s9 + $0x68] sm:$0xff] %v1685_v35   ;;  %v1108_v56 = vpop.f32.mrf.mxu1  ;;  %v1266_v9 = vadd.f32 %v1228_v54, %v2242_v27 }
 0x1bf   : > { %v1665_v57 = vpack.c.bf16 %v1325_v51, %v1324_v14  ;;  %v1109_v6 = vadd.f32 %v1108_v56, %v1009_v49 }
 0x1c0   : > { %v1210_v36 = vpop.f32.mrf.mxu2  ;;  %v1302_v1 = vadd.f32 %v2170_v43, %v1266_v9 }
 0x1c1   : > { %1705 = vst [vmem:[%s2188_s9 + $0x48] sm:$0xff] %v1665_v57   ;;  %v1258_v61 = vadd.f32 %v1208_v48, %v1109_v6 }
 0x1c2   : > { %v1011_v46 = vpop.f32.mrf.mxu0  ;;  %v1334_v27 = vmax.f32 %v1302_v1, 0.0 }
 0x1c3   : > { %v1294_v63 = vadd.f32 %v2170_v43, %v1258_v61 }
 0x1c5   : > { %v1230_v45 = vpop.f32.mrf.mxu3  ;;  %v1326_v21 = vmax.f32 %v1294_v63, 0.0 }
 0x1c6   : > { %v1267_v3 = vadd.f32 %v1230_v45, %v1131_v60  ;;  %v1110_v38 = vpop.f32.mrf.mxu1 }
 0x1c7   : > { %v1111_v4 = vadd.f32 %v1110_v38, %v1011_v46 }
 0x1c8   : > { %v1303_v10 = vadd.f32 %v2170_v43, %v1267_v3  ;;  %v1213_v5 = vpop.f32.mrf.mxu2 }
 0x1c9   : > { %v1259_v12 = vadd.f32 %v1210_v36, %v1111_v4 }
 0x1ca   : > { %v1335_v16 = vmax.f32 %v1303_v10, 0.0  ;;  %v1014_v31 = vpop.f32.mrf.mxu0 }
 0x1cb   : > { %v1295_v18 = vadd.f32 %v2170_v43, %v1259_v12 }
 0x1cc   : > { %v1690_v62 = vpack.c.bf16 %v1335_v16, %v1334_v27 }
 0x1cd   : > { %v1327_v59 = vmax.f32 %v1295_v18, 0.0  ;;  %v1233_v11 = vpop.f32.mrf.mxu3 }
 0x1ce   : > { %1710 = vst [vmem:[%s2188_s9 + $0x70] sm:$0xff] %v1690_v62   ;;  %v1113_v55 = vpop.f32.mrf.mxu1  ;;  %v1268_v25 = vadd.f32 %v1233_v11, %v2250_v20 }
 0x1cf   : > { %v1670_v22 = vpack.c.bf16 %v1327_v59, %v1326_v21  ;;  %v1114_v17 = vadd.f32 %v1113_v55, %v1014_v31 }
 0x1d0   : > { %v1304_v28 = vadd.f32 %v2170_v43, %v1268_v25  ;;  %v1215_v15 = vpop.f32.mrf.mxu2 }
 0x1d1   : > { %1706 = vst [vmem:[%s2188_s9 + $0x50] sm:$0xff] %v1670_v22   ;;  %v1260_v47 = vadd.f32 %v1213_v5, %v1114_v17 }
 0x1d2   : > { %v1016_v29 = vpop.f32.mrf.mxu0  ;;  %v1336_v20 = vmax.f32 %v1304_v28, 0.0 }
 0x1d3   : > { %v1296_v32 = vadd.f32 %v2170_v43, %v1260_v47 }
 0x1d5   : > { %v1235_v52 = vpop.f32.mrf.mxu3  ;;  %v1328_v24 = vmax.f32 %v1296_v32, 0.0 }
 0x1d6   : > { %v1269_v30 = vadd.f32 %v1235_v52, %v1136_v26  ;;  %v1115_v58 = vpop.f32.mrf.mxu1 }
 0x1d7   : > { %v1116_v33 = vadd.f32 %v1115_v58, %v1016_v29 }
 0x1d8   : > { %v1305_v8 = vadd.f32 %v2170_v43, %v1269_v30 }
 0x1d9   : > { %v1261_v23 = vadd.f32 %v1215_v15, %v1116_v33 }
 0x1da   : > { %v1337_v34 = vmax.f32 %v1305_v8, 0.0 }
 0x1db   : > { %v1297_v53 = vadd.f32 %v2170_v43, %v1261_v23 }
 0x1dc   : > { %v1695_v50 = vpack.c.bf16 %v1337_v34, %v1336_v20 }
 0x1dd   : > { %v1329_v44 = vmax.f32 %v1297_v53, 0.0 }
 0x1de   : > { %1711 = vst [vmem:[%s2188_s9 + $0x78] sm:$0xff] %v1695_v50  }
 0x1df   : > { %v1675_v13 = vpack.c.bf16 %v1329_v44, %v1328_v24 }
 0x1e1   : > { %1707 = vst [vmem:[%s2188_s9 + $0x58] sm:$0xff] %v1675_v13  }
 0x1e2 PF: > { %s13_s12 = sadd.s32 1, %s1733_s12  }
 0x1e3   : > { %p10_p4 = scmp.ge.s32.totalorder %s13_s12, 4  }
 0x1e5   :  { %12 = sbr.rel (!%p10_p4) target bundleno = 1 (0x1), region = 64 }

// kernel: image_retrieval_net_forward.3
= control target key start
LH: loop header
LB: loop body
LE: loop exit
PB: predicated region body
PF: predicated region fallthrough
CT: control target
= control target key end

     0   :  { %12 = vsyncpa [#allocation3], 0  ;;  %s4872_s0 = inlined_call_operand.vmem [shape: bf16[2,16,16,128], index: 0, kind: input, shape index: {}]   ;;  %s4873_s1 = inlined_call_operand.vmem [shape: bf16[3,384,128], index: 1, kind: input, shape index: {}]   ;;  %s4874_s2 = inlined_call_operand.vmem [shape: f32[1,128], index: 2, kind: input, shape index: {}]   ;;  %s4875_s3 = inlined_call_operand.vmem [shape: bf16[128,128], index: 3, kind: input, shape index: {}]   ;;  %s4876_s4 = inlined_call_operand.vmem [shape: f32[1,128], index: 4, kind: input, shape index: {}]   ;;  %s4877_s5 = inlined_call_operand.vmem [shape: bf16[128,128], index: 5, kind: input, shape index: {}]   ;;  %s4878_s6 = inlined_call_operand.vmem [shape: f32[1,128], index: 6, kind: input, shape index: {}]   ;;  %s4879_s7 = inlined_call_operand.hbm [shape: f32[2,1,128], index: 7, kind: output, shape index: {}]  }
   0x1   :  { %14 = vsyncpa [#allocation3 + $0x1], 0  ;;  %s3731_s24 = smov 0   ;;  %s3733_s25 = smov 0  }
   0x2   :  { %s3735_s26 = smov 0   ;;  %s3737_s27 = smov 0  }
   0x3 LB: > { %s3752_s28 = sadd.s32 4294967295, %s3688_s27   ;;  %s2907_s29 = sadd.s32 4294967294, %s3688_s27   ;;  %s3688_s27 = sphi %s3737_s27, %s5004_s27   ;;  %s3684_s26 = sphi %s3735_s26, %s5003_s26   ;;  %s3680_s25 = sphi %s3733_s25, %s5002_s25   ;;  %s3676_s24 = sphi %s3731_s24, %s5001_s24  }
   0x4   : > { %s3756_s30 = sadd.s32 1, %s3688_s27   ;;  %s179_s8 = sadd.s32 1, %s3684_s26 }
   0x5   : > { %s176_s9 = ssub.s32 %s3688_s27, %s3756_s30  ;;  %p189_p0 = scmp.ne.s32.totalorder %s3684_s26, %s3680_s25 }
   0x6   : > { %p177_p1 = scmp.eq.s32.totalorder %s176_s9, 0  ;;  %p190_p2 = scmp.eq.s32.totalorder %s3752_s28, 1 }
   0x7   : > { %p195_p3 = scmp.ne.s32.totalorder %s3680_s25, %s3676_s24  ;;  %p196_p4 = scmp.eq.s32.totalorder %s2907_s29, 1 }
   0x8   : > { %s3767_s10 = scalar_select %p177_p1, %s3684_s26, %s179_s8  }
   0x9   : > { %p3769_p5 = por %p190_p2, %p189_p0  ;;  %p3773_p6 = por %p196_p4, %p195_p3 }
   0xa   : > { %p2910_p7 = scmp.ge.s32.totalorder %s3688_s27, 1  ;;  %p240_p8 = scmp.lt.s32.totalorder %s3688_s27, 3 }
   0xc   : > { %p241_p9 = pnand %p2910_p7, %p240_p8 }
   0xe   : > { %244 = sbr.rel (%p241_p9) target bundleno = 1493 (0x5d5), region = 48 }
  0x13   : > { %v3475_v0 = vld [vmem:[%s4873_s1 + $0xf8] sm:$0xff]  ;;  %p271_p10 = scmp.lt.s32.totalorder %s3752_s28, 1  ;;  %v3474_v2 = vld [vmem:[%s4873_s1 + $0xf0] sm:$0xff]  ;;  %v3473_v4 = vld [vmem:[%s4873_s1 + $0xe8] sm:$0xff]  ;;  %vm542_vm0 = vcmask 1040384   ;;  %vm820_vm4 = vcmask 1046528   ;;  %s2848_s9 = scalar_lea.hbm %s4879_s7, %s3752_s28 }
  0x14   : > { %v3483_v1 = vld [vmem:[%s4873_s1 + $0x138] sm:$0xff]  ;;  %1145 = vmatpush.bf16.msra.mxu0 %v3475_v0  ;;  %v3482_v3 = vld [vmem:[%s4873_s1 + $0x130] sm:$0xff]  ;;  %3532 = vmatpush.bf16.msra.mxu3 %v3475_v0  ;;  %v3481_v5 = vld [vmem:[%s4873_s1 + $0x128] sm:$0xff]  ;;  %vm543_vm1 = vsmask.f32 256  ;;  %s269_s23 = sand.u32 1, %s3680_s25  }
  0x15   : > { %1234 = vmatpush.bf16.msra.mxu1 %v3483_v1  ;;  %s272_s21 = scalar_select %p271_p10, %s3752_s28, 1  ;;  %3540 = vmatpush.bf16.msra.mxu2 %v3483_v1  ;;  %v3472_v12 = vld [vmem:[%s4873_s1 + $0xe0] sm:$0xff]  ;;  %vm3813_vm2 = vmand %vm542_vm0, %vm543_vm1  ;;  %v3471_v19 = vld [vmem:[%s4873_s1 + $0xd8] sm:$0xff]  ;;  %vm579_vm3 = vsmask.f32 7424 }
  0x16   : > { %v3480_v13 = vld [vmem:[%s4873_s1 + $0x120] sm:$0xff]  ;;  %v3479_v20 = vld [vmem:[%s4873_s1 + $0x118] sm:$0xff]  ;;  %v3470_v25 = vld [vmem:[%s4873_s1 + $0xd0] sm:$0xff]  ;;  %s270_s14 = scalar_lea.vmem [#allocation2], %s269_s23  ;;  %s2840_s16 = scalar_lea.sflag [#allocation3], %s269_s23 }
  0x17   : > { %s3427_s22 = sshll.u32 %s272_s21, 7  ;;  %v3478_v26 = vld [vmem:[%s4873_s1 + $0x110] sm:$0xff]  ;;  %v3469_v33 = vld [vmem:[%s4873_s1 + $0xc8] sm:$0xff]  ;;  %v3468_v45 = vld [vmem:[%s4873_s1 + $0xc0] sm:$0xff]  ;;  %s2850_s15 = sshll.u32 %s270_s14, 4  ;;  %s2851_s15 = int_to_ptr.vmem [resolvable:$true] %s2850_s15 }
  0x18   : > { %s3799_s13 = scalar_lea.vmem %s4872_s0, %s3427_s22  ;;  %1146 = vmatpush.bf16.msra.mxu0 %v3474_v2  ;;  %3533 = vmatpush.bf16.msra.mxu3 %v3474_v2  ;;  %v3477_v34 = vld [vmem:[%s4873_s1 + $0x108] sm:$0xff]  ;;  %v3476_v46 = vld [vmem:[%s4873_s1 + $0x100] sm:$0xff]  ;;  %v3459_v52 = vld [vmem:[%s4873_s1 + $0x78] sm:$0xff]  ;;  %s3646_s20 = scalar_lea.hbm %s4879_s7, 2 }
  0x19   : > { %1235 = vmatpush.bf16.msra.mxu1 %v3482_v3  ;;  %v3428_v6 = vld [vmem:[%s3799_s13] sm:$0xff]  ;;  %v3437_v7 = vld [vmem:[%s3799_s13 + $0x48] sm:$0xff]  ;;  %3541 = vmatpush.bf16.msra.mxu2 %v3482_v3  ;;  %v3438_v24 = vld [vmem:[%s3799_s13 + $0x50] sm:$0xff] }
  0x1a   : > { %v397_v8 = vshrl.u32 %v3428_v6, 16  ;;  %v400_v9 = vshll.u32 %v3428_v6, 16  ;;  %v460_v10 = vshrl.u32 %v3437_v7, 16  ;;  %v463_v11 = vshll.u32 %v3437_v7, 16  ;;  %v3429_v22 = vld [vmem:[%s3799_s13 + $0x8] sm:$0xff]  ;;  %v3491_v54 = vld [vmem:[%s4873_s1 + $0x178] sm:$0xff] }
  0x1b   : > { %v404_v30 = vshrl.u32 %v3429_v22, 16  ;;  %v467_v32 = vshrl.u32 %v3438_v24, 16  ;;  %v407_v38 = vshll.u32 %v3429_v22, 16  ;;  %v470_v44 = vshll.u32 %v3438_v24, 16  ;;  %v3451_v58 = vld [vmem:[%s4873_s1 + $0x38] sm:$0xff]  ;;  %v3430_v59 = vld [vmem:[%s3799_s13 + $0x10] sm:$0xff] }
  0x1c   : > { %1147 = vmatpush.bf16.msra.mxu0 %v3473_v4  ;;  %v399_v14 = vrot.slane %v397_v8, 7  ;;  %v462_v15 = vrot.slane %v460_v10, 7  ;;  %3534 = vmatpush.bf16.msra.mxu3 %v3473_v4  ;;  %v3458_v61 = vld [vmem:[%s4873_s1 + $0x70] sm:$0xff]  ;;  %v3439_v62 = vld [vmem:[%s3799_s13 + $0x58] sm:$0xff]  ;;  %v411_v3 = vshrl.u32 %v3430_v59, 16  ;;  %v3457_v7 = vld [vmem:[%s4873_s1 + $0x68] sm:$0xff] }
  0x1d   : > { %1236 = vmatpush.bf16.msra.mxu1 %v3481_v5  ;;  %3542 = vmatpush.bf16.msra.mxu2 %v3481_v5  ;;  %v406_v42 = vrot.slane %v404_v30, 7  ;;  %v469_v43 = vrot.slane %v467_v32, 7  ;;  %v3490_v0 = vld [vmem:[%s4873_s1 + $0x170] sm:$0xff]  ;;  %v474_v6 = vshrl.u32 %v3439_v62, 16  ;;  %v3431_v32 = vld [vmem:[%s3799_s13 + $0x18] sm:$0xff] }
  0x1e   : > { %v402_v16 = vor.u32 %v400_v9, %v399_v14  ;;  %v465_v18 = vor.u32 %v463_v11, %v462_v15  ;;  %v3842_v28 = vsel %vm3813_vm2, %v399_v14, 0  ;;  %v3847_v31 = vsel %vm3813_vm2, %v462_v15, 0  ;;  %v3450_v4 = vld [vmem:[%s4873_s1 + $0x30] sm:$0xff] }
  0x1f   : > { %v600_v37 = vshll.u32 %v3842_v28, 16  ;;  %v708_v41 = vshll.u32 %v3847_v31, 16  ;;  %v409_v51 = vor.u32 %v407_v38, %v406_v42  ;;  %v472_v53 = vor.u32 %v470_v44, %v469_v43  ;;  %v3456_v38 = vld [vmem:[%s4873_s1 + $0x60] sm:$0xff]  ;;  %v3506_v17 = vld [vmem:[%s4873_s1 + $0x1f0] sm:$0xff] }
  0x20   : > { %1148 = vmatpush.bf16.msra.mxu0 %v3472_v12  ;;  %3535 = vmatpush.bf16.msra.mxu3 %v3472_v12  ;;  %v3825_v21 = vsel %vm3813_vm2, 0, %v402_v16  ;;  %v3830_v23 = vsel %vm3813_vm2, 0, %v465_v18  ;;  %v3903_v1 = vsel %vm3813_vm2, %v406_v42, 0  ;;  %v3911_v5 = vsel %vm3813_vm2, %v469_v43, 0 }
  0x21   : > { %1237 = vmatpush.bf16.msra.mxu1 %v3480_v13  ;;  %3543 = vmatpush.bf16.msra.mxu2 %v3480_v13  ;;  %4907 = vst [vmem:[#allocation5_spill] sm:$0xff] %v3830_v23  ;;  %v595_v27 = vshll.u32 %v3825_v21, 16  ;;  %v703_v29 = vshll.u32 %v3830_v23, 16  ;;  %v593_v35 = vshrl.u32 %v3825_v21, 16  ;;  %v701_v39 = vshrl.u32 %v3830_v23, 16 }
  0x22   : > { %v602_v48 = vrot.slane %v600_v37, 1  ;;  %v710_v50 = vrot.slane %v708_v41, 1  ;;  %v3879_v57 = vsel %vm3813_vm2, 0, %v409_v51  ;;  %v3887_v60 = vsel %vm3813_vm2, 0, %v472_v53  ;;  %v3449_v37 = vld [vmem:[%s4873_s1 + $0x28] sm:$0xff] }
  0x23   : > { %v597_v36 = vrot.slane %v595_v27, 1  ;;  %v705_v40 = vrot.slane %v703_v29, 1  ;;  %v607_v63 = vshll.u32 %v3879_v57, 16  ;;  %v715_v2 = vshll.u32 %v3887_v60, 16 }
  0x24   : > { %1149 = vmatpush.bf16.msra.mxu0 %v3471_v19  ;;  %3536 = vmatpush.bf16.msra.mxu3 %v3471_v19  ;;  %v605_v8 = vshrl.u32 %v3879_v57, 16  ;;  %v612_v10 = vshll.u32 %v3903_v1, 16  ;;  %v713_v11 = vshrl.u32 %v3887_v60, 16  ;;  %v720_v13 = vshll.u32 %v3911_v5, 16 }
  0x25   : > { %1238 = vmatpush.bf16.msra.mxu1 %v3479_v20  ;;  %3544 = vmatpush.bf16.msra.mxu2 %v3479_v20  ;;  %v598_v47 = vor.u32 %v597_v36, %v593_v35  ;;  %v706_v49 = vor.u32 %v705_v40, %v701_v39  ;;  %v609_v9 = vrot.slane %v607_v63, 1  ;;  %v717_v12 = vrot.slane %v715_v2, 1  ;;  %v3489_v36 = vld [vmem:[%s4873_s1 + $0x168] sm:$0xff] }
  0x26   : > { %v413_v14 = vrot.slane %v411_v3, 7  ;;  %v414_v15 = vshll.u32 %v3430_v59, 16  ;;  %v476_v16 = vrot.slane %v474_v6, 7  ;;  %v477_v18 = vshll.u32 %v3439_v62, 16 }
  0x27   : > { %v3872_v55 = vsel %vm579_vm3, %v598_v47, %v602_v48  ;;  %v3875_v56 = vsel %vm579_vm3, %v706_v49, %v710_v50  ;;  %v610_v19 = vor.u32 %v609_v9, %v605_v8  ;;  %v614_v20 = vrot.slane %v612_v10, 1  ;;  %v3488_v9 = vld [vmem:[%s4873_s1 + $0x160] sm:$0xff] }
  0x28   : > { %1150 = vmatpush.bf16.msra.mxu0 %v3470_v25  ;;  %3537 = vmatpush.bf16.msra.mxu3 %v3470_v25  ;;  %v718_v22 = vor.u32 %v717_v12, %v713_v11  ;;  %v722_v24 = vrot.slane %v720_v13, 1  ;;  %v416_v25 = vor.u32 %v414_v15, %v413_v14  ;;  %v3952_v39 = vsel %vm3813_vm2, %v413_v14, 0  ;;  %v3448_v10 = vld [vmem:[%s4873_s1 + $0x20] sm:$0xff]  ;;  %v3455_v11 = vld [vmem:[%s4873_s1 + $0x58] sm:$0xff] }
  0x29   : > { %1239 = vmatpush.bf16.msra.mxu1 %v3478_v26  ;;  %3545 = vmatpush.bf16.msra.mxu2 %v3478_v26  ;;  %v479_v26 = vor.u32 %v477_v18, %v476_v16  ;;  %v3921_v27 = vsel %vm579_vm3, %v610_v19, %v614_v20  ;;  %v418_v41 = vshrl.u32 %v3431_v32, 16  ;;  %v3957_v42 = vsel %vm3813_vm2, %v476_v16, 0 }
  0x2a   : > { %v3924_v29 = vsel %vm579_vm3, %v718_v22, %v722_v24  ;;  %v3928_v30 = vsel %vm3813_vm2, 0, %v416_v25  ;;  %v732_v49 = vshll.u32 %v3957_v42, 16  ;;  %v421_v51 = vshll.u32 %v3431_v32, 16 }
  0x2b   : > { %v619_v35 = vshll.u32 %v3928_v30, 16  ;;  %v617_v44 = vshrl.u32 %v3928_v30, 16  ;;  %v420_v50 = vrot.slane %v418_v41, 7 }
  0x2c   : > { %1151 = vmatpush.bf16.msra.mxu0 %v3469_v33  ;;  %3538 = vmatpush.bf16.msra.mxu3 %v3469_v33  ;;  %v3933_v33 = vsel %vm3813_vm2, 0, %v479_v26 }
  0x2d   : > { %1240 = vmatpush.bf16.msra.mxu1 %v3477_v34  ;;  %3546 = vmatpush.bf16.msra.mxu2 %v3477_v34  ;;  %v3440_v34 = vld [vmem:[%s3799_s13 + $0x60] sm:$0xff]  ;;  %v727_v40 = vshll.u32 %v3933_v33, 16  ;;  %v725_v47 = vshrl.u32 %v3933_v33, 16  ;;  %v423_v62 = vor.u32 %v421_v51, %v420_v50  ;;  %v3995_v12 = vsel %vm3813_vm2, %v420_v50, 0  ;;  %v3487_v51 = vld [vmem:[%s4873_s1 + $0x158] sm:$0xff] }
  0x2e   : > { %v481_v43 = vshrl.u32 %v3440_v34, 16  ;;  %v484_v53 = vshll.u32 %v3440_v34, 16  ;;  %v636_v20 = vshll.u32 %v3995_v12, 16 }
  0x2f   : > { %v729_v48 = vrot.slane %v727_v40, 1  ;;  %v3971_v3 = vsel %vm3813_vm2, 0, %v423_v62 }
  0x30   : > { %1152 = vmatpush.bf16.msra.mxu0 %v3468_v45  ;;  %3539 = vmatpush.bf16.msra.mxu3 %v3468_v45  ;;  %v621_v45 = vrot.slane %v619_v35, 1  ;;  %v631_v8 = vshll.u32 %v3971_v3, 16  ;;  %v629_v18 = vshrl.u32 %v3971_v3, 16 }
  0x31   : > { %1241 = vmatpush.bf16.msra.mxu1 %v3476_v46  ;;  %3547 = vmatpush.bf16.msra.mxu2 %v3476_v46  ;;  %v624_v46 = vshll.u32 %v3952_v39, 16  ;;  %v730_v59 = vor.u32 %v729_v48, %v725_v47  ;;  %v3433_v47 = vld [vmem:[%s3799_s13 + $0x28] sm:$0xff] }
  0x32   : > { %v633_v19 = vrot.slane %v631_v8, 1 }
  0x33   : > { %1153 = vmatmul.bf16.vlgmr.msra.gmra.mxu0 %v3825_v21  ;;  %1198 = vmatmul.bf16.vlgmr.msra.gmra.mxu3 %v3830_v23 }
  0x34   : > { %1645 = vmatpush.bf16.msrb.mxu0 %v3459_v52  ;;  %1242 = vmatmul.bf16.vlgmr.msra.gmra.mxu1 %v3872_v55  ;;  %v483_v52 = vrot.slane %v481_v43, 7 }
  0x35   : > { %1323 = vmatpush.bf16.msrb.mxu2 %v3491_v54  ;;  %1556 = vmatpush.bf16.msrb.mxu3 %v3451_v58  ;;  %v622_v54 = vor.u32 %v621_v45, %v617_v44  ;;  %v626_v58 = vrot.slane %v624_v46, 1 }
  0x36   : > { %1287 = vmatmul.bf16.vlgmr.msra.gmra.mxu2 %v3875_v56  ;;  %v486_v63 = vor.u32 %v484_v53, %v483_v52  ;;  %v4000_v15 = vsel %vm3813_vm2, %v483_v52, 0  ;;  %v3447_v52 = vld [vmem:[%s4873_s1 + $0x18] sm:$0xff]  ;;  %v3454_v53 = vld [vmem:[%s4873_s1 + $0x50] sm:$0xff] }
  0x37   : > { %v744_v25 = vshll.u32 %v4000_v15, 16 }
  0x38   : > { %1646 = vmatpush.bf16.msrb.mxu0 %v3458_v61  ;;  %v734_v61 = vrot.slane %v732_v49, 1  ;;  %v3976_v6 = vsel %vm3813_vm2, 0, %v486_v63  ;;  %v3442_v49 = vld [vmem:[%s3799_s13 + $0x70] sm:$0xff] }
  0x39   : > { %1324 = vmatpush.bf16.msrb.mxu2 %v3490_v0  ;;  %1557 = vmatpush.bf16.msrb.mxu3 %v3450_v4  ;;  %v3964_v0 = vsel %vm579_vm3, %v622_v54, %v626_v58  ;;  %v3432_v4 = vld [vmem:[%s3799_s13 + $0x20] sm:$0xff]  ;;  %v739_v13 = vshll.u32 %v3976_v6, 16  ;;  %v737_v22 = vshrl.u32 %v3976_v6, 16  ;;  %v746_v40 = vrot.slane %v744_v25, 1  ;;  %v3486_v63 = vld [vmem:[%s4873_s1 + $0x150] sm:$0xff] }
  0x3a   : > { %v3967_v2 = vsel %vm579_vm3, %v730_v59, %v734_v61  ;;  %v425_v14 = vshrl.u32 %v3432_v4, 16  ;;  %v428_v32 = vshll.u32 %v3432_v4, 16  ;;  %v432_v59 = vshrl.u32 %v3433_v47, 16  ;;  %v3446_v4 = vld [vmem:[%s4873_s1 + $0x10] sm:$0xff] }
  0x3b   : > { %v741_v24 = vrot.slane %v739_v13, 1  ;;  %v495_v62 = vshrl.u32 %v3442_v49, 16 }
  0x3c   : > { %1647 = vmatpush.bf16.msrb.mxu0 %v3457_v7  ;;  %v3441_v7 = vld [vmem:[%s3799_s13 + $0x68] sm:$0xff]  ;;  %v427_v26 = vrot.slane %v425_v14, 7  ;;  %v434_v14 = vrot.slane %v432_v59, 7  ;;  %v3484_v59 = vld [vmem:[%s4873_s1 + $0x140] sm:$0xff] }
  0x3d   : > { %1325 = vmatpush.bf16.msrb.mxu2 %v3489_v36  ;;  %1558 = vmatpush.bf16.msrb.mxu3 %v3449_v37  ;;  %v488_v16 = vshrl.u32 %v3441_v7, 16  ;;  %v491_v35 = vshll.u32 %v3441_v7, 16  ;;  %v634_v36 = vor.u32 %v633_v19, %v629_v18  ;;  %v638_v37 = vrot.slane %v636_v20, 1 }
  0x3e   : > { %v430_v41 = vor.u32 %v428_v32, %v427_v26  ;;  %v4038_v54 = vsel %vm3813_vm2, %v427_v26, 0  ;;  %v497_v18 = vrot.slane %v495_v62, 7  ;;  %v498_v19 = vshll.u32 %v3442_v49, 16  ;;  %v3453_v49 = vld [vmem:[%s4873_s1 + $0x48] sm:$0xff]  ;;  %v3444_v62 = vld [vmem:[%s4873_s1] sm:$0xff] }
  0x3f   : > { %v490_v34 = vrot.slane %v488_v16, 7  ;;  %v4007_v44 = vsel %vm579_vm3, %v634_v36, %v638_v37  ;;  %v435_v16 = vshll.u32 %v3433_v47, 16  ;;  %v3434_v37 = vld [vmem:[%s3799_s13 + $0x30] sm:$0xff]  ;;  %v3445_v47 = vld [vmem:[%s4873_s1 + $0x8] sm:$0xff] }
  0x40   : > { %1648 = vmatpush.bf16.msrb.mxu0 %v3456_v38  ;;  %v742_v38 = vor.u32 %v741_v24, %v737_v22  ;;  %v4014_v46 = vsel %vm3813_vm2, 0, %v430_v41  ;;  %v500_v32 = vor.u32 %v498_v19, %v497_v18 }
  0x41   : > { %1326 = vmatpush.bf16.msrb.mxu2 %v3488_v9  ;;  %1559 = vmatpush.bf16.msrb.mxu3 %v3448_v10  ;;  %v493_v43 = vor.u32 %v491_v35, %v490_v34  ;;  %4909 = vst [vmem:[#allocation7_spill] sm:$0xff] %v4014_v46  ;;  %v643_v50 = vshll.u32 %v4014_v46, 16  ;;  %v4043_v61 = vsel %vm3813_vm2, %v490_v34, 0  ;;  %v641_v7 = vshrl.u32 %v4014_v46, 16 }
  0x42   : > { %v4010_v45 = vsel %vm579_vm3, %v742_v38, %v746_v40  ;;  %v648_v9 = vshll.u32 %v4038_v54, 16  ;;  %v756_v13 = vshll.u32 %v4043_v61, 16  ;;  %v437_v26 = vor.u32 %v435_v16, %v434_v14  ;;  %v3443_v40 = vld [vmem:[%s3799_s13 + $0x78] sm:$0xff] }
  0x43   : > { %1158 = vmatmul.bf16.gmra.mxu0 %v3879_v57  ;;  %1203 = vmatmul.bf16.gmra.mxu3 %v3887_v60  ;;  %4908 = vst [vmem:[#allocation6_spill] sm:$0xff] %v4010_v45  ;;  %v4019_v48 = vsel %vm3813_vm2, 0, %v493_v43  ;;  %v645_v8 = vrot.slane %v643_v50, 1  ;;  %v4068_v38 = vsel %vm3813_vm2, 0, %v500_v32  ;;  %v3485_v43 = vld [vmem:[%s4873_s1 + $0x148] sm:$0xff]  ;;  %v4087_v50 = vsel %vm3813_vm2, %v434_v14, 0 }
  0x44   : > { %1247 = vmatmul.bf16.gmra.mxu1 %v3921_v27  ;;  %1649 = vmatpush.bf16.msrb.mxu0 %v3455_v11  ;;  %v751_v58 = vshll.u32 %v4019_v48, 16  ;;  %v749_v10 = vshrl.u32 %v4019_v48, 16  ;;  %v650_v22 = vrot.slane %v648_v9, 1  ;;  %v758_v25 = vrot.slane %v756_v13, 1 }
  0x45   : > { %1327 = vmatpush.bf16.msrb.mxu2 %v3487_v51  ;;  %1560 = vmatpush.bf16.msrb.mxu3 %v3447_v52  ;;  %v646_v20 = vor.u32 %v645_v8, %v641_v7  ;;  %v4063_v36 = vsel %vm3813_vm2, 0, %v437_v26  ;;  %v763_v51 = vshll.u32 %v4068_v38, 16  ;;  %v439_v52 = vshrl.u32 %v3434_v37, 16 }
  0x46   : > { %1292 = vmatmul.bf16.gmra.mxu2 %v3924_v29  ;;  %v753_v11 = vrot.slane %v751_v58, 1  ;;  %4911 = vst [vmem:[#allocation9_spill] sm:$0xff] %v4063_v36  ;;  %v655_v41 = vshll.u32 %v4063_v36, 16  ;;  %v502_v58 = vshrl.u32 %v3443_v40, 16  ;;  %v660_v7 = vshll.u32 %v4087_v50, 16 }
  0x47   : > { %v4056_v34 = vsel %vm579_vm3, %v646_v20, %v650_v22  ;;  %v761_v8 = vshrl.u32 %v4068_v38, 16  ;;  %v765_v9 = vrot.slane %v763_v51, 1  ;;  %v442_v13 = vshll.u32 %v3434_v37, 16  ;;  %v3435_v37 = vld [vmem:[%s3799_s13 + $0x38] sm:$0xff] }
  0x48   : > { %1650 = vmatpush.bf16.msrb.mxu0 %v3454_v53  ;;  %v754_v24 = vor.u32 %v753_v11, %v749_v10  ;;  %v4092_v53 = vsel %vm3813_vm2, %v497_v18, 0  ;;  %v441_v11 = vrot.slane %v439_v52, 7  ;;  %v504_v14 = vrot.slane %v502_v58, 7 }
  0x49   : > { %1328 = vmatpush.bf16.msrb.mxu2 %v3486_v63  ;;  %1561 = vmatpush.bf16.msrb.mxu3 %v3446_v4  ;;  %v653_v63 = vshrl.u32 %v4063_v36, 16  ;;  %v657_v4 = vrot.slane %v655_v41, 1  ;;  %v768_v10 = vshll.u32 %v4092_v53, 16  ;;  %v505_v16 = vshll.u32 %v3443_v40, 16 }
  0x4a   : > { %v4059_v35 = vsel %vm579_vm3, %v754_v24, %v758_v25  ;;  %v662_v19 = vrot.slane %v660_v7, 1  ;;  %v766_v20 = vor.u32 %v765_v9, %v761_v8  ;;  %v444_v24 = vor.u32 %v442_v13, %v441_v11  ;;  %v3465_v13 = vld [vmem:[%s4873_s1 + $0xa8] sm:$0xff] }
  0x4b   : > { %4910 = vst [vmem:[#allocation8_spill] sm:$0xff] %v4059_v35  ;;  %v658_v18 = vor.u32 %v657_v4, %v653_v63  ;;  %v770_v22 = vrot.slane %v768_v10, 1  ;;  %v507_v25 = vor.u32 %v505_v16, %v504_v14  ;;  %v446_v52 = vshrl.u32 %v3435_v37, 16 }
  0x4c   : > { %1651 = vmatpush.bf16.msrb.mxu0 %v3453_v49  ;;  %v4112_v41 = vsel %vm3813_vm2, 0, %v444_v24  ;;  %v4129_v49 = vsel %vm3813_vm2, %v441_v11, 0  ;;  %v4134_v58 = vsel %vm3813_vm2, %v504_v14, 0  ;;  %v449_v11 = vshll.u32 %v3435_v37, 16  ;;  %v3452_v37 = vld [vmem:[%s4873_s1 + $0x40] sm:$0xff] }
  0x4d   : > { %1329 = vmatpush.bf16.msrb.mxu2 %v3485_v43  ;;  %1562 = vmatpush.bf16.msrb.mxu3 %v3445_v47  ;;  %v4105_v26 = vsel %vm579_vm3, %v658_v18, %v662_v19  ;;  %v4108_v32 = vsel %vm579_vm3, %v766_v20, %v770_v22  ;;  %4914 = vst [vmem:[#allocation12_spill] sm:$0xff] %v4112_v41  ;;  %v4117_v40 = vsel %vm3813_vm2, 0, %v507_v25  ;;  %v667_v43 = vshll.u32 %v4112_v41, 16  ;;  %v3467_v47 = vld [vmem:[%s4873_s1 + $0xb8] sm:$0xff] }
  0x4e   : > { %4912 = vst [vmem:[#allocation10_spill] sm:$0xff] %v4105_v26  ;;  %v936_v51 = vshll.u32 %v4117_v40, 16  ;;  %1734 = vmatpush.bf16.msrb.mxu1 %v3467_v47  ;;  %v672_v4 = vshll.u32 %v4129_v49, 16  ;;  %v934_v7 = vshrl.u32 %v4117_v40, 16  ;;  %v941_v9 = vshll.u32 %v4134_v58, 16  ;;  %v3436_v47 = vld [vmem:[%s3799_s13 + $0x40] sm:$0xff] }
  0x4f   : > { %4913 = vst [vmem:[#allocation11_spill] sm:$0xff] %v4108_v32  ;;  %v669_v63 = vrot.slane %v667_v43, 1  ;;  %v448_v10 = vrot.slane %v446_v52, 7  ;;  %v3464_v43 = vld [vmem:[%s4873_s1 + $0xa0] sm:$0xff]  ;;  %s2852_s13 = sshll.u32 %s2848_s9, 4  ;;  %s2853_s13 = int_to_ptr.hbm [resolvable:$true] %s2852_s13 }
  0x50   : > { %v938_v8 = vrot.slane %v936_v51, 1  ;;  %v674_v16 = vrot.slane %v672_v4, 1  ;;  %v943_v19 = vrot.slane %v941_v9, 1  ;;  %1652 = vmatpush.bf16.msrb.mxu0 %v3452_v37  ;;  %v456_v9 = vshll.u32 %v3436_v47, 16  ;;  %s3640_s17 = sshra.s32 %s2853_s13, 4  ;;  %s3641_s17 = int_to_ptr.hbm [resolvable:$true] %s3640_s17 }
  0x51   : > { %1330 = vmatpush.bf16.msrb.mxu2 %v3484_v59  ;;  %1563 = vmatpush.bf16.msrb.mxu3 %v3444_v62  ;;  %v3466_v59 = vld [vmem:[%s4873_s1 + $0xb0] sm:$0xff]  ;;  %v665_v62 = vshrl.u32 %v4112_v41, 16  ;;  %v451_v20 = vor.u32 %v449_v11, %v448_v10  ;;  %v4170_v52 = vsel %vm3813_vm2, %v448_v10, 0  ;;  %v3499_v11 = vld [vmem:[%s4873_s1 + $0x1b8] sm:$0xff]  ;;  %s3642_s18 = scalar_lea.hbm %s3641_s17, 1  ;;  %p3647_p0 = scmp.lt.s32.totalorder %s3641_s17, %s4879_s7 }
  0x52   : > { %1735 = vmatpush.bf16.msrb.mxu1 %v3466_v59  ;;  %v939_v18 = vor.u32 %v938_v8, %v934_v7  ;;  %v453_v59 = vshrl.u32 %v3436_v47, 16  ;;  %v684_v7 = vshll.u32 %v4170_v52, 16  ;;  %v3462_v10 = vld [vmem:[%s4873_s1 + $0x90] sm:$0xff]  ;;  %v3461_v47 = vld [vmem:[%s4873_s1 + $0x88] sm:$0xff]  ;;  %p3643_p11 = scmp.ne.s32.totalorder %s3641_s17, %s3642_s18  ;;  %p3648_p1 = scmp.lt.s32.totalorder %s3646_s20, %s3642_s18 }
  0x53   : > { %1163 = vmatmul.bf16.gmra.mxu0 %v3928_v30  ;;  %1208 = vmatmul.bf16.gmra.mxu3 %v3933_v33  ;;  %v670_v14 = vor.u32 %v669_v63, %v665_v62  ;;  %v4154_v25 = vsel %vm3813_vm2, 0, %v451_v20  ;;  %v3463_v62 = vld [vmem:[%s4873_s1 + $0x98] sm:$0xff]  ;;  %v3690_v20 = vmov 0  }
  0x54   : > { %1252 = vmatmul.bf16.gmra.mxu1 %v3964_v0  ;;  %v4150_v24 = vsel %vm579_vm3, %v939_v18, %v943_v19  ;;  %4916 = vst [vmem:[#allocation14_spill] sm:$0xff] %v4154_v25  ;;  %v679_v51 = vshll.u32 %v4154_v25, 16  ;;  %v677_v63 = vshrl.u32 %v4154_v25, 16  ;;  %v455_v8 = vrot.slane %v453_v59, 7  ;;  %p3644_p12 = pnand %p3643_p11, %p3769_p5  ;;  %p3649_p2 = por %p3648_p1, %p3647_p0 }
  0x55   : > { %v4147_v22 = vsel %vm579_vm3, %v670_v14, %v674_v16  ;;  %4915 = vst [vmem:[#allocation13_spill] sm:$0xff] %v4150_v24  ;;  %2016 = vmatpush.bf16.msra.mxu2 %v3499_v11  ;;  %v686_v16 = vrot.slane %v684_v7, 1  ;;  %v824_v18 = vrot.slane %v3825_v21, 1  ;;  %v825_v19 = vrot.slane %v3842_v28, 1  ;;  %v3515_v7 = vld [vmem:[%s4873_s1 + $0x238] sm:$0xff] }
  0x56   : > { %1297 = vmatmul.bf16.gmra.mxu2 %v3967_v2  ;;  %1736 = vmatpush.bf16.msrb.mxu1 %v3465_v13  ;;  %v681_v4 = vrot.slane %v679_v51, 1  ;;  %v3507_v13 = vld [vmem:[%s4873_s1 + $0x1f8] sm:$0xff]  ;;  %v392_v37 = vrot.slane %v3690_v20, 7  ;;  %p3645_p13 = pneg %p3644_p12 }
  0x57   : > { %2105 = vmatpush.bf16.msra.mxu3 %v3507_v13  ;;  %v4195_v59 = vsel %vm820_vm4, %v824_v18, %v825_v19  ;;  %2194 = vmatpush.bf16.msra.mxu0 %v3515_v7  ;;  %v827_v18 = vrot.slane %v3879_v57, 1  ;;  %v828_v19 = vrot.slane %v3903_v1, 1 }
  0x58   : > { %v682_v14 = vor.u32 %v681_v4, %v677_v63  ;;  %v3460_v63 = vld [vmem:[%s4873_s1 + $0x80] sm:$0xff]  ;;  %p3650_p3 = pnand %p3649_p2, %p3645_p13 }
  0x5a   : > { %1737 = vmatpush.bf16.msrb.mxu1 %v3464_v43  ;;  %v458_v43 = vor.u32 %v456_v9, %v455_v8  ;;  %v4192_v51 = vsel %vm579_vm3, %v682_v14, %v686_v16  ;;  %v4218_v9 = vsel %vm3813_vm2, %v455_v8, 0 }
  0x5b   : > { %v696_v13 = vshll.u32 %v4218_v9, 16  ;;  %2106 = vmatpush.bf16.msra.mxu3 %v3506_v17 }
  0x5c   : > { %v4203_v28 = vsel %vm3813_vm2, 0, %v458_v43 }
  0x5d   : > { %4918 = vst [vmem:[#allocation16_spill] sm:$0xff] %v4203_v28  ;;  %v691_v4 = vshll.u32 %v4203_v28, 16  ;;  %v698_v16 = vrot.slane %v696_v13, 1 }
  0x5e   : > { %1738 = vmatpush.bf16.msrb.mxu1 %v3463_v62  ;;  %v4199_v62 = vsel %vm3813_vm2, 0, %v392_v37 }
  0x5f   : > { %4917 = vst [vmem:[#allocation15_spill] sm:$0xff] %v4199_v62  ;;  %v693_v11 = vrot.slane %v691_v4, 1  ;;  %v583_v1 = vshll.u32 %v4199_v62, 16  ;;  %v562_v4 = vsel %vm3813_vm2, %v392_v37, 0 }
  0x62   : > { %1739 = vmatpush.bf16.msrb.mxu1 %v3462_v10  ;;  %v689_v10 = vshrl.u32 %v4203_v28, 16 }
  0x63   : > { %1168 = vmatmul.bf16.gmra.mxu0 %v3971_v3  ;;  %1213 = vmatmul.bf16.gmra.mxu3 %v3976_v6 }
  0x64   : > { %1257 = vmatmul.bf16.gmra.mxu1 %v4007_v44  ;;  %v694_v14 = vor.u32 %v693_v11, %v689_v10 }
  0x66   : > { %1302 = vmatmul.bf16.gmra.mxu2 %v4010_v45  ;;  %1740 = vmatpush.bf16.msrb.mxu1 %v3461_v47  ;;  %v4225_v47 = vsel %vm579_vm3, %v694_v14, %v698_v16  ;;  %v581_v16 = vshrl.u32 %v4199_v62, 16 }
  0x6a   : > { %1741 = vmatpush.bf16.msrb.mxu1 %v3460_v63  ;;  %v4230_v63 = vsel %vm820_vm4, %v827_v18, %v828_v19  ;;  %v585_v18 = vrot.slane %v583_v1, 1  ;;  %v588_v19 = vshll.u32 %v562_v4, 16  ;;  %v830_v1 = vrot.slane %v3928_v30, 1 }
  0x6c   : > { %v586_v37 = vor.u32 %v585_v18, %v581_v16 }
  0x73   : > { %1173 = vmatmul.bf16.gmra.mxu0 %v4014_v46  ;;  %1218 = vmatmul.bf16.gmra.mxu3 %v4019_v48 }
  0x74   : > { %1262 = vmatmul.bf16.gmra.mxu1 %v4056_v34 }
  0x76   : > { %1307 = vmatmul.bf16.gmra.mxu2 %v4059_v35 }
  0x83   : > { %1178 = vmatmul.bf16.gmra.mxu0 %v4063_v36  ;;  %1223 = vmatmul.bf16.gmra.mxu3 %v4068_v38 }
  0x84   : > { %1267 = vmatmul.bf16.gmra.mxu1 %v4105_v26 }
  0x86   : > { %1312 = vmatmul.bf16.gmra.mxu2 %v4108_v32 }
  0x93   : > { %1183 = vmatmul.bf16.gmra.mxu0 %v4112_v41  ;;  %1228 = vmatmul.bf16.gmra.mxu3 %v4117_v40 }
  0x94   : > { %1272 = vmatmul.bf16.gmra.mxu1 %v4147_v22 }
  0x96   : > { %1317 = vmatmul.bf16.gmra.mxu2 %v4150_v24 }
  0xa3   : > { %1188 = vmatmul.bf16.gmra.mxu0 %v4154_v25  ;;  %1564 = vmatmul.bf16.vlgmr.msrb.gmra.mxu3 %v4199_v62 }
  0xa4   : > { %1277 = vmatmul.bf16.gmra.mxu1 %v4192_v51 }
  0xa6   : > { %1331 = vmatmul.bf16.vlgmr.msrb.gmra.mxu2 %v4195_v59 }
  0xb0   : > { %v1154_v20 = vpop.f32.mrf.mxu0 }
  0xb1   : > { %v1243_v43 = vpop.f32.mrf.mxu1 }
  0xb2   : > { %v4227_v8 = vadd.f32 %v1243_v43, %v1154_v20  ;;  %v590_v43 = vrot.slane %v588_v19, 1 }
  0xb3   : > { %1193 = vmatmul.bf16.gmra.mxu0 %v4203_v28  ;;  %1569 = vmatmul.bf16.gmra.mxu3 %v3825_v21  ;;  %v3498_v21 = vld [vmem:[%s4873_s1 + $0x1b0] sm:$0xff] }
  0xb4   : > { %1282 = vmatmul.bf16.gmra.mxu1 %v4225_v47  ;;  %2017 = vmatpush.bf16.msra.mxu2 %v3498_v21  ;;  %v4256_v45 = vsel %vm579_vm3, %v586_v37, %v590_v43  ;;  %v833_v37 = vrot.slane %v3971_v3, 1  ;;  %v834_v43 = vrot.slane %v3995_v12, 1 }
  0xb5   : > { %4920 = vst [vmem:[#allocation18_spill] sm:$0xff] %v4256_v45 }
  0xb6   : > { %1336 = vmatmul.bf16.gmra.mxu2 %v4230_v63  ;;  %v1199_v10 = vpop.f32.mrf.mxu3 }
  0xb8   : > { %v1156_v11 = vpop.f32.mrf.mxu0 }
  0xb9   : > { %v1288_v7 = vpop.f32.mrf.mxu2  ;;  %v1245_v14 = vpop.f32.mrf.mxu1 }
  0xba   : > { %v4239_v13 = vadd.f32 %v1288_v7, %v1199_v10  ;;  %v4242_v20 = vadd.f32 %v1245_v14, %v1156_v11  ;;  %v821_v7 = vrot.slane %v4199_v62, 1  ;;  %v822_v10 = vrot.slane %v562_v4, 1 }
  0xbb   : > { %v831_v11 = vrot.slane %v3952_v39, 1  ;;  %v3514_v39 = vld [vmem:[%s4873_s1 + $0x230] sm:$0xff] }
  0xbc   : > { %4919 = vst [vmem:[#allocation17_spill] sm:$0xff] %v4239_v13  ;;  %v4259_v21 = vsel %vm820_vm4, %v821_v7, %v822_v10  ;;  %2195 = vmatpush.bf16.msra.mxu0 %v3514_v39  ;;  %v4284_v39 = vsel %vm820_vm4, %v833_v37, %v834_v43  ;;  %v3497_v37 = vld [vmem:[%s4873_s1 + $0x1a8] sm:$0xff]  ;;  %v837_v43 = vrot.slane %v4038_v54, 1 }
  0xbd   : > { %4921 = vst [vmem:[#allocation19_spill] sm:$0xff] %v4259_v21  ;;  %v4264_v4 = vsel %vm820_vm4, %v830_v1, %v831_v11  ;;  %2018 = vmatpush.bf16.msra.mxu2 %v3497_v37  ;;  %v3513_v54 = vld [vmem:[%s4873_s1 + $0x228] sm:$0xff] }
  0xbe   : > { %v1201_v24 = vpop.f32.mrf.mxu3  ;;  %4922 = vst [vmem:[#allocation20_spill] sm:$0xff] %v4264_v4 }
  0xbf   : > { %4925 = vst [vmem:[#allocation23_spill] sm:$0xff] %v4284_v39 }
  0xc0   : > { %v1159_v13 = vpop.f32.mrf.mxu0  ;;  %2196 = vmatpush.bf16.msra.mxu0 %v3513_v54 }
  0xc1   : > { %v1290_v14 = vpop.f32.mrf.mxu2  ;;  %v1248_v35 = vpop.f32.mrf.mxu1 }
  0xc2   : > { %v4253_v32 = vadd.f32 %v1290_v14, %v1201_v24  ;;  %v4261_v16 = vadd.f32 %v1248_v35, %v1159_v13 }
  0xc3   : > { %1653 = vmatmul.bf16.vlgmr.msrb.gmra.mxu0 %v4256_v45  ;;  %1574 = vmatmul.bf16.gmra.mxu3 %v3879_v57 }
  0xc4   : > { %1742 = vmatmul.bf16.vlgmr.msrb.gmra.mxu1 %v4259_v21 }
  0xc6   : > { %1341 = vmatmul.bf16.gmra.mxu2 %v4264_v4  ;;  %v1204_v18 = vpop.f32.mrf.mxu3 }
  0xc8   : > { %v1161_v35 = vpop.f32.mrf.mxu0 }
  0xc9   : > { %v1293_v24 = vpop.f32.mrf.mxu2  ;;  %v1250_v19 = vpop.f32.mrf.mxu1 }
  0xca   : > { %v4273_v13 = vadd.f32 %v1293_v24, %v1204_v18  ;;  %v4275_v17 = vadd.f32 %v1250_v19, %v1161_v35 }
  0xcc   : > { %4923 = vst [vmem:[#allocation21_spill] sm:$0xff] %v4273_v13 }
  0xce   : > { %v1206_v10 = vpop.f32.mrf.mxu3 }
  0xd0   : > { %v1164_v1 = vpop.f32.mrf.mxu0 }
  0xd1   : > { %v1295_v7 = vpop.f32.mrf.mxu2  ;;  %v1253_v14 = vpop.f32.mrf.mxu1 }
  0xd2   : > { %v4279_v11 = vadd.f32 %v1295_v7, %v1206_v10  ;;  %v4281_v21 = vadd.f32 %v1253_v14, %v1164_v1 }
  0xd3   : > { %1658 = vmatmul.bf16.gmra.mxu0 %v3872_v55  ;;  %1579 = vmatmul.bf16.gmra.mxu3 %v3928_v30  ;;  %v3505_v55 = vld [vmem:[%s4873_s1 + $0x1e8] sm:$0xff] }
  0xd4   : > { %4924 = vst [vmem:[#allocation22_spill] sm:$0xff] %v4279_v11  ;;  %1747 = vmatmul.bf16.gmra.mxu1 %v4195_v59  ;;  %2107 = vmatpush.bf16.msra.mxu3 %v3505_v55  ;;  %v836_v59 = vrot.slane %v4014_v46, 1 }
  0xd6   : > { %1346 = vmatmul.bf16.gmra.mxu2 %v4284_v39  ;;  %v1209_v24 = vpop.f32.mrf.mxu3 }
  0xd8   : > { %v1166_v18 = vpop.f32.mrf.mxu0 }
  0xd9   : > { %v1298_v12 = vpop.f32.mrf.mxu2  ;;  %v1255_v19 = vpop.f32.mrf.mxu1 }
  0xda   : > { %v4290_v35 = vadd.f32 %v1298_v12, %v1209_v24  ;;  %v4292_v7 = vadd.f32 %v1255_v19, %v1166_v18  ;;  %v4307_v19 = vsel %vm820_vm4, %v836_v59, %v837_v43 }
  0xdb   : > { %4928 = vst [vmem:[#allocation26_spill] sm:$0xff] %v4307_v19 }
  0xdc   : > { %4926 = vst [vmem:[#allocation24_spill] sm:$0xff] %v4290_v35 }
  0xde   : > { %v1211_v1 = vpop.f32.mrf.mxu3 }
  0xe0   : > { %v1169_v14 = vpop.f32.mrf.mxu0 }
  0xe1   : > { %v1300_v10 = vpop.f32.mrf.mxu2  ;;  %v1258_v24 = vpop.f32.mrf.mxu1 }
  0xe2   : > { %v4302_v12 = vadd.f32 %v1300_v10, %v1211_v1  ;;  %v4304_v18 = vadd.f32 %v1258_v24, %v1169_v14  ;;  %v839_v14 = vrot.slane %v4063_v36, 1  ;;  %v840_v24 = vrot.slane %v4087_v50, 1 }
  0xe3   : > { %1663 = vmatmul.bf16.gmra.mxu0 %v3921_v27  ;;  %1584 = vmatmul.bf16.gmra.mxu3 %v3971_v3 }
  0xe4   : > { %4927 = vst [vmem:[#allocation25_spill] sm:$0xff] %v4302_v12  ;;  %1752 = vmatmul.bf16.gmra.mxu1 %v4230_v63  ;;  %v4327_v54 = vsel %vm820_vm4, %v839_v14, %v840_v24  ;;  %v843_v14 = vrot.slane %v4129_v49, 1  ;;  %v3512_v49 = vld [vmem:[%s4873_s1 + $0x220] sm:$0xff] }
  0xe5   : > { %4931 = vst [vmem:[#allocation29_spill] sm:$0xff] %v4327_v54  ;;  %2197 = vmatpush.bf16.msra.mxu0 %v3512_v49 }
  0xe6   : > { %1351 = vmatmul.bf16.gmra.mxu2 %v4307_v19  ;;  %v1214_v55 = vpop.f32.mrf.mxu3 }
  0xe8   : > { %v1171_v10 = vpop.f32.mrf.mxu0 }
  0xe9   : > { %v1303_v37 = vpop.f32.mrf.mxu2  ;;  %v1260_v59 = vpop.f32.mrf.mxu1 }
  0xea   : > { %v4316_v1 = vadd.f32 %v1303_v37, %v1214_v55  ;;  %v4318_v43 = vadd.f32 %v1260_v59, %v1171_v10  ;;  %v842_v59 = vrot.slane %v4112_v41, 1 }
  0xec   : > { %4929 = vst [vmem:[#allocation27_spill] sm:$0xff] %v4316_v1 }
  0xee   : > { %v1216_v62 = vpop.f32.mrf.mxu3 }
  0xf0   : > { %v1174_v12 = vpop.f32.mrf.mxu0 }
  0xf1   : > { %v1305_v45 = vpop.f32.mrf.mxu2  ;;  %v1263_v11 = vpop.f32.mrf.mxu1 }
  0xf2   : > { %v4322_v35 = vadd.f32 %v1305_v45, %v1216_v62  ;;  %v4324_v13 = vadd.f32 %v1263_v11, %v1174_v12  ;;  %v3496_v11 = vld [vmem:[%s4873_s1 + $0x1a0] sm:$0xff] }
  0xf3   : > { %1668 = vmatmul.bf16.gmra.mxu0 %v3964_v0  ;;  %1589 = vmatmul.bf16.gmra.mxu3 %v4014_v46  ;;  %v3504_v12 = vld [vmem:[%s4873_s1 + $0x1e0] sm:$0xff] }
  0xf4   : > { %4930 = vst [vmem:[#allocation28_spill] sm:$0xff] %v4322_v35  ;;  %1757 = vmatmul.bf16.gmra.mxu1 %v4264_v4  ;;  %2019 = vmatpush.bf16.msra.mxu2 %v3496_v11  ;;  %v4350_v35 = vsel %vm820_vm4, %v842_v59, %v843_v14 }
  0xf5   : > { %2108 = vmatpush.bf16.msra.mxu3 %v3504_v12 }
  0xf6   : > { %1356 = vmatmul.bf16.gmra.mxu2 %v4327_v54  ;;  %v1219_v37 = vpop.f32.mrf.mxu3 }
  0xf8   : > { %v1176_v55 = vpop.f32.mrf.mxu0 }
  0xf9   : > { %v1308_v50 = vpop.f32.mrf.mxu2  ;;  %v1265_v45 = vpop.f32.mrf.mxu1 }
  0xfa   : > { %v4333_v10 = vadd.f32 %v1308_v50, %v1219_v37  ;;  %v4335_v62 = vadd.f32 %v1265_v45, %v1176_v55 }
  0xfc   : > { %4932 = vst [vmem:[#allocation30_spill] sm:$0xff] %v4333_v10 }
  0xfe   : > { %v1221_v50 = vpop.f32.mrf.mxu3 }
 0x100   : > { %v1179_v37 = vpop.f32.mrf.mxu0 }
 0x101   : > { %v1310_v24 = vpop.f32.mrf.mxu2  ;;  %v1268_v55 = vpop.f32.mrf.mxu1 }
 0x102   : > { %v4345_v10 = vadd.f32 %v1310_v24, %v1221_v50  ;;  %v4347_v45 = vadd.f32 %v1268_v55, %v1179_v37  ;;  %v845_v37 = vrot.slane %v4154_v25, 1  ;;  %v846_v55 = vrot.slane %v4170_v52, 1 }
 0x103   : > { %1673 = vmatmul.bf16.gmra.mxu0 %v4007_v44  ;;  %1594 = vmatmul.bf16.gmra.mxu3 %v4063_v36 }
 0x104   : > { %4933 = vst [vmem:[#allocation31_spill] sm:$0xff] %v4345_v10  ;;  %1762 = vmatmul.bf16.gmra.mxu1 %v4284_v39  ;;  %v4370_v49 = vsel %vm820_vm4, %v845_v37, %v846_v55  ;;  %v849_v37 = vrot.slane %v4218_v9, 1  ;;  %v3511_v9 = vld [vmem:[%s4873_s1 + $0x218] sm:$0xff] }
 0x105   : > { %4936 = vst [vmem:[#allocation34_spill] sm:$0xff] %v4370_v49  ;;  %2198 = vmatpush.bf16.msra.mxu0 %v3511_v9 }
 0x106   : > { %1361 = vmatmul.bf16.gmra.mxu2 %v4350_v35  ;;  %v1224_v12 = vpop.f32.mrf.mxu3 }
 0x108   : > { %v1181_v24 = vpop.f32.mrf.mxu0 }
 0x109   : > { %v1313_v11 = vpop.f32.mrf.mxu2  ;;  %v1270_v59 = vpop.f32.mrf.mxu1 }
 0x10a   : > { %v4359_v50 = vadd.f32 %v1313_v11, %v1224_v12  ;;  %v4361_v14 = vadd.f32 %v1270_v59, %v1181_v24  ;;  %v848_v59 = vrot.slane %v4203_v28, 1 }
 0x10c   : > { %4934 = vst [vmem:[#allocation32_spill] sm:$0xff] %v4359_v50 }
 0x10e   : > { %v1226_v1 = vpop.f32.mrf.mxu3 }
 0x110   : > { %v1184_v36 = vpop.f32.mrf.mxu0 }
 0x111   : > { %v1315_v10 = vpop.f32.mrf.mxu2  ;;  %v1273_v46 = vpop.f32.mrf.mxu1 }
 0x112   : > { %v4365_v39 = vadd.f32 %v1315_v10, %v1226_v1  ;;  %v4367_v4 = vadd.f32 %v1273_v46, %v1184_v36  ;;  %v3495_v46 = vld [vmem:[%s4873_s1 + $0x198] sm:$0xff] }
 0x113   : > { %1678 = vmatmul.bf16.gmra.mxu0 %v4056_v34  ;;  %1599 = vmatmul.bf16.gmra.mxu3 %v4112_v41  ;;  %v3503_v36 = vld [vmem:[%s4873_s1 + $0x1d8] sm:$0xff] }
 0x114   : > { %4935 = vst [vmem:[#allocation33_spill] sm:$0xff] %v4365_v39  ;;  %1767 = vmatmul.bf16.gmra.mxu1 %v4307_v19  ;;  %2020 = vmatpush.bf16.msra.mxu2 %v3495_v46  ;;  %v4393_v39 = vsel %vm820_vm4, %v848_v59, %v849_v37 }
 0x115   : > { %2109 = vmatpush.bf16.msra.mxu3 %v3503_v36 }
 0x116   : > { %1366 = vmatmul.bf16.gmra.mxu2 %v4370_v49  ;;  %v1229_v11 = vpop.f32.mrf.mxu3 }
 0x118   : > { %v1186_v12 = vpop.f32.mrf.mxu0 }
 0x119   : > { %v1318_v52 = vpop.f32.mrf.mxu2  ;;  %v1275_v1 = vpop.f32.mrf.mxu1 }
 0x11a   : > { %v4376_v24 = vadd.f32 %v1318_v52, %v1229_v11  ;;  %v4378_v10 = vadd.f32 %v1275_v1, %v1186_v12 }
 0x11c   : > { %4937 = vst [vmem:[#allocation35_spill] sm:$0xff] %v4376_v24 }
 0x11e   : > { %v1231_v52 = vpop.f32.mrf.mxu3 }
 0x120   : > { %v1189_v11 = vpop.f32.mrf.mxu0 }
 0x121   : > { %v1320_v55 = vpop.f32.mrf.mxu2  ;;  %v1278_v12 = vpop.f32.mrf.mxu1 }
 0x122   : > { %v4388_v24 = vadd.f32 %v1320_v55, %v1231_v52  ;;  %v4390_v1 = vadd.f32 %v1278_v12, %v1189_v11  ;;  %v851_v12 = vrot.slane %v3830_v23, 1 }
 0x123   : > { %1683 = vmatmul.bf16.gmra.mxu0 %v4105_v26  ;;  %1604 = vmatmul.bf16.gmra.mxu3 %v4154_v25 }
 0x124   : > { %4938 = vst [vmem:[#allocation36_spill] sm:$0xff] %v4388_v24  ;;  %1772 = vmatmul.bf16.gmra.mxu1 %v4327_v54  ;;  %v852_v24 = vrot.slane %v3847_v31, 1  ;;  %v3523_v31 = vld [vmem:[%s4875_s3 + $0x38] sm:$0xff] }
 0x125   : > { %2467 = vmatpush.bf16.msra.mxu1 %v3523_v31 }
 0x126   : > { %1371 = vmatmul.bf16.gmra.mxu2 %v4393_v39  ;;  %v1565_v36 = vpop.f32.mrf.mxu3  ;;  %v4411_v26 = vsel %vm820_vm4, %v851_v12, %v852_v24 }
 0x128   : > { %v1191_v52 = vpop.f32.mrf.mxu0 }
 0x129   : > { %v1332_v46 = vpop.f32.mrf.mxu2  ;;  %v1280_v59 = vpop.f32.mrf.mxu1 }
 0x12a   : > { %v1333_v55 = vadd.f32 %v1332_v46, %v4227_v8  ;;  %v4403_v37 = vadd.f32 %v1280_v59, %v1191_v52  ;;  %v3494_v46 = vld [vmem:[%s4873_s1 + $0x190] sm:$0xff]  ;;  %v855_v52 = vrot.slane %v3911_v5, 1 }
 0x12b   : > { %2021 = vmatpush.bf16.msra.mxu2 %v3494_v46  ;;  %v3510_v5 = vld [vmem:[%s4873_s1 + $0x210] sm:$0xff] }
 0x12c   : > { %v1566_v11 = vadd.f32 %v1565_v36, %v1333_v55  ;;  %v3502_v36 = vld [vmem:[%s4873_s1 + $0x1d0] sm:$0xff]  ;;  %v854_v55 = vrot.slane %v3887_v60, 1  ;;  %2199 = vmatpush.bf16.msra.mxu0 %v3510_v5 }
 0x12d   : > { %2110 = vmatpush.bf16.msra.mxu3 %v3502_v36 }
 0x12e   : > { %v1567_v25 = vpop.f32.mrf.mxu3 }
 0x130   : > { %v1194_v41 = vpop.f32.mrf.mxu0 }
 0x131   : > { %v1334_v50 = vpop.f32.mrf.mxu2  ;;  %v1283_v19 = vpop.f32.mrf.mxu1 }
 0x132   : > { %v1335_v54 = vadd.f32 %v1334_v50, %v4242_v20  ;;  %v4408_v9 = vadd.f32 %v1283_v19, %v1194_v41 }
 0x133   : > { %1688 = vmatmul.bf16.gmra.mxu0 %v4147_v22  ;;  %1609 = vmatmul.bf16.gmra.mxu3 %v4203_v28 }
 0x134   : > { %v1568_v8 = vadd.f32 %v1567_v25, %v1335_v54  ;;  %1777 = vmatmul.bf16.gmra.mxu1 %v4350_v35 }
 0x136   : > { %1376 = vmatmul.bf16.gmra.mxu2 %v4411_v26  ;;  %v1570_v41 = vpop.f32.mrf.mxu3 }
 0x138   : > { %v1196_v50 = vpop.f32.mrf.mxu0 }
 0x139   : > { %v1337_v20 = vpop.f32.mrf.mxu2  ;;  %v1285_v24 = vpop.f32.mrf.mxu1 }
 0x13a   : > { %v1338_v19 = vadd.f32 %v1337_v20, %v4261_v16  ;;  %v4421_v25 = vadd.f32 %v1285_v24, %v1196_v50 }
 0x13c   : > { %v1571_v54 = vadd.f32 %v1570_v41, %v1338_v19  ;;  %v4433_v19 = vsel %vm820_vm4, %v854_v55, %v855_v52 }
 0x13e   : > { %v1572_v59 = vpop.f32.mrf.mxu3 }
 0x140   : > { %v1654_v31 = vpop.f32.mrf.mxu0 }
 0x141   : > { %v1339_v16 = vpop.f32.mrf.mxu2  ;;  %v1743_v20 = vpop.f32.mrf.mxu1  ;;  %v1655_v41 = vadd.f32 %v1654_v31, %v1566_v11  ;;  %v858_v31 = vrot.slane %v3957_v42, 1  ;;  %v3522_v42 = vld [vmem:[%s4875_s3 + $0x30] sm:$0xff] }
 0x142   : > { %v1340_v12 = vadd.f32 %v1339_v16, %v4275_v17  ;;  %2468 = vmatpush.bf16.msra.mxu1 %v3522_v42 }
 0x143   : > { %v4435_v24 = vadd.f32 %v1743_v20, %v1655_v41  ;;  %1693 = vmatmul.bf16.gmra.mxu0 %v4192_v51  ;;  %1614 = vmatmul.bf16.gmra.mxu3 %v3830_v23 }
 0x144   : > { %v1573_v50 = vadd.f32 %v1572_v59, %v1340_v12  ;;  %1782 = vmatmul.bf16.gmra.mxu1 %v4370_v49  ;;  %v857_v12 = vrot.slane %v3933_v33, 1 }
 0x145   : > { %4939 = vst [vmem:[#allocation37_spill] sm:$0xff] %v4435_v24 }
 0x146   : > { %1381 = vmatmul.bf16.gmra.mxu2 %v4433_v19  ;;  %v1575_v11 = vpop.f32.mrf.mxu3  ;;  %v4451_v28 = vsel %vm820_vm4, %v857_v12, %v858_v31  ;;  %v861_v12 = vrot.slane %v4000_v15, 1  ;;  %v3509_v15 = vld [vmem:[%s4873_s1 + $0x208] sm:$0xff] }
 0x147   : > { %2200 = vmatpush.bf16.msra.mxu0 %v3509_v15 }
 0x148   : > { %v1656_v36 = vpop.f32.mrf.mxu0 }
 0x149   : > { %v1342_v17 = vpop.f32.mrf.mxu2  ;;  %v1745_v55 = vpop.f32.mrf.mxu1  ;;  %v1657_v52 = vadd.f32 %v1656_v36, %v1568_v8  ;;  %v3493_v36 = vld [vmem:[%s4873_s1 + $0x188] sm:$0xff] }
 0x14a   : > { %v1343_v46 = vadd.f32 %v1342_v17, %v4281_v21  ;;  %2022 = vmatpush.bf16.msra.mxu2 %v3493_v36 }
 0x14b   : > { %v4445_v59 = vadd.f32 %v1745_v55, %v1657_v52  ;;  %v3501_v55 = vld [vmem:[%s4873_s1 + $0x1c8] sm:$0xff]  ;;  %v860_v52 = vrot.slane %v3976_v6, 1 }
 0x14c   : > { %v1576_v16 = vadd.f32 %v1575_v11, %v1343_v46  ;;  %2111 = vmatpush.bf16.msra.mxu3 %v3501_v55 }
 0x14d   : > { %v4475_v42 = vsel %vm820_vm4, %v860_v52, %v861_v12  ;;  %v863_v52 = vrot.slane %v4019_v48, 1  ;;  %v864_v12 = vrot.slane %v4043_v61, 1  ;;  %v3521_v61 = vld [vmem:[%s4875_s3 + $0x28] sm:$0xff] }
 0x14e   : > { %v1577_v41 = vpop.f32.mrf.mxu3  ;;  %2469 = vmatpush.bf16.msra.mxu1 %v3521_v61 }
 0x14f   : > { %v4493_v15 = vsel %vm820_vm4, %v863_v52, %v864_v12  ;;  %v3492_v52 = vld [vmem:[%s4873_s1 + $0x180] sm:$0xff] }
 0x150   : > { %v1659_v23 = vpop.f32.mrf.mxu0  ;;  %v3500_v12 = vld [vmem:[%s4873_s1 + $0x1c0] sm:$0xff]  ;;  %2023 = vmatpush.bf16.msra.mxu2 %v3492_v52 }
 0x151   : > { %v1344_v20 = vpop.f32.mrf.mxu2  ;;  %v1748_v5 = vpop.f32.mrf.mxu1  ;;  %v1660_v49 = vadd.f32 %v1659_v23, %v1571_v54  ;;  %2112 = vmatpush.bf16.msra.mxu3 %v3500_v12  ;;  %v948_v12 = vrot.slane %v4117_v40, 1 }
 0x152   : > { %v1345_v24 = vadd.f32 %v1344_v20, %v4292_v7 }
 0x153   : > { %v4453_v17 = vadd.f32 %v1748_v5, %v1660_v49  ;;  %1698 = vmatmul.bf16.gmra.mxu0 %v4225_v47  ;;  %1619 = vmatmul.bf16.gmra.mxu3 %v3887_v60 }
 0x154   : > { %v1578_v21 = vadd.f32 %v1577_v41, %v1345_v24  ;;  %1787 = vmatmul.bf16.gmra.mxu1 %v4393_v39 }
 0x156   : > { %1386 = vmatmul.bf16.gmra.mxu2 %v4451_v28  ;;  %v1580_v7 = vpop.f32.mrf.mxu3 }
 0x158   : > { %v1661_v54 = vpop.f32.mrf.mxu0 }
 0x159   : > { %v1347_v23 = vpop.f32.mrf.mxu2  ;;  %v1750_v49 = vpop.f32.mrf.mxu1  ;;  %v1662_v24 = vadd.f32 %v1661_v54, %v1573_v50 }
 0x15a   : > { %v1348_v8 = vadd.f32 %v1347_v23, %v4304_v18 }
 0x15b   : > { %v4463_v46 = vadd.f32 %v1750_v49, %v1662_v24 }
 0x15c   : > { %v1581_v11 = vadd.f32 %v1580_v7, %v1348_v8 }
 0x15e   : > { %v1582_v31 = vpop.f32.mrf.mxu3 }
 0x160   : > { %v1664_v20 = vpop.f32.mrf.mxu0 }
 0x161   : > { %v1349_v18 = vpop.f32.mrf.mxu2  ;;  %v1753_v41 = vpop.f32.mrf.mxu1  ;;  %v1665_v5 = vadd.f32 %v1664_v20, %v1576_v16 }
 0x162   : > { %v1350_v50 = vadd.f32 %v1349_v18, %v4318_v43 }
 0x163   : > { %v4477_v7 = vadd.f32 %v1753_v41, %v1665_v5  ;;  %1703 = vmatmul.bf16.gmra.mxu0 %v3875_v56  ;;  %1624 = vmatmul.bf16.gmra.mxu3 %v3933_v33 }
 0x164   : > { %v1583_v23 = vadd.f32 %v1582_v31, %v1350_v50  ;;  %1792 = vmatmul.bf16.gmra.mxu1 %v4411_v26 }
 0x166   : > { %1391 = vmatmul.bf16.gmra.mxu2 %v4475_v42  ;;  %v1585_v16 = vpop.f32.mrf.mxu3 }
 0x168   : > { %v1666_v54 = vpop.f32.mrf.mxu0 }
 0x169   : > { %v1352_v43 = vpop.f32.mrf.mxu2  ;;  %v1755_v49 = vpop.f32.mrf.mxu1  ;;  %v1667_v24 = vadd.f32 %v1666_v54, %v1578_v21 }
 0x16a   : > { %v1353_v8 = vadd.f32 %v1352_v43, %v4324_v13 }
 0x16b   : > { %v4487_v55 = vadd.f32 %v1755_v49, %v1667_v24 }
 0x16c   : > { %v1586_v36 = vadd.f32 %v1585_v16, %v1353_v8 }
 0x16e   : > { %v1587_v31 = vpop.f32.mrf.mxu3 }
 0x170   : > { %v1669_v20 = vpop.f32.mrf.mxu0 }
 0x171   : > { %v1354_v18 = vpop.f32.mrf.mxu2  ;;  %v1758_v41 = vpop.f32.mrf.mxu1  ;;  %v1670_v5 = vadd.f32 %v1669_v20, %v1581_v11 }
 0x172   : > { %v1355_v50 = vadd.f32 %v1354_v18, %v4335_v62  ;;  %v866_v18 = vrot.slane %v4068_v38, 1 }
 0x173   : > { %v4495_v43 = vadd.f32 %v1758_v41, %v1670_v5  ;;  %1708 = vmatmul.bf16.gmra.mxu0 %v3924_v29  ;;  %1629 = vmatmul.bf16.gmra.mxu3 %v3976_v6 }
 0x174   : > { %v1588_v13 = vadd.f32 %v1587_v31, %v1355_v50  ;;  %1797 = vmatmul.bf16.gmra.mxu1 %v4433_v19  ;;  %v867_v31 = vrot.slane %v4092_v53, 1  ;;  %v3508_v53 = vld [vmem:[%s4873_s1 + $0x200] sm:$0xff] }
 0x175   : > { %2201 = vmatpush.bf16.msra.mxu0 %v3508_v53 }
 0x176   : > { %1396 = vmatmul.bf16.gmra.mxu2 %v4493_v15  ;;  %v1590_v21 = vpop.f32.mrf.mxu3  ;;  %v4517_v61 = vsel %vm820_vm4, %v866_v18, %v867_v31  ;;  %v949_v18 = vrot.slane %v4134_v58, 1  ;;  %v3520_v58 = vld [vmem:[%s4875_s3 + $0x20] sm:$0xff] }
 0x177   : > { %2470 = vmatpush.bf16.msra.mxu1 %v3520_v58  ;;  %v4942_v58 = vld [vmem:[#allocation8_spill] sm:$0xff] }
 0x178   : > { %v1671_v16 = vpop.f32.mrf.mxu0 }
 0x179   : > { %v1357_v62 = vpop.f32.mrf.mxu2  ;;  %v1760_v8 = vpop.f32.mrf.mxu1  ;;  %v1672_v54 = vadd.f32 %v1671_v16, %v1583_v23 }
 0x17a   : > { %v1358_v11 = vadd.f32 %v1357_v62, %v4347_v45 }
 0x17b   : > { %v4505_v24 = vadd.f32 %v1760_v8, %v1672_v54 }
 0x17c   : > { %v1591_v49 = vadd.f32 %v1590_v21, %v1358_v11 }
 0x17e   : > { %v1592_v50 = vpop.f32.mrf.mxu3 }
 0x180   : > { %v1674_v20 = vpop.f32.mrf.mxu0 }
 0x181   : > { %v1359_v45 = vpop.f32.mrf.mxu2  ;;  %v1763_v41 = vpop.f32.mrf.mxu1  ;;  %v1675_v5 = vadd.f32 %v1674_v20, %v1586_v36 }
 0x182   : > { %v1360_v23 = vadd.f32 %v1359_v45, %v4361_v14 }
 0x183   : > { %v4519_v21 = vadd.f32 %v1763_v41, %v1675_v5  ;;  %1713 = vmatmul.bf16.gmra.mxu0 %v3967_v2  ;;  %1634 = vmatmul.bf16.gmra.mxu3 %v4019_v48  ;;  %v4537_v5 = vsel %vm820_vm4, %v948_v12, %v949_v18 }
 0x184   : > { %v1593_v62 = vadd.f32 %v1592_v50, %v1360_v23  ;;  %1802 = vmatmul.bf16.gmra.mxu1 %v4451_v28  ;;  %4940 = vst [vmem:[#allocation38_spill] sm:$0xff] %v4537_v5 }
 0x186   : > { %1401 = vmatmul.bf16.gmra.mxu2 %v4517_v61  ;;  %v1595_v36 = vpop.f32.mrf.mxu3 }
 0x188   : > { %v1676_v16 = vpop.f32.mrf.mxu0 }
 0x189   : > { %v1362_v14 = vpop.f32.mrf.mxu2  ;;  %v4529_v8 = vpop.f32.mrf.mxu1  ;;  %v4531_v54 = vadd.f32 %v1676_v16, %v1588_v13  ;;  %v4941_v13 = vld [vmem:[#allocation6_spill] sm:$0xff] }
 0x18a   : > { %v1363_v11 = vadd.f32 %v1362_v14, %v4367_v4 }
 0x18c   : > { %v1596_v52 = vadd.f32 %v1595_v36, %v1363_v11 }
 0x18e   : > { %v1597_v45 = vpop.f32.mrf.mxu3 }
 0x190   : > { %v1679_v23 = vpop.f32.mrf.mxu0 }
 0x191   : > { %v1364_v31 = vpop.f32.mrf.mxu2  ;;  %v1768_v20 = vpop.f32.mrf.mxu1  ;;  %v1680_v41 = vadd.f32 %v1679_v23, %v1591_v49 }
 0x192   : > { %v1365_v50 = vadd.f32 %v1364_v31, %v4378_v10 }
 0x193   : > { %v4539_v53 = vadd.f32 %v1768_v20, %v1680_v41  ;;  %1718 = vmatmul.bf16.gmra.mxu0 %v4941_v13  ;;  %1639 = vmatmul.bf16.gmra.mxu3 %v4068_v38 }
 0x194   : > { %v1598_v4 = vadd.f32 %v1597_v45, %v1365_v50  ;;  %1807 = vmatmul.bf16.gmra.mxu1 %v4475_v42 }
 0x196   : > { %1406 = vmatmul.bf16.gmra.mxu2 %v4537_v5  ;;  %v1600_v49 = vpop.f32.mrf.mxu3 }
 0x198   : > { %v1681_v36 = vpop.f32.mrf.mxu0 }
 0x199   : > { %v1367_v10 = vpop.f32.mrf.mxu2  ;;  %v4549_v11 = vpop.f32.mrf.mxu1  ;;  %v4551_v16 = vadd.f32 %v1681_v36, %v1593_v62 }
 0x19a   : > { %v1368_v14 = vadd.f32 %v1367_v10, %v4390_v1 }
 0x19c   : > { %v1601_v12 = vadd.f32 %v1600_v49, %v1368_v14 }
 0x19e   : > { %v1602_v31 = vpop.f32.mrf.mxu3 }
 0x1a0   : > { %v1684_v50 = vpop.f32.mrf.mxu0 }
 0x1a1   : > { %v1369_v18 = vpop.f32.mrf.mxu2  ;;  %v1773_v23 = vpop.f32.mrf.mxu1  ;;  %v1685_v20 = vadd.f32 %v1684_v50, %v1596_v52 }
 0x1a2   : > { %v1370_v45 = vadd.f32 %v1369_v18, %v4403_v37 }
 0x1a3   : > { %v4554_v5 = vadd.f32 %v1773_v23, %v1685_v20  ;;  %1723 = vmatmul.bf16.gmra.mxu0 %v4942_v58  ;;  %2113 = vmatmul.bf16.vlgmr.msra.gmra.mxu3 %v3921_v27  ;;  %v4944_v27 = vld [vmem:[#allocation11_spill] sm:$0xff] }
 0x1a4   : > { %v1603_v41 = vadd.f32 %v1602_v31, %v1370_v45  ;;  %1812 = vmatmul.bf16.gmra.mxu1 %v4493_v15 }
 0x1a6   : > { %2024 = vmatmul.bf16.vlgmr.msra.gmra.mxu2 %v3879_v57  ;;  %v1605_v62 = vpop.f32.mrf.mxu3 }
 0x1a8   : > { %v1686_v49 = vpop.f32.mrf.mxu0 }
 0x1a9   : > { %v1372_v1 = vpop.f32.mrf.mxu2  ;;  %v4561_v37 = vpop.f32.mrf.mxu1  ;;  %v4563_v14 = vadd.f32 %v1686_v49, %v1598_v4 }
 0x1aa   : > { %v1373_v10 = vadd.f32 %v1372_v1, %v4408_v9  ;;  %v3519_v9 = vld [vmem:[%s4875_s3 + $0x18] sm:$0xff]  ;;  %v4945_v1 = vld [vmem:[#allocation17_spill] sm:$0xff] }
 0x1ab   : > { %2471 = vmatpush.bf16.msra.mxu1 %v3519_v9 }
 0x1ac   : > { %v1606_v52 = vadd.f32 %v1605_v62, %v1373_v10 }
 0x1ae   : > { %v1607_v18 = vpop.f32.mrf.mxu3 }
 0x1b0   : > { %v1689_v45 = vpop.f32.mrf.mxu0 }
 0x1b1   : > { %v1374_v36 = vpop.f32.mrf.mxu2  ;;  %v1778_v50 = vpop.f32.mrf.mxu1  ;;  %v1690_v23 = vadd.f32 %v1689_v45, %v1601_v12 }
 0x1b2   : > { %v1375_v31 = vadd.f32 %v1374_v36, %v4421_v25 }
 0x1b3   : > { %v4566_v20 = vadd.f32 %v1778_v50, %v1690_v23  ;;  %1728 = vmatmul.bf16.gmra.mxu0 %v4944_v27  ;;  %2118 = vmatmul.bf16.gmra.mxu3 %v3964_v0 }
 0x1b4   : > { %v1608_v57 = vadd.f32 %v1607_v18, %v1375_v31  ;;  %1817 = vmatmul.bf16.gmra.mxu1 %v4517_v61 }
 0x1b5   : > { %4943 = vst [vmem:[#allocation6_spill] sm:$0xff] %v4566_v20 }
 0x1b6   : > { %2029 = vmatmul.bf16.gmra.mxu2 %v3928_v30  ;;  %v1610_v4 = vpop.f32.mrf.mxu3 }
 0x1b8   : > { %v1691_v62 = vpop.f32.mrf.mxu0 }
 0x1b9   : > { %v1377_v25 = vpop.f32.mrf.mxu2  ;;  %v4576_v10 = vpop.f32.mrf.mxu1  ;;  %v4578_v49 = vadd.f32 %v1691_v62, %v1603_v41 }
 0x1ba   : > { %v1378_v12 = vadd.f32 %v1377_v25, %v4945_v1  ;;  %v4946_v25 = vld [vmem:[#allocation21_spill] sm:$0xff] }
 0x1bc   : > { %v1611_v36 = vadd.f32 %v1610_v4, %v1378_v12 }
 0x1be   : > { %v1612_v31 = vpop.f32.mrf.mxu3 }
 0x1c0   : > { %v1694_v50 = vpop.f32.mrf.mxu0 }
 0x1c1   : > { %v1379_v18 = vpop.f32.mrf.mxu2  ;;  %v1783_v23 = vpop.f32.mrf.mxu1  ;;  %v1695_v30 = vadd.f32 %v1694_v50, %v1606_v52 }
 0x1c2   : > { %v1380_v45 = vadd.f32 %v1379_v18, %v4253_v32 }
 0x1c3   : > { %v4581_v0 = vadd.f32 %v1783_v23, %v1695_v30  ;;  %2202 = vmatmul.bf16.vlgmr.msra.gmra.mxu0 %v4230_v63  ;;  %2123 = vmatmul.bf16.gmra.mxu3 %v4007_v44  ;;  %v4951_v44 = vld [vmem:[#allocation20_spill] sm:$0xff] }
 0x1c4   : > { %v1613_v20 = vadd.f32 %v1612_v31, %v1380_v45  ;;  %v4949_v31 = vld [vmem:[#allocation22_spill] sm:$0xff] }
 0x1c6   : > { %2034 = vmatmul.bf16.gmra.mxu2 %v3971_v3  ;;  %v1615_v41 = vpop.f32.mrf.mxu3 }
 0x1c8   : > { %v1696_v1 = vpop.f32.mrf.mxu0 }
 0x1c9   : > { %v1382_v9 = vpop.f32.mrf.mxu2  ;;  %v4587_v12 = vpop.f32.mrf.mxu1  ;;  %v4589_v32 = vadd.f32 %v1696_v1, %v1608_v57 }
 0x1ca   : > { %v1383_v4 = vadd.f32 %v1382_v9, %v4946_v25  ;;  %4947 = vst [vmem:[#allocation8_spill] sm:$0xff] %v4587_v12  ;;  %v3518_v9 = vld [vmem:[%s4875_s3 + $0x10] sm:$0xff] }
 0x1cb   : > { %4948 = vst [vmem:[#allocation11_spill] sm:$0xff] %v4589_v32  ;;  %v4952_v25 = vld [vmem:[#allocation7_spill] sm:$0xff]  ;;  %2472 = vmatpush.bf16.msra.mxu1 %v3518_v9  ;;  %v4958_v32 = vld [vmem:[#allocation9_spill] sm:$0xff] }
 0x1cc   : > { %v1616_v62 = vadd.f32 %v1615_v41, %v1383_v4  ;;  %v4953_v4 = vld [vmem:[#allocation24_spill] sm:$0xff]  ;;  %v4957_v9 = vld [vmem:[#allocation23_spill] sm:$0xff] }
 0x1ce   : > { %v1617_v18 = vpop.f32.mrf.mxu3 }
 0x1d0   : > { %v1699_v50 = vpop.f32.mrf.mxu0 }
 0x1d1   : > { %v1384_v52 = vpop.f32.mrf.mxu2  ;;  %v1788_v63 = vpop.f32.mrf.mxu1  ;;  %v1700_v23 = vadd.f32 %v1699_v50, %v1611_v36 }
 0x1d2   : > { %v1385_v45 = vadd.f32 %v1384_v52, %v4949_v31 }
 0x1d3   : > { %v4592_v30 = vadd.f32 %v1788_v63, %v1700_v23  ;;  %2207 = vmatmul.bf16.gmra.mxu0 %v4951_v44  ;;  %2128 = vmatmul.bf16.gmra.mxu3 %v4056_v34  ;;  %v4955_v63 = vld [vmem:[#allocation25_spill] sm:$0xff] }
 0x1d4   : > { %v1618_v3 = vadd.f32 %v1617_v18, %v1385_v45 }
 0x1d5   : > { %4950 = vst [vmem:[#allocation17_spill] sm:$0xff] %v4592_v30 }
 0x1d6   : > { %2039 = vmatmul.bf16.gmra.mxu2 %v4952_v25  ;;  %v1620_v41 = vpop.f32.mrf.mxu3 }
 0x1d8   : > { %v1701_v52 = vpop.f32.mrf.mxu0 }
 0x1d9   : > { %v1387_v57 = vpop.f32.mrf.mxu2  ;;  %v4601_v36 = vpop.f32.mrf.mxu1  ;;  %v4603_v18 = vadd.f32 %v1701_v52, %v1613_v20  ;;  %v4960_v52 = vld [vmem:[#allocation27_spill] sm:$0xff] }
 0x1da   : > { %v1388_v1 = vadd.f32 %v1387_v57, %v4953_v4  ;;  %4954 = vst [vmem:[#allocation21_spill] sm:$0xff] %v4601_v36  ;;  %v4959_v57 = vld [vmem:[#allocation10_spill] sm:$0xff] }
 0x1dc   : > { %v1621_v31 = vadd.f32 %v1620_v41, %v1388_v1 }
 0x1de   : > { %v1622_v50 = vpop.f32.mrf.mxu3 }
 0x1e0   : > { %v1704_v44 = vpop.f32.mrf.mxu0 }
 0x1e1   : > { %v1389_v45 = vpop.f32.mrf.mxu2  ;;  %v1793_v30 = vpop.f32.mrf.mxu1  ;;  %v1705_v25 = vadd.f32 %v1704_v44, %v1616_v62 }
 0x1e2   : > { %v1390_v23 = vadd.f32 %v1389_v45, %v4955_v63 }
 0x1e3   : > { %v4606_v34 = vadd.f32 %v1793_v30, %v1705_v25  ;;  %2212 = vmatmul.bf16.gmra.mxu0 %v4957_v9  ;;  %2133 = vmatmul.bf16.gmra.mxu3 %v4959_v57  ;;  %v4963_v30 = vld [vmem:[#allocation28_spill] sm:$0xff]  ;;  %v4965_v57 = vld [vmem:[#allocation26_spill] sm:$0xff] }
 0x1e4   : > { %v1623_v12 = vadd.f32 %v1622_v50, %v1390_v23 }
 0x1e5   : > { %4956 = vst [vmem:[#allocation22_spill] sm:$0xff] %v4606_v34 }
 0x1e6   : > { %2044 = vmatmul.bf16.gmra.mxu2 %v4958_v32  ;;  %v1625_v20 = vpop.f32.mrf.mxu3 }
 0x1e8   : > { %v1706_v1 = vpop.f32.mrf.mxu0 }
 0x1e9   : > { %v1392_v4 = vpop.f32.mrf.mxu2  ;;  %v4612_v36 = vpop.f32.mrf.mxu1  ;;  %v4614_v45 = vadd.f32 %v1706_v1, %v1618_v3 }
 0x1ea   : > { %v1393_v41 = vadd.f32 %v1392_v4, %v4960_v52  ;;  %4961 = vst [vmem:[#allocation20_spill] sm:$0xff] %v4612_v36  ;;  %v3517_v4 = vld [vmem:[%s4875_s3 + $0x8] sm:$0xff]  ;;  %v4966_v52 = vld [vmem:[#allocation12_spill] sm:$0xff] }
 0x1eb   : > { %4962 = vst [vmem:[#allocation7_spill] sm:$0xff] %v4614_v45  ;;  %2473 = vmatpush.bf16.msra.mxu1 %v3517_v4  ;;  %v4970_v4 = vld [vmem:[#allocation29_spill] sm:$0xff]  ;;  %v4971_v45 = vld [vmem:[#allocation14_spill] sm:$0xff] }
 0x1ec   : > { %v1626_v63 = vadd.f32 %v1625_v20, %v1393_v41  ;;  %v4967_v41 = vld [vmem:[#allocation30_spill] sm:$0xff] }
 0x1ee   : > { %v1627_v50 = vpop.f32.mrf.mxu3 }
 0x1f0   : > { %v1709_v44 = vpop.f32.mrf.mxu0 }
 0x1f1   : > { %v1394_v62 = vpop.f32.mrf.mxu2  ;;  %v1798_v25 = vpop.f32.mrf.mxu1  ;;  %v1710_v9 = vadd.f32 %v1709_v44, %v1621_v31 }
 0x1f2   : > { %v1395_v23 = vadd.f32 %v1394_v62, %v4963_v30 }
 0x1f3   : > { %v4617_v34 = vadd.f32 %v1798_v25, %v1710_v9  ;;  %2217 = vmatmul.bf16.gmra.mxu0 %v4965_v57  ;;  %2138 = vmatmul.bf16.gmra.mxu3 %v4147_v22  ;;  %v4968_v25 = vld [vmem:[#allocation31_spill] sm:$0xff] }
 0x1f4   : > { %v1628_v32 = vadd.f32 %v1627_v50, %v1395_v23 }
 0x1f5   : > { %4964 = vst [vmem:[#allocation24_spill] sm:$0xff] %v4617_v34 }
 0x1f6   : > { %2049 = vmatmul.bf16.gmra.mxu2 %v4966_v52  ;;  %v1630_v20 = vpop.f32.mrf.mxu3 }
 0x1f8   : > { %v1711_v62 = vpop.f32.mrf.mxu0 }
 0x1f9   : > { %v1397_v3 = vpop.f32.mrf.mxu2  ;;  %v4626_v31 = vpop.f32.mrf.mxu1  ;;  %v4628_v50 = vadd.f32 %v1711_v62, %v1623_v12 }
 0x1fa   : > { %v1398_v1 = vadd.f32 %v1397_v3, %v4967_v41  ;;  %v4972_v41 = vld [vmem:[#allocation32_spill] sm:$0xff] }
 0x1fc   : > { %v1631_v30 = vadd.f32 %v1630_v20, %v1398_v1 }
 0x1fe   : > { %v1632_v44 = vpop.f32.mrf.mxu3 }
 0x200   : > { %v1714_v57 = vpop.f32.mrf.mxu0 }
 0x201   : > { %v1399_v23 = vpop.f32.mrf.mxu2  ;;  %v1803_v34 = vpop.f32.mrf.mxu1  ;;  %v1715_v52 = vadd.f32 %v1714_v57, %v1626_v63 }
 0x202   : > { %v1400_v9 = vadd.f32 %v1399_v23, %v4968_v25 }
 0x203   : > { %v4631_v22 = vadd.f32 %v1803_v34, %v1715_v52  ;;  %2222 = vmatmul.bf16.gmra.mxu0 %v4970_v4  ;;  %2143 = vmatmul.bf16.gmra.mxu3 %v4192_v51  ;;  %v4974_v34 = vld [vmem:[#allocation33_spill] sm:$0xff] }
 0x204   : > { %v1633_v36 = vadd.f32 %v1632_v44, %v1400_v9  ;;  %v3516_v51 = vld [vmem:[%s4875_s3] sm:$0xff] }
 0x205   : > { %4969 = vst [vmem:[#allocation25_spill] sm:$0xff] %v4631_v22  ;;  %2474 = vmatpush.bf16.msra.mxu1 %v3516_v51  ;;  %v4979_v51 = vld [vmem:[#allocation34_spill] sm:$0xff] }
 0x206   : > { %2054 = vmatmul.bf16.gmra.mxu2 %v4971_v45  ;;  %v1635_v12 = vpop.f32.mrf.mxu3 }
 0x208   : > { %v1716_v1 = vpop.f32.mrf.mxu0 }
 0x209   : > { %v1402_v3 = vpop.f32.mrf.mxu2  ;;  %v4637_v62 = vpop.f32.mrf.mxu1  ;;  %v4639_v23 = vadd.f32 %v1716_v1, %v1628_v32 }
 0x20a   : > { %v1403_v20 = vadd.f32 %v1402_v3, %v4972_v41  ;;  %4973 = vst [vmem:[#allocation23_spill] sm:$0xff] %v4637_v62  ;;  %v4976_v3 = vld [vmem:[#allocation16_spill] sm:$0xff]  ;;  %v4977_v41 = vld [vmem:[#allocation35_spill] sm:$0xff]  ;;  %v4980_v62 = vld [vmem:[#allocation5_spill] sm:$0xff] }
 0x20c   : > { %v1636_v25 = vadd.f32 %v1635_v12, %v1403_v20 }
 0x20e   : > { %v1637_v44 = vpop.f32.mrf.mxu3 }
 0x210   : > { %v1719_v57 = vpop.f32.mrf.mxu0 }
 0x211   : > { %v1404_v63 = vpop.f32.mrf.mxu2  ;;  %v1808_v52 = vpop.f32.mrf.mxu1  ;;  %v1720_v4 = vadd.f32 %v1719_v57, %v1631_v30 }
 0x212   : > { %v1405_v9 = vadd.f32 %v1404_v63, %v4974_v34 }
 0x213   : > { %v4642_v22 = vadd.f32 %v1808_v52, %v1720_v4  ;;  %2227 = vmatmul.bf16.gmra.mxu0 %v4350_v35  ;;  %2148 = vmatmul.bf16.gmra.mxu3 %v4225_v47 }
 0x214   : > { %v1638_v45 = vadd.f32 %v1637_v44, %v1405_v9  ;;  %v4978_v9 = vld [vmem:[#allocation36_spill] sm:$0xff] }
 0x215   : > { %4975 = vst [vmem:[#allocation9_spill] sm:$0xff] %v4642_v22 }
 0x216   : > { %2059 = vmatmul.bf16.gmra.mxu2 %v4976_v3  ;;  %v1640_v12 = vpop.f32.mrf.mxu3 }
 0x218   : > { %v1721_v1 = vpop.f32.mrf.mxu0 }
 0x219   : > { %v1407_v32 = vpop.f32.mrf.mxu2  ;;  %v4651_v30 = vpop.f32.mrf.mxu1  ;;  %v4653_v63 = vadd.f32 %v1721_v1, %v1633_v36 }
 0x21a   : > { %v1408_v20 = vadd.f32 %v1407_v32, %v4977_v41 }
 0x21c   : > { %v1641_v44 = vadd.f32 %v1640_v12, %v1408_v20 }
 0x21e   : > { %v1642_v34 = vpop.f32.mrf.mxu3 }
 0x220   : > { %v1724_v52 = vpop.f32.mrf.mxu0 }
 0x221   : > { %v1409_v35 = vpop.f32.mrf.mxu2  ;;  %v1813_v4 = vpop.f32.mrf.mxu1  ;;  %v1725_v3 = vadd.f32 %v1724_v52, %v1636_v25 }
 0x222   : > { %v1410_v57 = vadd.f32 %v1409_v35, %v4978_v9 }
 0x223   : > { %v4656_v47 = vadd.f32 %v1813_v4, %v1725_v3  ;;  %2232 = vmatmul.bf16.gmra.mxu0 %v4979_v51  ;;  %2153 = vmatmul.bf16.gmra.mxu3 %v3875_v56 }
 0x224   : > { %v1643_v22 = vadd.f32 %v1642_v34, %v1410_v57 }
 0x226   : > { %2064 = vmatmul.bf16.gmra.mxu2 %v4980_v62  ;;  %v2114_v36 = vpop.f32.mrf.mxu3 }
 0x228   : > { %v1726_v41 = vpop.f32.mrf.mxu0 }
 0x229   : > { %v2025_v32 = vpop.f32.mrf.mxu2  ;;  %v4661_v12 = vpop.f32.mrf.mxu1  ;;  %v4663_v20 = vadd.f32 %v1726_v41, %v1638_v45 }
 0x22a   : > { %4981 = vst [vmem:[#allocation10_spill] sm:$0xff] %v4661_v12  ;;  %v2115_v45 = vadd.f32 %v2114_v36, %v2025_v32 }
 0x22e   : > { %v2116_v35 = vpop.f32.mrf.mxu3 }
 0x230   : > { %v1729_v9 = vpop.f32.mrf.mxu0 }
 0x231   : > { %v2027_v1 = vpop.f32.mrf.mxu2  ;;  %v1818_v25 = vpop.f32.mrf.mxu1  ;;  %v1730_v34 = vadd.f32 %v1729_v9, %v1641_v44 }
 0x233   : > { %v4665_v57 = vadd.f32 %v1818_v25, %v1730_v34  ;;  %2237 = vmatmul.bf16.gmra.mxu0 %v4393_v39  ;;  %2158 = vmatmul.bf16.gmra.mxu3 %v3924_v29  ;;  %v2117_v39 = vadd.f32 %v2116_v35, %v2027_v1  ;;  %v4679_v29 = vld [vmem:[%s4874_s2] ss:$0 sm:$0xff] }
 0x236   : > { %2069 = vmatmul.bf16.gmra.mxu2 %v3887_v60  ;;  %v2119_v62 = vpop.f32.mrf.mxu3  ;;  %v4982_v60 = vld [vmem:[#allocation37_spill] sm:$0xff] }
 0x238   : > { %v1731_v52 = vpop.f32.mrf.mxu0 }
 0x239   : > { %v2030_v56 = vpop.f32.mrf.mxu2  ;;  %v4670_v4 = vadd.f32 %v1731_v52, %v1643_v22 }
 0x23e   : > { %v2121_v51 = vpop.f32.mrf.mxu3 }
 0x240   : > { %v2203_v41 = vpop.f32.mrf.mxu0 }
 0x241   : > { %v2032_v3 = vpop.f32.mrf.mxu2  ;;  %v2204_v12 = vadd.f32 %v2203_v41, %v2115_v45 }
 0x243   : > { %2242 = vmatmul.bf16.gmra.mxu0 %v4411_v26  ;;  %2163 = vmatmul.bf16.gmra.mxu3 %v3967_v2  ;;  %v2283_v44 = vadd.f32 %v2204_v12, %v4982_v60  ;;  %v2120_v2 = vadd.f32 %v2119_v62, %v2030_v56 }
 0x245   : > { %v2319_v25 = vadd.f32 %v4679_v29, %v2283_v44 }
 0x246   : > { %2074 = vmatmul.bf16.gmra.mxu2 %v3933_v33  ;;  %v2124_v32 = vpop.f32.mrf.mxu3 }
 0x247   : > { %v2351_v34 = vmax.f32 %v2319_v25, 0.0 }
 0x248   : > { %v2205_v36 = vpop.f32.mrf.mxu0 }
 0x249   : > { %v2035_v22 = vpop.f32.mrf.mxu2  ;;  %v2206_v9 = vadd.f32 %v2205_v36, %v2117_v39  ;;  %v2122_v39 = vadd.f32 %v2121_v51, %v2032_v3 }
 0x24b   : > { %v2284_v26 = vadd.f32 %v2206_v9, %v4445_v59 }
 0x24d   : > { %v2320_v33 = vadd.f32 %v4679_v29, %v2284_v26 }
 0x24e   : > { %v2126_v12 = vpop.f32.mrf.mxu3 }
 0x24f   : > { %v2352_v1 = vmax.f32 %v2320_v33, 0.0 }
 0x250   : > { %v2208_v52 = vpop.f32.mrf.mxu0 }
 0x251   : > { %v2037_v35 = vpop.f32.mrf.mxu2  ;;  %v2383_v45 = vpack.c.bf16 %v2352_v1, %v2351_v34  ;;  %v2209_v41 = vadd.f32 %v2208_v52, %v2120_v2 }
 0x253   : > { %2247 = vmatmul.bf16.gmra.mxu0 %v4433_v19  ;;  %2475 = vmatmul.bf16.vlgmr.msra.gmra.mxu1 %v2383_v45  ;;  %v2285_v59 = vadd.f32 %v2209_v41, %v4453_v17  ;;  %v2125_v19 = vadd.f32 %v2124_v32, %v2035_v22  ;;  %v2127_v17 = vadd.f32 %v2126_v12, %v2037_v35 }
 0x254   : > { %2168 = vmatmul.bf16.gmra.mxu3 %v4941_v13 }
 0x255   : > { %v2321_v62 = vadd.f32 %v4679_v29, %v2285_v59 }
 0x256   : > { %2079 = vmatmul.bf16.gmra.mxu2 %v3976_v6  ;;  %v2129_v44 = vpop.f32.mrf.mxu3 }
 0x257   : > { %v2353_v26 = vmax.f32 %v2321_v62, 0.0 }
 0x258   : > { %v2210_v36 = vpop.f32.mrf.mxu0 }
 0x259   : > { %v2040_v60 = vpop.f32.mrf.mxu2  ;;  %v2211_v56 = vadd.f32 %v2210_v36, %v2122_v39 }
 0x25b   : > { %v2286_v9 = vadd.f32 %v2211_v56, %v4463_v46 }
 0x25d   : > { %v2322_v25 = vadd.f32 %v4679_v29, %v2286_v9 }
 0x25e   : > { %v2131_v6 = vpop.f32.mrf.mxu3 }
 0x25f   : > { %v2354_v33 = vmax.f32 %v2322_v25, 0.0 }
 0x260   : > { %v2213_v2 = vpop.f32.mrf.mxu0 }
 0x261   : > { %v2042_v34 = vpop.f32.mrf.mxu2  ;;  %v2384_v13 = vpack.c.bf16 %v2354_v33, %v2353_v26  ;;  %v2214_v3 = vadd.f32 %v2213_v2, %v2125_v19 }
 0x263   : > { %2252 = vmatmul.bf16.gmra.mxu0 %v4451_v28  ;;  %2480 = vmatmul.bf16.gmra.mxu1 %v2384_v13  ;;  %v2287_v46 = vadd.f32 %v2214_v3, %v4477_v7  ;;  %v2130_v28 = vadd.f32 %v2129_v44, %v2040_v60  ;;  %v2132_v7 = vadd.f32 %v2131_v6, %v2042_v34 }
 0x264   : > { %2173 = vmatmul.bf16.gmra.mxu3 %v4942_v58 }
 0x265   : > { %v2323_v32 = vadd.f32 %v4679_v29, %v2287_v46 }
 0x266   : > { %2084 = vmatmul.bf16.gmra.mxu2 %v4019_v48  ;;  %v2134_v1 = vpop.f32.mrf.mxu3 }
 0x267   : > { %v2355_v39 = vmax.f32 %v2323_v32, 0.0 }
 0x268   : > { %v2215_v52 = vpop.f32.mrf.mxu0 }
 0x269   : > { %v2045_v51 = vpop.f32.mrf.mxu2  ;;  %v2216_v22 = vadd.f32 %v2215_v52, %v2127_v17 }
 0x26b   : > { %v2288_v45 = vadd.f32 %v2216_v22, %v4487_v55 }
 0x26d   : > { %v2324_v41 = vadd.f32 %v4679_v29, %v2288_v45 }
 0x26e   : > { %v2136_v48 = vpop.f32.mrf.mxu3 }
 0x26f   : > { %v2356_v59 = vmax.f32 %v2324_v41, 0.0 }
 0x270   : > { %v2218_v56 = vpop.f32.mrf.mxu0 }
 0x271   : > { %v2047_v36 = vpop.f32.mrf.mxu2  ;;  %v2385_v58 = vpack.c.bf16 %v2356_v59, %v2355_v39  ;;  %v2219_v35 = vadd.f32 %v2218_v56, %v2130_v28 }
 0x272   : > { %v2137_v6 = vadd.f32 %v2136_v48, %v2047_v36  ;;  %v4984_v36 = vld [vmem:[#allocation15_spill] sm:$0xff] }
 0x273   : > { %2257 = vmatmul.bf16.gmra.mxu0 %v4475_v42  ;;  %2485 = vmatmul.bf16.gmra.mxu1 %v2385_v58  ;;  %v2289_v55 = vadd.f32 %v2219_v35, %v4495_v43  ;;  %v2135_v42 = vadd.f32 %v2134_v1, %v2045_v51  ;;  %v4983_v43 = vld [vmem:[#allocation13_spill] sm:$0xff]  ;;  %v1766_v51 = vadd.f32 %v4529_v8, %v4531_v54  ;;  %v4985_v8 = vld [vmem:[#allocation18_spill] sm:$0xff] }
 0x274   : > { %2178 = vmatmul.bf16.gmra.mxu3 %v4944_v27 }
 0x275   : > { %v2325_v44 = vadd.f32 %v4679_v29, %v2289_v55 }
 0x276   : > { %2089 = vmatmul.bf16.gmra.mxu2 %v4068_v38  ;;  %v2139_v62 = vpop.f32.mrf.mxu3 }
 0x277   : > { %v2357_v19 = vmax.f32 %v2325_v44, 0.0 }
 0x278   : > { %v2220_v9 = vpop.f32.mrf.mxu0 }
 0x279   : > { %v2050_v12 = vpop.f32.mrf.mxu2  ;;  %v2221_v60 = vadd.f32 %v2220_v9, %v2132_v7  ;;  %v1771_v7 = vadd.f32 %v4549_v11, %v4551_v16 }
 0x27a   : > { %v2140_v45 = vadd.f32 %v2139_v62, %v2050_v12 }
 0x27b   : > { %v2290_v25 = vadd.f32 %v2221_v60, %v4505_v24 }
 0x27d   : > { %v2326_v26 = vadd.f32 %v4679_v29, %v2290_v25 }
 0x27e   : > { %v2141_v38 = vpop.f32.mrf.mxu3 }
 0x27f   : > { %v2358_v33 = vmax.f32 %v2326_v26, 0.0 }
 0x280   : > { %v2223_v13 = vpop.f32.mrf.mxu0 }
 0x281   : > { %v2052_v2 = vpop.f32.mrf.mxu2  ;;  %v2386_v27 = vpack.c.bf16 %v2358_v33, %v2357_v19  ;;  %v2224_v34 = vadd.f32 %v2223_v13, %v2135_v42  ;;  %v4986_v33 = vld [vmem:[#allocation38_spill] sm:$0xff] }
 0x282   : > { %v2142_v54 = vadd.f32 %v2141_v38, %v2052_v2 }
 0x283   : > { %2262 = vmatmul.bf16.gmra.mxu0 %v4493_v15  ;;  %2490 = vmatmul.bf16.gmra.mxu1 %v2386_v27  ;;  %v2291_v24 = vadd.f32 %v2224_v34, %v4519_v21  ;;  %v1776_v27 = vadd.f32 %v4561_v37, %v4563_v14 }
 0x284   : > { %2183 = vmatmul.bf16.gmra.mxu3 %v4983_v43 }
 0x285   : > { %v2327_v52 = vadd.f32 %v4679_v29, %v2291_v24 }
 0x286   : > { %2094 = vmatmul.bf16.gmra.mxu2 %v4117_v40  ;;  %v2144_v17 = vpop.f32.mrf.mxu3 }
 0x287   : > { %v2359_v32 = vmax.f32 %v2327_v52, 0.0 }
 0x288   : > { %v2225_v46 = vpop.f32.mrf.mxu0 }
 0x289   : > { %v2055_v3 = vpop.f32.mrf.mxu2  ;;  %v2226_v1 = vadd.f32 %v2225_v46, %v2137_v6 }
 0x28a   : > { %v2145_v60 = vadd.f32 %v2144_v17, %v2055_v3 }
 0x28b   : > { %v2292_v22 = vadd.f32 %v2226_v1, %v1766_v51 }
 0x28d   : > { %v2328_v15 = vadd.f32 %v4679_v29, %v2292_v22 }
 0x28e   : > { %v2146_v39 = vpop.f32.mrf.mxu3 }
 0x28f   : > { %v2360_v40 = vmax.f32 %v2328_v15, 0.0  ;;  %v4987_v15 = vld [vmem:[#allocation19_spill] sm:$0xff] }
 0x290   : > { %v2228_v28 = vpop.f32.mrf.mxu0 }
 0x291   : > { %v2057_v41 = vpop.f32.mrf.mxu2  ;;  %v2387_v59 = vpack.c.bf16 %v2360_v40, %v2359_v32  ;;  %v2229_v21 = vadd.f32 %v2228_v28, %v2140_v45  ;;  %v4988_v45 = vld [vmem:[#allocation6_spill] sm:$0xff] }
 0x292   : > { %v2147_v2 = vadd.f32 %v2146_v39, %v2057_v41  ;;  %v1781_v39 = vadd.f32 %v4576_v10, %v4578_v49  ;;  %v4734_v49 = vpop.f32.mrf.mxu1 }
 0x293   : > { %2267 = vmatmul.bf16.gmra.mxu0 %v4517_v61  ;;  %2495 = vmatmul.bf16.gmra.mxu1 %v2387_v59  ;;  %v2293_v48 = vadd.f32 %v2229_v21, %v4539_v53 }
 0x294   : > { %2188 = vmatmul.bf16.gmra.mxu3 %v4985_v8 }
 0x295   : > { %v2329_v12 = vadd.f32 %v4679_v29, %v2293_v48 }
 0x296   : > { %2099 = vmatmul.bf16.gmra.mxu2 %v4984_v36  ;;  %v2149_v58 = vpop.f32.mrf.mxu3 }
 0x297   : > { %v2361_v9 = vmax.f32 %v2329_v12, 0.0 }
 0x298   : > { %v2230_v35 = vpop.f32.mrf.mxu0 }
 0x299   : > { %v2060_v56 = vpop.f32.mrf.mxu2  ;;  %v2231_v55 = vadd.f32 %v2230_v35, %v2142_v54 }
 0x29a   : > { %v2150_v17 = vadd.f32 %v2149_v58, %v2060_v56 }
 0x29b   : > { %v2294_v62 = vadd.f32 %v2231_v55, %v1771_v7 }
 0x29d   : > { %v2330_v61 = vadd.f32 %v4679_v29, %v2294_v62 }
 0x29e   : > { %v2151_v26 = vpop.f32.mrf.mxu3 }
 0x29f   : > { %v2362_v44 = vmax.f32 %v2330_v61, 0.0 }
 0x2a0   : > { %v2233_v19 = vpop.f32.mrf.mxu0 }
 0x2a1   : > { %v2062_v25 = vpop.f32.mrf.mxu2  ;;  %v2388_v42 = vpack.c.bf16 %v2362_v44, %v2361_v9  ;;  %v2234_v53 = vadd.f32 %v2233_v19, %v2145_v60  ;;  %v4989_v60 = vld [vmem:[#allocation11_spill] sm:$0xff]  ;;  %v4990_v44 = vld [vmem:[#allocation8_spill] sm:$0xff] }
 0x2a2   : > { %v2152_v32 = vadd.f32 %v2151_v26, %v2062_v25  ;;  %v1786_v25 = vadd.f32 %v4990_v44, %v4989_v60  ;;  %v4993_v44 = vld [vmem:[#allocation22_spill] sm:$0xff] }
 0x2a3   : > { %2272 = vmatmul.bf16.gmra.mxu0 %v4986_v33  ;;  %2500 = vmatmul.bf16.gmra.mxu1 %v2388_v42  ;;  %v2295_v11 = vadd.f32 %v2234_v53, %v4554_v5 }
 0x2a5   : > { %v2331_v43 = vadd.f32 %v4679_v29, %v2295_v11 }
 0x2a6   : > { %v2154_v38 = vpop.f32.mrf.mxu3 }
 0x2a7   : > { %v2363_v3 = vmax.f32 %v2331_v43, 0.0 }
 0x2a8   : > { %v2235_v13 = vpop.f32.mrf.mxu0 }
 0x2a9   : > { %v2065_v16 = vpop.f32.mrf.mxu2  ;;  %v2236_v34 = vadd.f32 %v2235_v13, %v2147_v2 }
 0x2aa   : > { %v2155_v54 = vadd.f32 %v2154_v38, %v2065_v16 }
 0x2ab   : > { %v2296_v6 = vadd.f32 %v2236_v34, %v1776_v27 }
 0x2ad   : > { %v2332_v24 = vadd.f32 %v4679_v29, %v2296_v6 }
 0x2ae   : > { %v2156_v1 = vpop.f32.mrf.mxu3 }
 0x2af   : > { %v2364_v46 = vmax.f32 %v2332_v24, 0.0 }
 0x2b0   : > { %v2238_v52 = vpop.f32.mrf.mxu0 }
 0x2b1   : > { %v2067_v51 = vpop.f32.mrf.mxu2  ;;  %v2389_v22 = vpack.c.bf16 %v2364_v46, %v2363_v3  ;;  %v2239_v5 = vadd.f32 %v2238_v52, %v2150_v17  ;;  %v4991_v3 = vld [vmem:[#allocation17_spill] sm:$0xff] }
 0x2b2   : > { %v2157_v12 = vadd.f32 %v2156_v1, %v2067_v51  ;;  %v4992_v52 = vld [vmem:[#allocation21_spill] sm:$0xff] }
 0x2b3   : > { %2277 = vmatmul.bf16.gmra.mxu0 %v4987_v15  ;;  %2505 = vmatmul.bf16.gmra.mxu1 %v2389_v22  ;;  %v2297_v37 = vadd.f32 %v2239_v5, %v4988_v45  ;;  %v1791_v22 = vadd.f32 %v4992_v52, %v4603_v18 }
 0x2b5   : > { %v2333_v59 = vadd.f32 %v4679_v29, %v2297_v37 }
 0x2b6   : > { %v2159_v40 = vpop.f32.mrf.mxu3 }
 0x2b7   : > { %v2365_v8 = vmax.f32 %v2333_v59, 0.0 }
 0x2b8   : > { %v2240_v41 = vpop.f32.mrf.mxu0 }
 0x2b9   : > { %v2070_v14 = vpop.f32.mrf.mxu2  ;;  %v2241_v28 = vadd.f32 %v2240_v41, %v2152_v32 }
 0x2ba   : > { %v2160_v2 = vadd.f32 %v2159_v40, %v2070_v14 }
 0x2bb   : > { %v2298_v21 = vadd.f32 %v2241_v28, %v1781_v39 }
 0x2bd   : > { %v2334_v36 = vadd.f32 %v4679_v29, %v2298_v21 }
 0x2be   : > { %v2161_v58 = vpop.f32.mrf.mxu3 }
 0x2bf   : > { %v2366_v48 = vmax.f32 %v2334_v36, 0.0 }
 0x2c0   : > { %v2243_v35 = vpop.f32.mrf.mxu0 }
 0x2c1   : > { %v2072_v56 = vpop.f32.mrf.mxu2  ;;  %v2390_v7 = vpack.c.bf16 %v2366_v48, %v2365_v8  ;;  %v2244_v55 = vadd.f32 %v2243_v35, %v2155_v54 }
 0x2c2   : > { %v2162_v24 = vadd.f32 %v2161_v58, %v2072_v56 }
 0x2c3   : > { %2510 = vmatmul.bf16.gmra.mxu1 %v2390_v7  ;;  %v2299_v62 = vadd.f32 %v2244_v55, %v4581_v0  ;;  %v4743_v0 = vld [vmem:[%s4876_s4] ss:$0 sm:$0xff] }
 0x2c5   : > { %v2335_v19 = vadd.f32 %v4679_v29, %v2299_v62 }
 0x2c6   : > { %v2164_v10 = vpop.f32.mrf.mxu3 }
 0x2c7   : > { %v2367_v33 = vmax.f32 %v2335_v19, 0.0  ;;  %v4994_v19 = vld [vmem:[#allocation7_spill] sm:$0xff] }
 0x2c8   : > { %v2245_v9 = vpop.f32.mrf.mxu0 }
 0x2c9   : > { %v2075_v61 = vpop.f32.mrf.mxu2  ;;  %v2246_v26 = vadd.f32 %v2245_v9, %v2157_v12 }
 0x2ca   : > { %v2165_v59 = vadd.f32 %v2164_v10, %v2075_v61 }
 0x2cb   : > { %v2300_v42 = vadd.f32 %v2246_v26, %v1786_v25 }
 0x2cd   : > { %v2336_v53 = vadd.f32 %v4679_v29, %v2300_v42  ;;  %v4995_v42 = vld [vmem:[#allocation20_spill] sm:$0xff] }
 0x2ce   : > { %v2166_v38 = vpop.f32.mrf.mxu3 }
 0x2cf   : > { %v2368_v11 = vmax.f32 %v2336_v53, 0.0  ;;  %v1796_v53 = vadd.f32 %v4995_v42, %v4994_v19 }
 0x2d0   : > { %v2248_v13 = vpop.f32.mrf.mxu0  ;;  %v2476_v27 = vpop.f32.mrf.mxu1 }
 0x2d1   : > { %v2077_v16 = vpop.f32.mrf.mxu2  ;;  %v2391_v34 = vpack.c.bf16 %v2368_v11, %v2367_v33  ;;  %v2249_v43 = vadd.f32 %v2248_v13, %v2160_v2  ;;  %v2477_v6 = vadd.f32 %v4743_v0, %v2476_v27 }
 0x2d2   : > { %v2167_v60 = vadd.f32 %v2166_v38, %v2077_v16 }
 0x2d3   : > { %2515 = vmatmul.bf16.gmra.mxu1 %v2391_v34  ;;  %v2301_v17 = vadd.f32 %v2249_v43, %v4991_v3  ;;  %v2556_v46 = vmax.f32 %v2477_v6, 1e-06 }
 0x2d5   : > { %v2337_v37 = vadd.f32 %v4679_v29, %v2301_v17  ;;  %v2588_v14 = vmul.f32 %v2556_v46, %v2556_v46 }
 0x2d7   : > { %v2169_v45 = vpop.f32.mrf.mxu3  ;;  %v2369_v21 = vmax.f32 %v2337_v37, 0.0  ;;  %v2620_v36 = vmul.f32 %v2588_v14, %v2556_v46 }
 0x2d8   : > { %v2250_v51 = vpop.f32.mrf.mxu0  ;;  %v2478_v1 = vpop.f32.mrf.mxu1 }
 0x2d9   : > { %v2251_v5 = vadd.f32 %v2250_v51, %v2162_v24  ;;  %v2479_v15 = vadd.f32 %v4743_v0, %v2478_v1  ;;  %v2080_v32 = vpop.f32.mrf.mxu2 }
 0x2da   : > { %v2170_v3 = vadd.f32 %v2169_v45, %v2080_v32  ;;  %v1801_v45 = vadd.f32 %v4626_v31, %v4628_v50 }
 0x2db   : > { %v2302_v40 = vadd.f32 %v2251_v5, %v1791_v22  ;;  %v2557_v41 = vmax.f32 %v2479_v15, 1e-06 }
 0x2dd   : > { %v2338_v39 = vadd.f32 %v4679_v29, %v2302_v40  ;;  %v2589_v28 = vmul.f32 %v2557_v41, %v2557_v41 }
 0x2df   : > { %v2370_v8 = vmax.f32 %v2338_v39, 0.0  ;;  %v2621_v54 = vmul.f32 %v2589_v28, %v2557_v41  ;;  %v2171_v62 = vpop.f32.mrf.mxu3  ;;  %v4996_v41 = vld [vmem:[#allocation24_spill] sm:$0xff] }
 0x2e0   : > { %v2253_v48 = vpop.f32.mrf.mxu0  ;;  %v2481_v18 = vpop.f32.mrf.mxu1 }
 0x2e1   : > { %v2652_v56 = vadd.f32 %v2621_v54, %v2620_v36  ;;  %v2482_v58 = vadd.f32 %v4743_v0, %v2481_v18  ;;  %v2392_v35 = vpack.c.bf16 %v2370_v8, %v2369_v21  ;;  %v2254_v7 = vadd.f32 %v2253_v48, %v2165_v59  ;;  %v2082_v12 = vpop.f32.mrf.mxu2 }
 0x2e2   : > { %v2172_v40 = vadd.f32 %v2171_v62, %v2082_v12 }
 0x2e3   : > { %v2558_v55 = vmax.f32 %v2482_v58, 1e-06  ;;  %2520 = vmatmul.bf16.gmra.mxu1 %v2392_v35  ;;  %v2303_v25 = vadd.f32 %v2254_v7, %v4993_v44 }
 0x2e5   : > { %v2590_v9 = vmul.f32 %v2558_v55, %v2558_v55  ;;  %v2339_v13 = vadd.f32 %v4679_v29, %v2303_v25 }
 0x2e7   : > { %v2622_v61 = vmul.f32 %v2590_v9, %v2558_v55  ;;  %v2174_v38 = vpop.f32.mrf.mxu3  ;;  %v2371_v24 = vmax.f32 %v2339_v13, 0.0 }
 0x2e8   : > { %v2255_v10 = vpop.f32.mrf.mxu0  ;;  %v2483_v26 = vpop.f32.mrf.mxu1 }
 0x2e9   : > { %v2653_v33 = vadd.f32 %v2652_v56, %v2622_v61  ;;  %v2256_v2 = vadd.f32 %v2255_v10, %v2167_v60  ;;  %v2484_v11 = vadd.f32 %v4743_v0, %v2483_v26  ;;  %v2085_v16 = vpop.f32.mrf.mxu2 }
 0x2ea   : > { %v2175_v12 = vadd.f32 %v2174_v38, %v2085_v16 }
 0x2eb   : > { %v2304_v27 = vadd.f32 %v2256_v2, %v1796_v53  ;;  %v2559_v34 = vmax.f32 %v2484_v11, 1e-06 }
 0x2ed   : > { %v2340_v43 = vadd.f32 %v4679_v29, %v2304_v27  ;;  %v2591_v6 = vmul.f32 %v2559_v34, %v2559_v34 }
 0x2ef   : > { %v2372_v17 = vmax.f32 %v2340_v43, 0.0  ;;  %v2623_v46 = vmul.f32 %v2591_v6, %v2559_v34  ;;  %v2176_v21 = vpop.f32.mrf.mxu3  ;;  %v4998_v34 = vld [vmem:[#allocation23_spill] sm:$0xff] }
 0x2f0   : > { %v2258_v51 = vpop.f32.mrf.mxu0  ;;  %v2486_v1 = vpop.f32.mrf.mxu1  ;;  %v1806_v43 = vadd.f32 %v4998_v34, %v4639_v23 }
 0x2f1   : > { %v2654_v52 = vadd.f32 %v2653_v33, %v2623_v46  ;;  %v2487_v22 = vadd.f32 %v4743_v0, %v2486_v1  ;;  %v2393_v5 = vpack.c.bf16 %v2372_v17, %v2371_v24  ;;  %v2259_v15 = vadd.f32 %v2258_v51, %v2170_v3  ;;  %v2087_v59 = vpop.f32.mrf.mxu2  ;;  %v4997_v33 = vld [vmem:[#allocation25_spill] sm:$0xff] }
 0x2f2   : > { %v2177_v53 = vadd.f32 %v2176_v21, %v2087_v59 }
 0x2f3   : > { %v2560_v37 = vmax.f32 %v2487_v22, 1e-06  ;;  %2525 = vmatmul.bf16.gmra.mxu1 %v2393_v5  ;;  %v2305_v39 = vadd.f32 %v2259_v15, %v4996_v41 }
 0x2f5   : > { %v2592_v14 = vmul.f32 %v2560_v37, %v2560_v37  ;;  %v2341_v18 = vadd.f32 %v4679_v29, %v2305_v39 }
 0x2f7   : > { %v2624_v28 = vmul.f32 %v2592_v14, %v2560_v37  ;;  %v2373_v55 = vmax.f32 %v2341_v18, 0.0  ;;  %v2179_v10 = vpop.f32.mrf.mxu3 }
 0x2f8   : > { %v2260_v36 = vpop.f32.mrf.mxu0  ;;  %v2488_v32 = vpop.f32.mrf.mxu1 }
 0x2f9   : > { %v2655_v8 = vadd.f32 %v2654_v52, %v2624_v28  ;;  %v2261_v54 = vadd.f32 %v2260_v36, %v2172_v40  ;;  %v2489_v48 = vadd.f32 %v4743_v0, %v2488_v32  ;;  %v2090_v61 = vpop.f32.mrf.mxu2 }
 0x2fa   : > { %v2180_v5 = vadd.f32 %v2179_v10, %v2090_v61 }
 0x2fb   : > { %v2306_v56 = vadd.f32 %v2261_v54, %v1801_v45  ;;  %v2561_v58 = vmax.f32 %v2489_v48, 1e-06 }
 0x2fd   : > { %v2342_v35 = vadd.f32 %v4679_v29, %v2306_v56  ;;  %v2593_v7 = vmul.f32 %v2561_v58, %v2561_v58 }
 0x2ff   : > { %v2374_v62 = vmax.f32 %v2342_v35, 0.0  ;;  %v2625_v9 = vmul.f32 %v2593_v7, %v2561_v58  ;;  %v2181_v51 = vpop.f32.mrf.mxu3  ;;  %v1811_v58 = vadd.f32 %v4651_v30, %v4653_v63 }
 0x300   : > { %v2263_v60 = vpop.f32.mrf.mxu0  ;;  %v2491_v44 = vpop.f32.mrf.mxu1 }
 0x301   : > { %v2656_v25 = vadd.f32 %v2655_v8, %v2625_v9  ;;  %v2492_v31 = vadd.f32 %v4743_v0, %v2491_v44  ;;  %v2394_v50 = vpack.c.bf16 %v2374_v62, %v2373_v55  ;;  %v2264_v26 = vadd.f32 %v2263_v60, %v2175_v12  ;;  %v2092_v46 = vpop.f32.mrf.mxu2  ;;  %v4999_v8 = vld [vmem:[#allocation9_spill] sm:$0xff] }
 0x302   : > { %v2182_v45 = vadd.f32 %v2181_v51, %v2092_v46 }
 0x303   : > { %v2562_v19 = vmax.f32 %v2492_v31, 1e-06  ;;  %2530 = vmatmul.bf16.gmra.mxu1 %v2394_v50  ;;  %v2307_v2 = vadd.f32 %v2264_v26, %v4997_v33 }
 0x305   : > { %v2594_v42 = vmul.f32 %v2562_v19, %v2562_v19  ;;  %v2343_v24 = vadd.f32 %v4679_v29, %v2307_v2 }
 0x307   : > { %v2626_v11 = vmul.f32 %v2594_v42, %v2562_v19  ;;  %v2375_v22 = vmax.f32 %v2343_v24, 0.0  ;;  %v2184_v32 = vpop.f32.mrf.mxu3 }
 0x308   : > { %v2265_v13 = vpop.f32.mrf.mxu0  ;;  %v2493_v27 = vpop.f32.mrf.mxu1 }
 0x309   : > { %v2657_v6 = vadd.f32 %v2656_v25, %v2626_v11  ;;  %v2266_v16 = vadd.f32 %v2265_v13, %v2177_v53  ;;  %v2494_v38 = vadd.f32 %v4743_v0, %v2493_v27  ;;  %v2095_v36 = vpop.f32.mrf.mxu2 }
 0x30a   : > { %v2185_v31 = vadd.f32 %v2184_v32, %v2095_v36 }
 0x30b   : > { %v2308_v3 = vadd.f32 %v2266_v16, %v1806_v43  ;;  %v2563_v17 = vmax.f32 %v2494_v38, 1e-06  ;;  %v5000_v16 = vld [vmem:[#allocation10_spill] sm:$0xff] }
 0x30c   : > { %v1816_v38 = vadd.f32 %v5000_v16, %v4663_v20 }
 0x30d   : > { %v2344_v1 = vadd.f32 %v4679_v29, %v2308_v3  ;;  %v2595_v52 = vmul.f32 %v2563_v17, %v2563_v17 }
 0x30f   : > { %v2376_v15 = vmax.f32 %v2344_v1, 0.0  ;;  %v2627_v37 = vmul.f32 %v2595_v52, %v2563_v17  ;;  %v2186_v26 = vpop.f32.mrf.mxu3 }
 0x310   : > { %v2268_v14 = vpop.f32.mrf.mxu0  ;;  %v2496_v40 = vpop.f32.mrf.mxu1 }
 0x311   : > { %v2658_v23 = vadd.f32 %v2657_v6, %v2627_v37  ;;  %v2497_v41 = vadd.f32 %v4743_v0, %v2496_v40  ;;  %v2395_v39 = vpack.c.bf16 %v2376_v15, %v2375_v22  ;;  %v2269_v28 = vadd.f32 %v2268_v14, %v2180_v5  ;;  %v2097_v10 = vpop.f32.mrf.mxu2 }
 0x312   : > { %v2187_v13 = vadd.f32 %v2186_v26, %v2097_v10 }
 0x313   : > { %v2564_v59 = vmax.f32 %v2497_v41, 1e-06  ;;  %2535 = vmatmul.bf16.gmra.mxu1 %v2395_v39  ;;  %v2309_v54 = vadd.f32 %v2269_v28, %v4999_v8 }
 0x315   : > { %v2596_v21 = vmul.f32 %v2564_v59, %v2564_v59  ;;  %v2345_v12 = vadd.f32 %v4679_v29, %v2309_v54 }
 0x317   : > { %v2628_v48 = vmul.f32 %v2596_v21, %v2564_v59  ;;  %v2377_v25 = vmax.f32 %v2345_v12, 0.0  ;;  %v2189_v51 = vpop.f32.mrf.mxu3 }
 0x318   : > { %v2270_v18 = vpop.f32.mrf.mxu0  ;;  %v2498_v56 = vpop.f32.mrf.mxu1 }
 0x319   : > { %v2659_v35 = vadd.f32 %v2658_v23, %v2628_v48  ;;  %v2271_v7 = vadd.f32 %v2270_v18, %v2182_v45  ;;  %v2499_v55 = vadd.f32 %v4743_v0, %v2498_v56  ;;  %v2100_v46 = vpop.f32.mrf.mxu2 }
 0x31a   : > { %v2190_v37 = vadd.f32 %v2189_v51, %v2100_v46 }
 0x31b   : > { %v2310_v62 = vadd.f32 %v2271_v7, %v1811_v58  ;;  %v2565_v9 = vmax.f32 %v2499_v55, 1e-06  ;;  %v1821_v58 = vadd.f32 %v4734_v49, %v4670_v4 }
 0x31d   : > { %v2346_v60 = vadd.f32 %v4679_v29, %v2310_v62  ;;  %v2597_v44 = vmul.f32 %v2565_v9, %v2565_v9 }
 0x31f   : > { %v2378_v50 = vmax.f32 %v2346_v60, 0.0  ;;  %v2629_v61 = vmul.f32 %v2597_v44, %v2565_v9  ;;  %v2191_v32 = vpop.f32.mrf.mxu3 }
 0x320   : > { %v2273_v19 = vpop.f32.mrf.mxu0  ;;  %v2501_v42 = vpop.f32.mrf.mxu1 }
 0x321   : > { %v2660_v30 = vadd.f32 %v2659_v35, %v2629_v61  ;;  %v2502_v63 = vadd.f32 %v4743_v0, %v2501_v42  ;;  %v2396_v53 = vpack.c.bf16 %v2378_v50, %v2377_v25  ;;  %v2274_v33 = vadd.f32 %v2273_v19, %v2185_v31  ;;  %v2102_v36 = vpop.f32.mrf.mxu2 }
 0x322   : > { %v2192_v8 = vadd.f32 %v2191_v32, %v2102_v36 }
 0x323   : > { %v2566_v2 = vmax.f32 %v2502_v63, 1e-06  ;;  %2540 = vmatmul.bf16.gmra.mxu1 %v2396_v53  ;;  %v2311_v27 = vadd.f32 %v2274_v33, %v4656_v47 }
 0x325   : > { %v2598_v11 = vmul.f32 %v2566_v2, %v2566_v2  ;;  %v2347_v1 = vadd.f32 %v4679_v29, %v2311_v27 }
 0x327   : > { %v2630_v34 = vmul.f32 %v2598_v11, %v2566_v2  ;;  %v2379_v47 = vmax.f32 %v2347_v1, 0.0 }
 0x328   : > { %v2275_v43 = vpop.f32.mrf.mxu0  ;;  %v2503_v6 = vpop.f32.mrf.mxu1 }
 0x329   : > { %v2661_v24 = vadd.f32 %v2660_v30, %v2630_v34  ;;  %v2276_v3 = vadd.f32 %v2275_v43, %v2187_v13  ;;  %v2504_v17 = vadd.f32 %v4743_v0, %v2503_v6 }
 0x32b   : > { %v2312_v52 = vadd.f32 %v2276_v3, %v1816_v38  ;;  %v2567_v22 = vmax.f32 %v2504_v17, 1e-06 }
 0x32d   : > { %v2348_v5 = vadd.f32 %v4679_v29, %v2312_v52  ;;  %v2599_v15 = vmul.f32 %v2567_v22, %v2567_v22 }
 0x32f   : > { %v2380_v14 = vmax.f32 %v2348_v5, 0.0  ;;  %v2631_v40 = vmul.f32 %v2599_v15, %v2567_v22 }
 0x330   : > { %v2278_v23 = vpop.f32.mrf.mxu0  ;;  %v2506_v41 = vpop.f32.mrf.mxu1 }
 0x331   : > { %v2662_v20 = vadd.f32 %v2661_v24, %v2631_v40  ;;  %v2507_v39 = vadd.f32 %v4743_v0, %v2506_v41  ;;  %v2397_v28 = vpack.c.bf16 %v2380_v14, %v2379_v47  ;;  %v2279_v59 = vadd.f32 %v2278_v23, %v2190_v37 }
 0x333   : > { %v2568_v21 = vmax.f32 %v2507_v39, 1e-06  ;;  %2545 = vmatmul.bf16.gmra.mxu1 %v2397_v28  ;;  %v2313_v54 = vadd.f32 %v2279_v59, %v4665_v57 }
 0x335   : > { %v2600_v45 = vmul.f32 %v2568_v21, %v2568_v21  ;;  %v2349_v12 = vadd.f32 %v4679_v29, %v2313_v54 }
 0x337   : > { %v2632_v48 = vmul.f32 %v2600_v45, %v2568_v21  ;;  %v2381_v25 = vmax.f32 %v2349_v12, 0.0 }
 0x338   : > { %v2280_v18 = vpop.f32.mrf.mxu0  ;;  %v2508_v56 = vpop.f32.mrf.mxu1 }
 0x339   : > { %v2663_v35 = vadd.f32 %v2662_v20, %v2632_v48  ;;  %v2281_v7 = vadd.f32 %v2280_v18, %v2192_v8  ;;  %v2509_v55 = vadd.f32 %v4743_v0, %v2508_v56  ;;  %v3531_v48 = vld [vmem:[%s4877_s5 + $0x38] sm:$0xff] }
 0x33a   : > { %2792 = vmatpush.bf16.msrb.mxu2 %v3531_v48 }
 0x33b   : > { %v2314_v62 = vadd.f32 %v2281_v7, %v1821_v58  ;;  %v2569_v9 = vmax.f32 %v2509_v55, 1e-06 }
 0x33d   : > { %v2350_v60 = vadd.f32 %v4679_v29, %v2314_v62  ;;  %v2601_v44 = vmul.f32 %v2569_v9, %v2569_v9 }
 0x33f   : > { %v2382_v31 = vmax.f32 %v2350_v60, 0.0  ;;  %v2633_v57 = vmul.f32 %v2601_v44, %v2569_v9 }
 0x340   : > { %v2511_v50 = vpop.f32.mrf.mxu1 }
 0x341   : > { %v2664_v61 = vadd.f32 %v2663_v35, %v2633_v57  ;;  %v2512_v10 = vadd.f32 %v4743_v0, %v2511_v50  ;;  %v2398_v26 = vpack.c.bf16 %v2382_v31, %v2381_v25 }
 0x343   : > { %v2570_v4 = vmax.f32 %v2512_v10, 1e-06  ;;  %2550 = vmatmul.bf16.gmra.mxu1 %v2398_v26 }
 0x345   : > { %v2602_v49 = vmul.f32 %v2570_v4, %v2570_v4 }
 0x347   : > { %v2634_v19 = vmul.f32 %v2602_v49, %v2570_v4 }
 0x348   : > { %v2513_v42 = vpop.f32.mrf.mxu1 }
 0x349   : > { %v2665_v30 = vadd.f32 %v2664_v61, %v2634_v19  ;;  %v2514_v63 = vadd.f32 %v4743_v0, %v2513_v42 }
 0x34b   : > { %v2571_v53 = vmax.f32 %v2514_v63, 1e-06 }
 0x34d   : > { %v2603_v33 = vmul.f32 %v2571_v53, %v2571_v53 }
 0x34f   : > { %v2635_v29 = vmul.f32 %v2603_v33, %v2571_v53 }
 0x350   : > { %v2516_v2 = vpop.f32.mrf.mxu1 }
 0x351   : > { %v2666_v11 = vadd.f32 %v2665_v30, %v2635_v29  ;;  %v2517_v13 = vadd.f32 %v4743_v0, %v2516_v2 }
 0x353   : > { %v2572_v27 = vmax.f32 %v2517_v13, 1e-06 }
 0x355   : > { %v2604_v34 = vmul.f32 %v2572_v27, %v2572_v27 }
 0x357   : > { %v2636_v43 = vmul.f32 %v2604_v34, %v2572_v27 }
 0x358   : > { %v2518_v6 = vpop.f32.mrf.mxu1 }
 0x359   : > { %v2667_v16 = vadd.f32 %v2666_v11, %v2636_v43  ;;  %v2519_v38 = vadd.f32 %v4743_v0, %v2518_v6 }
 0x35b   : > { %v2573_v24 = vmax.f32 %v2519_v38, 1e-06 }
 0x35d   : > { %v2605_v3 = vmul.f32 %v2573_v24, %v2573_v24 }
 0x35f   : > { %v2637_v17 = vmul.f32 %v2605_v3, %v2573_v24 }
 0x360   : > { %v2521_v46 = vpop.f32.mrf.mxu1 }
 0x361   : > { %v2668_v51 = vadd.f32 %v2667_v16, %v2637_v17  ;;  %v2522_v1 = vadd.f32 %v4743_v0, %v2521_v46  ;;  %v3530_v16 = vld [vmem:[%s4877_s5 + $0x30] sm:$0xff] }
 0x362   : > { %2793 = vmatpush.bf16.msrb.mxu2 %v3530_v16 }
 0x363   : > { %v2574_v52 = vmax.f32 %v2522_v1, 1e-06  ;;  %v3529_v1 = vld [vmem:[%s4877_s5 + $0x28] sm:$0xff] }
 0x365   : > { %v2606_v22 = vmul.f32 %v2574_v52, %v2574_v52 }
 0x366   : > { %2794 = vmatpush.bf16.msrb.mxu2 %v3529_v1 }
 0x367   : > { %v2638_v5 = vmul.f32 %v2606_v22, %v2574_v52 }
 0x368   : > { %v2523_v15 = vpop.f32.mrf.mxu1 }
 0x369   : > { %v2669_v47 = vadd.f32 %v2668_v51, %v2638_v5  ;;  %v2524_v37 = vadd.f32 %v4743_v0, %v2523_v15 }
 0x36b   : > { %v2575_v14 = vmax.f32 %v2524_v37, 1e-06 }
 0x36d   : > { %v2607_v40 = vmul.f32 %v2575_v14, %v2575_v14 }
 0x36f   : > { %v2639_v23 = vmul.f32 %v2607_v40, %v2575_v14  ;;  %v3528_v40 = vld [vmem:[%s4877_s5 + $0x20] sm:$0xff] }
 0x370   : > { %v2526_v41 = vpop.f32.mrf.mxu1  ;;  %2795 = vmatpush.bf16.msrb.mxu2 %v3528_v40 }
 0x371   : > { %v2670_v20 = vadd.f32 %v2669_v47, %v2639_v23  ;;  %v2527_v39 = vadd.f32 %v4743_v0, %v2526_v41 }
 0x373   : > { %v2576_v28 = vmax.f32 %v2527_v39, 1e-06 }
 0x375   : > { %v2608_v59 = vmul.f32 %v2576_v28, %v2576_v28 }
 0x377   : > { %v2640_v21 = vmul.f32 %v2608_v59, %v2576_v28 }
 0x378   : > { %v2528_v36 = vpop.f32.mrf.mxu1 }
 0x379   : > { %v2671_v32 = vadd.f32 %v2670_v20, %v2640_v21  ;;  %v2529_v35 = vadd.f32 %v4743_v0, %v2528_v36 }
 0x37b   : > { %v2577_v55 = vmax.f32 %v2529_v35, 1e-06 }
 0x37d   : > { %v2609_v44 = vmul.f32 %v2577_v55, %v2577_v55 }
 0x37f   : > { %v2641_v10 = vmul.f32 %v2609_v44, %v2577_v55 }
 0x380   : > { %v2531_v45 = vpop.f32.mrf.mxu1 }
 0x381   : > { %v2532_v7 = vadd.f32 %v4743_v0, %v2531_v45  ;;  %v2672_v33 = vadd.f32 %v2671_v32, %v2641_v10 }
 0x383   : > { %v2578_v9 = vmax.f32 %v2532_v7, 1e-06 }
 0x385   : > { %v2610_v57 = vmul.f32 %v2578_v9, %v2578_v9 }
 0x387   : > { %v2642_v42 = vmul.f32 %v2610_v57, %v2578_v9  ;;  %v3525_v57 = vld [vmem:[%s4877_s5 + $0x8] sm:$0xff] }
 0x388   : > { %v2533_v8 = vpop.f32.mrf.mxu1 }
 0x389   : > { %v2534_v12 = vadd.f32 %v4743_v0, %v2533_v8  ;;  %v2673_v27 = vadd.f32 %v2672_v33, %v2642_v42  ;;  %v2691_v42 = vlaneseq }
 0x38b   : > { %v2579_v25 = vmax.f32 %v2534_v12, 1e-06 }
 0x38d   : > { %v2611_v26 = vmul.f32 %v2579_v25, %v2579_v25 }
 0x38f   : > { %v2643_v29 = vmul.f32 %v2611_v26, %v2579_v25  ;;  %v3527_v25 = vld [vmem:[%s4877_s5 + $0x18] sm:$0xff] }
 0x390   : > { %v2536_v54 = vpop.f32.mrf.mxu1  ;;  %2796 = vmatpush.bf16.msrb.mxu2 %v3527_v25 }
 0x391   : > { %v2537_v60 = vadd.f32 %v4743_v0, %v2536_v54  ;;  %v2674_v38 = vadd.f32 %v2673_v27, %v2643_v29 }
 0x393   : > { %v2580_v50 = vmax.f32 %v2537_v60, 1e-06 }
 0x395   : > { %v2612_v30 = vmul.f32 %v2580_v50, %v2580_v50 }
 0x397   : > { %v2644_v34 = vmul.f32 %v2612_v30, %v2580_v50 }
 0x398   : > { %v2538_v18 = vpop.f32.mrf.mxu1 }
 0x399   : > { %v2539_v31 = vadd.f32 %v4743_v0, %v2538_v18  ;;  %v2675_v52 = vadd.f32 %v2674_v38, %v2644_v34 }
 0x39b   : > { %v2581_v49 = vmax.f32 %v2539_v31, 1e-06  ;;  %v3526_v31 = vld [vmem:[%s4877_s5 + $0x10] sm:$0xff] }
 0x39c   : > { %2797 = vmatpush.bf16.msrb.mxu2 %v3526_v31 }
 0x39d   : > { %v2613_v2 = vmul.f32 %v2581_v49, %v2581_v49 }
 0x39f   : > { %v2645_v3 = vmul.f32 %v2613_v2, %v2581_v49 }
 0x3a0   : > { %v2541_v56 = vpop.f32.mrf.mxu1  ;;  %2798 = vmatpush.bf16.msrb.mxu2 %v3525_v57 }
 0x3a1   : > { %v2542_v61 = vadd.f32 %v4743_v0, %v2541_v56  ;;  %v2676_v47 = vadd.f32 %v2675_v52, %v2645_v3 }
 0x3a3   : > { %v2582_v63 = vmax.f32 %v2542_v61, 1e-06 }
 0x3a5   : > { %v2614_v43 = vmul.f32 %v2582_v63, %v2582_v63 }
 0x3a7   : > { %v2646_v22 = vmul.f32 %v2614_v43, %v2582_v63 }
 0x3a8   : > { %v2543_v58 = vpop.f32.mrf.mxu1 }
 0x3a9   : > { %v2544_v19 = vadd.f32 %v4743_v0, %v2543_v58  ;;  %v2677_v23 = vadd.f32 %v2676_v47, %v2646_v22 }
 0x3ab   : > { %v2583_v11 = vmax.f32 %v2544_v19, 1e-06 }
 0x3ad   : > { %v2615_v17 = vmul.f32 %v2583_v11, %v2583_v11 }
 0x3af   : > { %v2647_v37 = vmul.f32 %v2615_v17, %v2583_v11 }
 0x3b0   : > { %v2546_v62 = vpop.f32.mrf.mxu1 }
 0x3b1   : > { %v2547_v53 = vadd.f32 %v4743_v0, %v2546_v62  ;;  %v2678_v28 = vadd.f32 %v2677_v23, %v2647_v37 }
 0x3b3   : > { %v2584_v6 = vmax.f32 %v2547_v53, 1e-06  ;;  %v2692_v53 = vand.u32 127, %v2691_v42 }
 0x3b5   : > { %v2616_v5 = vmul.f32 %v2584_v6, %v2584_v6  ;;  %vm2693_vm9 = vcmp.lt.s32.totalorder %v2692_v53, 16 }
 0x3b7   : > { %v2648_v41 = vmul.f32 %v2616_v5, %v2584_v6  ;;  %v3524_v6 = vld [vmem:[%s4877_s5] sm:$0xff] }
 0x3b8   : > { %v2548_v4 = vpop.f32.mrf.mxu1  ;;  %2799 = vmatpush.bf16.msrb.mxu2 %v3524_v6 }
 0x3b9   : > { %v2549_v13 = vadd.f32 %v4743_v0, %v2548_v4  ;;  %v2679_v36 = vadd.f32 %v2678_v28, %v2648_v41 }
 0x3bb   : > { %v2585_v46 = vmax.f32 %v2549_v13, 1e-06 }
 0x3bd   : > { %v2617_v14 = vmul.f32 %v2585_v46, %v2585_v46 }
 0x3bf   : > { %v2649_v59 = vmul.f32 %v2617_v14, %v2585_v46 }
 0x3c0   : > { %v2551_v24 = vpop.f32.mrf.mxu1 }
 0x3c1   : > { %v2552_v51 = vadd.f32 %v4743_v0, %v2551_v24  ;;  %v2680_v8 = vadd.f32 %v2679_v36, %v2649_v59 }
 0x3c3   : > { %v2586_v15 = vmax.f32 %v2552_v51, 1e-06 }
 0x3c5   : > { %v2618_v20 = vmul.f32 %v2586_v15, %v2586_v15 }
 0x3c7   : > { %v2650_v32 = vmul.f32 %v2618_v20, %v2586_v15 }
 0x3c8   : > { %v2553_v39 = vpop.f32.mrf.mxu1 }
 0x3c9   : > { %v2554_v21 = vadd.f32 %v4743_v0, %v2553_v39  ;;  %v2681_v48 = vadd.f32 %v2680_v8, %v2650_v32  ;;  %v2743_v32 = vld [vmem:[%s4878_s6] sm:$0x1] }
 0x3cb   : > { %v2587_v45 = vmax.f32 %v2554_v21, 1e-06 }
 0x3cd   : > { %v2619_v54 = vmul.f32 %v2587_v45, %v2587_v45 }
 0x3cf   : > { %v2651_v18 = vmul.f32 %v2619_v54, %v2587_v45 }
 0x3d1   : > { %v2682_v56 = vadd.f32 %v2681_v48, %v2651_v18 }
 0x3d3   : > { %v2683_v58 = vrot.slane %v2682_v56, 4 }
 0x3d5   : > { %v2684_v35 = vadd.f32 %v2683_v58, %v2682_v56 }
 0x3d7   : > { %v2685_v7 = vrot.slane %v2684_v35, 2 }
 0x3d9   : > { %v2686_v55 = vadd.f32 %v2685_v7, %v2684_v35 }
 0x3db   : > { %v2687_v12 = vrot.slane %v2686_v55, 1 }
 0x3dd   : > { %v2688_v62 = vadd.f32 %v2687_v12, %v2686_v55 }
 0x3df   : > { %v2689_v9 = vmul.f32 0.00390625, %v2688_v62 }
 0x3e1   : > { %v3550_v60 = vand.u32 2147483647, %v2689_v9  ;;  %v3567_v33 = vand.u32 2147483648, %v2689_v9  ;;  %vm3549_vm7 = vcmp.lt.f32.partialorder %v2689_v9, 0.0  ;;  %vm3548_vm8 = vcmp.eq.f32.partialorder %v2689_v9, 0.0 }
 0x3e3   : > { %3614 = vlog2.f32 %v3550_v60  ;;  %vm3564_vm5 = vweird.f32 %v3550_v60  ;;  %vm3566_vm6 = vcmp.eq.f32.partialorder %v3550_v60, 0.0  ;;  %vm3551_vm10 = vcmp.eq.f32.partialorder %v3550_v60, inf }
 0x3e9   : > { %v3615_v44 = vpop.eup %3614 }
 0x3ea   : > { %v3554_v0 = vmul.f32 -0.33333334, %v3615_v44 }
 0x3ec   : > { %3616 = vpow2.f32 %v3554_v0 }
 0x3f2   : > { %v3617_v50 = vpop.eup %3616 }
 0x3f3   : > { %v3556_v61 = vmul.f32 %v3617_v50, %v3617_v50 }
 0x3f5   : > { %v3557_v10 = vmul.f32 %v3556_v61, %v3550_v60 }
 0x3f7   : > { %v3558_v26 = vmul.f32 %v3557_v10, %v3556_v61 }
 0x3f9   : > { %v3559_v4 = vsub.f32 %v3558_v26, %v3617_v50 }
 0x3fb   : > { %v3560_v49 = vmul.f32 -0.33333334, %v3559_v4 }
 0x3fd   : > { %v3561_v19 = vadd.f32 %v3617_v50, %v3560_v49 }
 0x3ff   : > { %v3562_v30 = vmul.f32 %v3561_v19, %v2689_v9 }
 0x401   : > { %v3563_v63 = vmul.f32 %v3562_v30, %v3561_v19 }
 0x403   : > { %v3565_v29 = vsel %vm3564_vm5, %v2689_v9, %v3563_v63 }
 0x404   : > { %v3568_v2 = vsel %vm3566_vm6, %v3567_v33, %v3565_v29 }
 0x405   : > { %v3569_v11 = vsel %vm3549_vm7, nan, %v3568_v2 }
 0x406   : > { %v3570_v13 = vsel %vm3548_vm8, 0.0, %v3569_v11 }
 0x407   : > { %v3571_v27 = vsel %vm3551_vm10, inf, %v3570_v13 }
 0x408   : > { %v2694_v34 = vsel %vm2693_vm9, %v3571_v27, 0.0 }
 0x409   : > { %v2695_v43 = vmul.f32 %v2694_v34, %v2694_v34 }
 0x40b   : > { %2696 = vadd.xlane.f32.xlu0 %v2695_v43 }
 0x47e   : > { %v2697_v16 = vpop.xlane.xlu0 %2696 }
 0x47f   : > { %3618 = vrsqrt.f32 %v2697_v16  ;;  %vm2705_vm11 = vcmp.eq.f32.partialorder %v2697_v16, inf  ;;  %v2708_v52 = vand.u32 2147483648, %v2697_v16  ;;  %vm2707_vm12 = vcmp.eq.f32.partialorder %v2697_v16, 0.0 }
 0x485   : > { %v3619_v38 = vpop.eup %3618 }
 0x486   : > { %v2699_v24 = vmul.f32 %v3619_v38, %v2697_v16 }
 0x488   : > { %v2700_v3 = vmul.f32 %v3619_v38, %v2699_v24 }
 0x48a   : > { %v2701_v17 = vmul.f32 0.5, %v2700_v3 }
 0x48c   : > { %v2702_v46 = vsub.f32 1.5, %v2701_v17 }
 0x48e   : > { %v2703_v51 = vmul.f32 %v3619_v38, %v2702_v46 }
 0x490   : > { %v2704_v1 = vmul.f32 %v2703_v51, %v2697_v16 }
 0x492   : > { %v2706_v22 = vsel %vm2705_vm11, %v2697_v16, %v2704_v1 }
 0x493   : > { %v2709_v5 = vsel %vm2707_vm12, %v2708_v52, %v2706_v22 }
 0x494   : > { %v2710_v15 = vadd.f32 1e-06, %v2709_v5 }
 0x496   : > { %3620 = vrcp.f32 %v2710_v15  ;;  %v2722_v40 = vand.u32 2147483648, %v2710_v15  ;;  %v2720_v41 = vand.u32 2147483647, %v2710_v15  ;;  %vm2716_vm14 = vweird.f32 %v2710_v15 }
 0x498   : > { %v2723_v39 = vor.u32 1.1754944e-38, %v2722_v40  ;;  %vm2721_vm1 = vcmp.eq.f32.partialorder %v2720_v41, 8.507059e+37 }
 0x49c   : > { %v3621_v47 = vpop.eup %3620 }
 0x49d   : > { %v2712_v37 = vmul.f32 %v3621_v47, %v2710_v15  ;;  %vm2717_vm13 = vweird.f32 %v3621_v47 }
 0x49e   : > { %vm2718_vm15 = vmor %vm2716_vm14, %vm2717_vm13 }
 0x49f   : > { %v2713_v14 = vsub.f32 1.0, %v2712_v37 }
 0x4a1   : > { %v2714_v23 = vmul.f32 %v3621_v47, %v2713_v14 }
 0x4a3   : > { %v2715_v20 = vadd.f32 %v3621_v47, %v2714_v23 }
 0x4a5   : > { %v2719_v28 = vsel %vm2718_vm15, %v3621_v47, %v2715_v20 }
 0x4a6   : > { %v2724_v59 = vsel %vm2721_vm1, %v2723_v39, %v2719_v28 }
 0x4a7   : > { %v2725_v21 = vmul.f32 %v2724_v59, %v2694_v34 }
 0x4a9   : > { %v2726_v36 = vpack.c.bf16 %v2725_v21, %v2725_v21 }
 0x4ab   : > { %2800 = vmatmul.bf16.vlgmr.msrb.gmra.mxu2 %v2726_v36 }
 0x52e   : > { %v2801_v45 = vpop.f32.mrf.mxu2 }
 0x52f   : > { %v2802_v8 = vadd.f32 %v2801_v45, %v2743_v32 }
 0x531   : > { %v2805_v54 = vmul.f32 %v2802_v8, %v2802_v8 }
 0x533   : > { %v2807_v48 = vsel %vm542_vm0, %v2805_v54, 0.0 }
 0x534   : > { %2808 = vadd.xlane.f32.xlu0 %v2807_v48 }
 0x536   : > { %v2803_v18 = vpop.f32.mrf.mxu2 }
 0x5a7   : > { %v2809_v56 = vpop.xlane.xlu0 %2808 }
 0x5a8   : > { %3622 = vrsqrt.f32 %v2809_v56  ;;  %vm2817_vm2 = vcmp.eq.f32.partialorder %v2809_v56, inf  ;;  %v2820_v60 = vand.u32 2147483648, %v2809_v56  ;;  %vm2819_vm3 = vcmp.eq.f32.partialorder %v2809_v56, 0.0 }
 0x5ae   : > { %v3623_v58 = vpop.eup %3622 }
 0x5af   : > { %v2811_v35 = vmul.f32 %v3623_v58, %v2809_v56 }
 0x5b1   : > { %v2812_v7 = vmul.f32 %v3623_v58, %v2811_v35 }
 0x5b3   : > { %v2813_v55 = vmul.f32 0.5, %v2812_v7 }
 0x5b5   : > { %v2814_v12 = vsub.f32 1.5, %v2813_v55 }
 0x5b7   : > { %v2815_v62 = vmul.f32 %v3623_v58, %v2814_v12 }
 0x5b9   : > { %v2816_v9 = vmul.f32 %v2815_v62, %v2809_v56 }
 0x5bb   : > { %v2818_v44 = vsel %vm2817_vm2, %v2809_v56, %v2816_v9 }
 0x5bc   : > { %v2821_v0 = vsel %vm2819_vm3, %v2820_v60, %v2818_v44 }
 0x5bd   : > { %v2822_v25 = vadd.f32 1e-06, %v2821_v0 }
 0x5bf   : > { %3624 = vrcp.f32 %v2822_v25  ;;  %v2834_v61 = vand.u32 2147483648, %v2822_v25  ;;  %v2832_v26 = vand.u32 2147483647, %v2822_v25  ;;  %vm2828_vm4 = vweird.f32 %v2822_v25 }
 0x5c1   : > { %v2835_v49 = vor.u32 1.1754944e-38, %v2834_v61  ;;  %vm2833_vm6 = vcmp.eq.f32.partialorder %v2832_v26, 8.507059e+37 }
 0x5c5   : > { %v3625_v31 = vpop.eup %3624 }
 0x5c6   : > { %v2824_v57 = vmul.f32 %v3625_v31, %v2822_v25  ;;  %vm2829_vm0 = vweird.f32 %v3625_v31 }
 0x5c7   : > { %vm2830_vm5 = vmor %vm2828_vm4, %vm2829_vm0 }
 0x5c8   : > { %v2825_v50 = vsub.f32 1.0, %v2824_v57 }
 0x5ca   : > { %v2826_v10 = vmul.f32 %v3625_v31, %v2825_v50 }
 0x5cc   : > { %v2827_v4 = vadd.f32 %v3625_v31, %v2826_v10 }
 0x5ce   : > { %v2831_v19 = vsel %vm2830_vm5, %v3625_v31, %v2827_v4 }
 0x5cf   : > { %v2836_v42 = vsel %vm2833_vm6, %v2835_v49, %v2831_v19 }
 0x5d0   : > { %v2837_v30 = vmul.f32 %v2836_v42, %v2802_v8 }
 0x5d2   : > { %2838 = vst [vmem:[%s270_s14] sm:$0x1] %v2837_v30 }
 0x5d3   : > { %3653 = shalt.err (!%p3650_p3)
}
 0x5d4   : > { %3572 = dma.vmem_to_hbm [thread:$0]  (%p3769_p5), %s2851_s15, 16, %s2853_s13, %s2840_s16  }
 0x5d5 PF: > { %p3578_p4 = scmp.ge.s32.totalorder %s3688_s27, 2  ;;  %s2864_s23 = sand.u32 1, %s3676_s24  }
 0x5d6   : > { %s2865_s29 = scalar_lea.sflag [#allocation3], %s2864_s23 }
 0x5d7   : > { %p3575_p7 = pnand %p3578_p4, %p3773_p6 }
 0x5d9   : > { %p3576_p8 = pneg %p3575_p7 }
 0x5db   : > { %3671 = dma.done.wait (%p3576_p8), %s2865_s29, 16  }
 0x5dc   : > { %3673 = vsyncadd (%p3576_p8), %s2865_s29, 4294967280  ;;  %p17_p9 = scmp.ge.s32.totalorder %s3756_s30, 4   ;;  %s5001_s24 = smov %s3680_s25 }
 0x5dd   : > { %s5002_s25 = smov %s3684_s26  ;;  %s5003_s26 = smov %s3767_s10 }
 0x5de   : > { %s5004_s27 = smov %s3756_s30  ;;  %19 = sbr.rel (!%p17_p9) target bundleno = 3 (0x3), region = 85 }
 0x5e3   :  { %2870 = vsyncpa [#allocation3], 1 }
 0x5e4   :  { %2872 = vsyncpa [#allocation3 + $0x1], 1 }

</bundles_post_ra>
